<compile_context>
chip_gen: v5e
topology: v5e:2x2
jax: 0.10.0
libtpu: 0.0.40
codegen_flags: <defaults>
</compile_context>

<pallas_src>
import jax
import jax.numpy as jnp
from jax.experimental import pallas as pl
from jax.experimental.pallas import tpu as pltpu

_LANE = 128
_FASTPATH_ELEMS = 1 << 14          # below ~16K elements, launch overhead dominates
_TARGET_BLOCK_BYTES = 4 * 1024 * 1024  # safe double-buffered on v5e/v6e/v7x


def _quant_kernel(x_ref, o_ref):
    # Compute in f32 in-register (matches torch.round's f32 half-to-even
    # behaviour), cast back to the streamed dtype on store.  The divide stays
    # a true divide for bit parity with torch; it is hidden under DMA anyway.
    x = x_ref[...].astype(jnp.float32)
    x = jnp.clip(x, 0.0, 1.0)
    o_ref[...] = (jnp.round(x * 255.0) / 255.0).astype(o_ref.dtype)


def _quant_ref(x: jax.Array) -> jax.Array:
    """Plain-JAX reference / tiny-tensor fast path (identical semantics)."""
    xf = jnp.clip(x.astype(jnp.float32), 0.0, 1.0)
    return (jnp.round(xf * 255.0) / 255.0).astype(x.dtype)


def _num_tensorcores() -> int:
    """Best-effort TensorCores-per-chip (2 on v7x, 1 on v5e/v6e). Never raises."""
    try:
        info = pltpu.get_tpu_info()
        for attr in ("num_cores", "core_count", "tensorcore_count", "num_tensorcores"):
            v = getattr(info, attr, None)
            if isinstance(v, int) and v > 0:
                return v
    except Exception:
        pass
    try:
        kind = jax.devices()[0].device_kind.lower()
        if "v7" in kind:
            return 2
    except Exception:
        pass
    return 1


def _round_up(x: int, m: int) -> int:
    return -(-x // m) * m


def _pick_block_rows(rows: int, itemsize: int, num_cores: int) -> int:
    # dtype-native sublane multiple: 8 (f32), 16 (bf16/f16), 32 (int8/fp8).
    sub = max(8, (8 * 4) // max(1, itemsize))
    target = max(sub, (_TARGET_BLOCK_BYTES // (_LANE * itemsize)) // sub * sub)
    if num_cores <= 1:
        # Single TensorCore: a full-extent block (always legal) when it fits
        # the target avoids all per-step overhead; otherwise ~4 MiB tiles.
        return rows if rows <= target else target
    # Multi-TensorCore (v7x): >= 4 blocks per core so both cores stream data
    # and each core's double-buffer pipeline actually overlaps.
    min_steps = 4 * num_cores
    per_step = max(sub, _round_up(-(-rows // min_steps), sub))
    return min(target, per_step)


def quantization(x: jax.Array) -> jax.Array:
    """Elementwise 8-bit quantization, same forward semantics as Quant.apply."""
    n = x.size
    if n == 0:
        return x
    if n < _FASTPATH_ELEMS or n % _LANE != 0:
        # Tiny or lane-ragged: plain XLA elementwise is faster than a kernel
        # launch, avoids padding copies, and lets XLA fuse with neighbours.
        return _quant_ref(x)

    rows = n // _LANE
    x2d = x.reshape(rows, _LANE)           # free row-major reshape, no pad/copy
    itemsize = x.dtype.itemsize

    block_rows = _pick_block_rows(rows, itemsize, _num_tensorcores())
    grid = (pl.cdiv(rows, block_rows),)    # ragged last block -> masked stores

    out2d = pl.pallas_call(
        _quant_kernel,
        out_shape=jax.ShapeDtypeStruct((rows, _LANE), x.dtype),
        grid_spec=pltpu.PrefetchScalarGridSpec(
            num_scalar_prefetch=0,
            grid=grid,
            in_specs=[pl.BlockSpec((block_rows, _LANE), lambda i: (i, 0))],
            out_specs=pl.BlockSpec((block_rows, _LANE), lambda i: (i, 0)),
        ),
        compiler_params=pltpu.CompilerParams(
            dimension_semantics=("parallel",),
            vmem_limit_bytes=32 * 1024 * 1024,
        ),
        cost_estimate=pl.CostEstimate(
            flops=5 * n, transcendentals=0, bytes_accessed=2 * n * itemsize
        ),
    )(x2d)

    return out2d.reshape(x.shape)


# TODO(synk): Quant.backward is a straight-through estimator (identity grad);
# only the forward pass is implemented here.


if __name__ == "__main__":
    key = jax.random.PRNGKey(0)
    k1, k2, k3 = jax.random.split(key, 3)

    # Small NCHW input (module convention) — exercises the tiny-tensor fast path.
    x_small = jax.random.uniform(
        k1, (2, 4, 16, 16), dtype=jnp.float32, minval=-0.25, maxval=1.25
    )
    # Larger NCHW input — exercises the Pallas kernel path.
    x_large = jax.random.uniform(
        k2, (2, 4, 128, 192), dtype=jnp.float32, minval=-0.25, maxval=1.25
    )

    for x in (x_small, x_large):
        y = jax.block_until_ready(quantization(x))
        ref = jnp.round(jnp.clip(x, 0.0, 1.0) * 255.0) / 255.0
        assert y.shape == x.shape and y.dtype == x.dtype
        assert float(jnp.max(jnp.abs(y - ref))) < 1e-6

    # bf16 input — exercises the dtype-native sublane rounding on the kernel path.
    x_bf16 = jax.random.uniform(
        k3, (2, 4, 128, 192), dtype=jnp.float32, minval=-0.25, maxval=1.25
    ).astype(jnp.bfloat16)
    y_bf16 = jax.block_until_ready(quantization(x_bf16))
    ref_bf16 = _quant_ref(x_bf16)
    assert y_bf16.shape == x_bf16.shape and y_bf16.dtype == x_bf16.dtype
    assert float(jnp.max(jnp.abs(
        y_bf16.astype(jnp.float32) - ref_bf16.astype(jnp.float32)))) < 1e-6

    print("KERNEL_OK")
</pallas_src>

<mosaic_0001>
module attributes {stable_mosaic.version = 11 : i64} {
  func.func @_quant_kernel(%arg0: i32, %arg1: memref<1536x128xf32, #tpu.memory_space<vmem>>, %arg2: memref<1536x128xf32, #tpu.memory_space<vmem>>) attributes {dimension_semantics = [#tpu.dimension_semantics<parallel>], iteration_bounds = array<i64: 1>, scalar_prefetch = 0 : i64, scratch_operands = 0 : i64, tpu.core_type = #tpu.core_type<tc>, window_params = [{transform_indices = @transform_0, window_bounds = array<i64: 1536, 128>}, {transform_indices = @transform_1, window_bounds = array<i64: 1536, 128>}]} {
    %c0 = arith.constant 0 : index
    %c0_0 = arith.constant 0 : index
    %0 = vector.load %arg1[%c0, %c0_0] : memref<1536x128xf32, #tpu.memory_space<vmem>>, vector<1536x128xf32>
    %cst = arith.constant 0.000000e+00 : f32
    %cst_1 = arith.constant 1.000000e+00 : f32
    %1 = vector.broadcast %cst : f32 to vector<1536x128xf32>
    %2 = arith.maximumf %1, %0 : vector<1536x128xf32>
    %3 = vector.broadcast %cst_1 : f32 to vector<1536x128xf32>
    %4 = arith.minimumf %3, %2 : vector<1536x128xf32>
    %cst_2 = arith.constant 2.550000e+02 : f32
    %5 = vector.broadcast %cst_2 : f32 to vector<1536x128xf32>
    %6 = arith.mulf %4, %5 : vector<1536x128xf32>
    %7 = math.roundeven %6 : vector<1536x128xf32>
    %cst_3 = arith.constant 2.550000e+02 : f32
    %8 = vector.broadcast %cst_3 : f32 to vector<1536x128xf32>
    %9 = arith.divf %7, %8 : vector<1536x128xf32>
    %c0_4 = arith.constant 0 : index
    %c0_5 = arith.constant 0 : index
    %10 = vector.load %arg2[%c0_4, %c0_5] : memref<1536x128xf32, #tpu.memory_space<vmem>>, vector<1536x128xf32>
    tpu.vector_store %arg2[%c0_4, %c0_5], %9 {strides = array<i32>} : memref<1536x128xf32, #tpu.memory_space<vmem>>, vector<1536x128xf32>,
    return
  }
  func.func @transform_0(%arg0: i32) -> (i32, i32) {
    %c0_i32 = arith.constant 0 : i32
    %c0_i32_0 = arith.constant 0 : i32
    return %arg0, %c0_i32 : i32, i32
  }
  func.func @transform_1(%arg0: i32) -> (i32, i32) {
    %c0_i32 = arith.constant 0 : i32
    %c0_i32_0 = arith.constant 0 : i32
    return %arg0, %c0_i32 : i32, i32
  }
}

</mosaic_0001>

<bundles_post_ra>
// kernel: tpu_custom_call.1
= control target key start
LH: loop header
LB: loop body
LE: loop exit
PB: predicated region body
PF: predicated region fallthrough
CT: control target
= control target key end

     0   :  { %6 = vsyncpa [#allocation3], 0  ;;  %s4373_s0 = inlined_call_operand.hbm [shape: f32[1536,128], index: 0, kind: input, shape index: {}]   ;;  %s4374_s1 = inlined_call_operand.hbm [shape: f32[1536,128], index: 1, kind: output, shape index: {}]  }
   0x1   :  { %7 = vsyncpa [#allocation4], 0  ;;  %s12_s8 = sshll.u32 %s4373_s0, 4  ;;  %s2990_s9 = smov [#allocation2]   ;;  %s13_s8 = int_to_ptr.hbm [resolvable:$true] %s12_s8 }
   0x2   :  { %s14_s10 = sshll.u32 %s2990_s9, 4  ;;  %s2991_s11 = smov 128   ;;  %s15_s10 = int_to_ptr.vmem [resolvable:$true] %s14_s10 }
   0x3   :  { %s2992_s12 = smov 8  }
   0x4   :  { %20 = dma.hbm_to_vmem [thread:$0]  %s13_s8, 24576, %s15_s10, [#allocation3], %s2991_s11, %s2991_s11, %s2992_s12  }
   0x5   :  { %2986 = dma.done.wait [#allocation3], 24576  }
   0x6   :  { %2987 = vsyncadd [#allocation3], 4294942720  ;;  %v2993_v0 = vmov 255.0   ;;  %v25_v2 = vld [vmem:[#allocation2] sm:$0xff]  ;;  %v26_v3 = vld [vmem:[#allocation2 + $0x8] sm:$0xff]  ;;  %s2994_s0 = smov [#allocation5]  }
   0x7   :  { %2936 = vrcp.f32 %v2993_v0  ;;  %v27_v4 = vld [vmem:[#allocation2 + $0x10] sm:$0xff]  ;;  %v217_v5 = vmax.f32 %v25_v2, 0.0  ;;  %v218_v7 = vmax.f32 %v26_v3, 0.0  ;;  %v28_v8 = vld [vmem:[#allocation2 + $0x18] sm:$0xff]  ;;  %v29_v9 = vld [vmem:[#allocation2 + $0x20] sm:$0xff]  ;;  %s1380_s13 = sshll.u32 %s2994_s0, 4  ;;  %s1381_s13 = int_to_ptr.vmem [resolvable:$true] %s1380_s13 }
   0x8   :  { %v30_v10 = vld [vmem:[#allocation2 + $0x28] sm:$0xff]  ;;  %v219_v11 = vmax.f32 %v27_v4, 0.0  ;;  %v220_v12 = vmax.f32 %v28_v8, 0.0  ;;  %v221_v13 = vmax.f32 %v29_v9, 0.0  ;;  %v31_v15 = vld [vmem:[#allocation2 + $0x30] sm:$0xff]  ;;  %v32_v8 = vld [vmem:[#allocation2 + $0x38] sm:$0xff] }
   0x9   :  { %v222_v14 = vmax.f32 %v30_v10, 0.0  ;;  %v409_v16 = vmin.f32 %v217_v5, 1.0  ;;  %v410_v18 = vmin.f32 %v218_v7, 1.0  ;;  %v223_v19 = vmax.f32 %v31_v15, 0.0  ;;  %v33_v9 = vld [vmem:[#allocation2 + $0x40] sm:$0xff]  ;;  %s1382_s16 = sshll.u32 %s4374_s1, 4  ;;  %s1383_s16 = int_to_ptr.hbm [resolvable:$true] %s1382_s16 }
   0xa   :  { %v411_v20 = vmin.f32 %v219_v11, 1.0  ;;  %v412_v21 = vmin.f32 %v220_v12, 1.0  ;;  %v413_v22 = vmin.f32 %v221_v13, 1.0 }
   0xb   :  { %v414_v23 = vmin.f32 %v222_v14, 1.0  ;;  %v601_v24 = vmul.f32 255.0, %v409_v16  ;;  %v602_v26 = vmul.f32 255.0, %v410_v18  ;;  %v415_v27 = vmin.f32 %v223_v19, 1.0  ;;  %v34_v14 = vld [vmem:[#allocation2 + $0x48] sm:$0xff] }
   0xc   :  { %v603_v28 = vmul.f32 255.0, %v411_v20  ;;  %v604_v29 = vmul.f32 255.0, %v412_v21  ;;  %v3011_v30 = vmul.f32 255.0, %v413_v22  ;;  %v224_v21 = vmax.f32 %v32_v8, 0.0 }
   0xd   :  { %v2937_v1 = vpop.eup %2936  ;;  %v3013_v31 = vmul.f32 255.0, %v414_v23  ;;  %v1395_v32 = vand.u32 2147483647, %v601_v24  ;;  %v1397_v33 = vcvt.f32.s32 %v601_v24  ;;  %v1400_v34 = vand.u32 2147483648, %v601_v24 }
   0xe   :  { %v986_v6 = vmul.f32 255.0, %v2937_v1  ;;  %vm990_vm0 = vweird.f32 %v2937_v1  ;;  %v1403_v36 = vand.u32 2147483647, %v602_v26  ;;  %v1405_v37 = vcvt.f32.s32 %v602_v26 }
   0xf   :  { %v1408_v38 = vand.u32 2147483648, %v602_v26  ;;  %v1411_v39 = vand.u32 2147483647, %v603_v28  ;;  %vm3015_vm1 = vcmp.lt.f32.partialorder %v1395_v32, 8388608.0  ;;  %v1398_v41 = vcvt.s32.f32 %v1397_v33  ;;  %v36_v32 = vld [vmem:[#allocation2 + $0x58] sm:$0xff] }
  0x10   :  { %v987_v17 = vsub.f32 1.0, %v986_v6  ;;  %v1413_v43 = vcvt.f32.s32 %v603_v28  ;;  %vm3022_vm2 = vcmp.lt.f32.partialorder %v1403_v36, 8388608.0  ;;  %v1406_v45 = vcvt.s32.f32 %v1405_v37 }
  0x11   :  { %vm3026_vm3 = vcmp.lt.f32.partialorder %v1411_v39, 8388608.0  ;;  %v1416_v47 = vand.u32 2147483648, %v603_v28  ;;  %v1399_v48 = vand.u32 2147483647, %v1398_v41  ;;  %v1419_v50 = vand.u32 2147483647, %v604_v29 }
  0x12   :  { %v988_v25 = vmul.f32 %v2937_v1, %v987_v17  ;;  %v1414_v49 = vcvt.s32.f32 %v1413_v43  ;;  %v1421_v51 = vcvt.f32.s32 %v604_v29  ;;  %v1407_v52 = vand.u32 2147483647, %v1406_v45 }
  0x13   :  { %v1424_v53 = vand.u32 2147483648, %v604_v29  ;;  %v1427_v54 = vand.u32 2147483647, %v3011_v30  ;;  %v1429_v55 = vcvt.f32.s32 %v3011_v30  ;;  %v1401_v56 = vor.u32 %v1400_v34, %v1399_v48 }
  0x14   :  { %v989_v35 = vadd.f32 %v2937_v1, %v988_v25  ;;  %v1415_v57 = vand.u32 2147483647, %v1414_v49  ;;  %vm3032_vm4 = vcmp.lt.f32.partialorder %v1419_v50, 8388608.0  ;;  %v1422_v59 = vcvt.s32.f32 %v1421_v51 }
  0x15   :  { %v1409_v60 = vor.u32 %v1408_v38, %v1407_v52  ;;  %vm3036_vm5 = vcmp.lt.f32.partialorder %v1427_v54, 8388608.0  ;;  %v1430_v62 = vcvt.s32.f32 %v1429_v55  ;;  %v1432_v63 = vand.u32 2147483648, %v3011_v30 }
  0x16   :  { %v3020_v42 = vsel %vm990_vm0, %v2937_v1, %v989_v35  ;;  %v1402_v0 = vsel %vm3015_vm1, %v1401_v56, %v601_v24  ;;  %v1417_v1 = vor.u32 %v1416_v47, %v1415_v57  ;;  %v1423_v2 = vand.u32 2147483647, %v1422_v59 }
  0x17   :  { %v1435_v3 = vand.u32 2147483647, %v3013_v31  ;;  %v992_v4 = vmul.f32 %v1402_v0, %v3020_v42  ;;  %v1410_v5 = vsel %vm3022_vm2, %v1409_v60, %v602_v26  ;;  %v1431_v6 = vand.u32 2147483647, %v1430_v62  ;;  %v37_v62 = vld [vmem:[#allocation2 + $0x60] sm:$0xff] }
  0x18   :  { %v1437_v7 = vcvt.f32.s32 %v3013_v31  ;;  %v993_v10 = vmul.f32 %v1410_v5, %v3020_v42  ;;  %v1418_v11 = vsel %vm3026_vm3, %v1417_v1, %v603_v28  ;;  %v1425_v12 = vor.u32 %v1424_v53, %v1423_v2  ;;  %v35_v28 = vld [vmem:[#allocation2 + $0x50] sm:$0xff] }
  0x19   :  { %vm3051_vm6 = vcmp.lt.f32.partialorder %v1435_v3, 8388608.0  ;;  %1184 = vst [vmem:[#allocation5] sm:$0xff] %v992_v4  ;;  %v994_v15 = vmul.f32 %v1418_v11, %v3020_v42  ;;  %v1433_v16 = vor.u32 %v1432_v63, %v1431_v6  ;;  %v1440_v18 = vand.u32 2147483648, %v3013_v31  ;;  %v38_v63 = vld [vmem:[#allocation2 + $0x68] sm:$0xff] }
  0x1a   :  { %v1438_v17 = vcvt.s32.f32 %v1437_v7  ;;  %1185 = vst [vmem:[#allocation5 + $0x8] sm:$0xff] %v993_v10  ;;  %v1426_v19 = vsel %vm3032_vm4, %v1425_v12, %v604_v29  ;;  %v607_v20 = vmul.f32 255.0, %v415_v27  ;;  %v225_v22 = vmax.f32 %v33_v9, 0.0 }
  0x1b   :  { %1186 = vst [vmem:[#allocation5 + $0x10] sm:$0xff] %v994_v15  ;;  %v995_v23 = vmul.f32 %v1426_v19, %v3020_v42  ;;  %v1434_v24 = vsel %vm3036_vm5, %v1433_v16, %v3011_v30  ;;  %v226_v26 = vmax.f32 %v34_v14, 0.0  ;;  %v416_v29 = vmin.f32 %v224_v21, 1.0 }
  0x1c   :  { %v1439_v25 = vand.u32 2147483647, %v1438_v17  ;;  %v996_v33 = vmul.f32 %v1434_v24, %v3020_v42  ;;  %v1443_v34 = vand.u32 2147483647, %v607_v20  ;;  %v1445_v35 = vcvt.f32.s32 %v607_v20 }
  0x1d   :  { %v1448_v36 = vand.u32 2147483648, %v607_v20  ;;  %1187 = vst [vmem:[#allocation5 + $0x18] sm:$0xff] %v995_v23  ;;  %v417_v37 = vmin.f32 %v225_v22, 1.0  ;;  %v418_v38 = vmin.f32 %v226_v26, 1.0  ;;  %v227_v40 = vmax.f32 %v35_v28, 0.0  ;;  %v44_v26 = vld [vmem:[#allocation2 + $0x98] sm:$0xff] }
  0x1e   :  { %v1441_v27 = vor.u32 %v1440_v18, %v1439_v25  ;;  %1188 = vst [vmem:[#allocation5 + $0x20] sm:$0xff] %v996_v33  ;;  %vm3064_vm7 = vcmp.lt.f32.partialorder %v1443_v34, 8388608.0  ;;  %v1446_v30 = vcvt.s32.f32 %v1445_v35  ;;  %v228_v41 = vmax.f32 %v36_v32, 0.0  ;;  %v39_v32 = vld [vmem:[#allocation2 + $0x70] sm:$0xff]  ;;  %v40_v33 = vld [vmem:[#allocation2 + $0x78] sm:$0xff]  ;;  %v41_v34 = vld [vmem:[#allocation2 + $0x80] sm:$0xff] }
  0x1f   :  { %v608_v44 = vmul.f32 255.0, %v416_v29  ;;  %v609_v45 = vmul.f32 255.0, %v417_v37  ;;  %v610_v46 = vmul.f32 255.0, %v418_v38  ;;  %v419_v49 = vmin.f32 %v227_v40, 1.0  ;;  %v3103_v37 = vld [vmem:[#allocation2 + $0x88] sm:$0xff] }
  0x20   :  { %v1442_v43 = vsel %vm3051_vm6, %v1441_v27, %v3013_v31  ;;  %v1447_v48 = vand.u32 2147483647, %v1446_v30  ;;  %v420_v50 = vmin.f32 %v228_v41, 1.0  ;;  %v229_v10 = vmax.f32 %v37_v62, 0.0 }
  0x21   :  { %v997_v47 = vmul.f32 %v1442_v43, %v3020_v42  ;;  %v1451_v51 = vand.u32 2147483647, %v608_v44  ;;  %v1453_v52 = vcvt.f32.s32 %v608_v44  ;;  %v1456_v53 = vand.u32 2147483648, %v608_v44 }
  0x22   :  { %v1459_v54 = vand.u32 2147483647, %v609_v45  ;;  %v1449_v55 = vor.u32 %v1448_v36, %v1447_v48  ;;  %v1461_v56 = vcvt.f32.s32 %v609_v45  ;;  %v1464_v57 = vand.u32 2147483648, %v609_v45 }
  0x23   :  { %1189 = vst [vmem:[#allocation5 + $0x28] sm:$0xff] %v997_v47  ;;  %v1467_v58 = vand.u32 2147483647, %v610_v46  ;;  %vm3072_vm8 = vcmp.lt.f32.partialorder %v1451_v51, 8388608.0  ;;  %v1454_v31 = vcvt.s32.f32 %v1453_v52  ;;  %v1469_v61 = vcvt.f32.s32 %v610_v46 }
  0x24   :  { %vm3076_vm9 = vcmp.lt.f32.partialorder %v1459_v54, 8388608.0  ;;  %v1450_v0 = vsel %vm3064_vm7, %v1449_v55, %v607_v20  ;;  %v1462_v1 = vcvt.s32.f32 %v1461_v56  ;;  %v1472_v3 = vand.u32 2147483648, %v610_v46 }
  0x25   :  { %vm3082_vm10 = vcmp.lt.f32.partialorder %v1467_v58, 8388608.0  ;;  %v998_v4 = vmul.f32 %v1450_v0, %v3020_v42  ;;  %v1455_v5 = vand.u32 2147483647, %v1454_v31  ;;  %v1470_v6 = vcvt.s32.f32 %v1469_v61 }
  0x26   :  { %v611_v7 = vmul.f32 255.0, %v419_v49  ;;  %v1463_v8 = vand.u32 2147483647, %v1462_v1  ;;  %v612_v9 = vmul.f32 255.0, %v420_v50  ;;  %v230_v11 = vmax.f32 %v38_v63, 0.0 }
  0x27   :  { %1190 = vst [vmem:[#allocation5 + $0x30] sm:$0xff] %v998_v4  ;;  %v1457_v12 = vor.u32 %v1456_v53, %v1455_v5  ;;  %v1471_v13 = vand.u32 2147483647, %v1470_v6  ;;  %v421_v30 = vmin.f32 %v229_v10, 1.0  ;;  %v231_v43 = vmax.f32 %v39_v32, 0.0 }
  0x28   :  { %v1475_v14 = vand.u32 2147483647, %v611_v7  ;;  %v1477_v15 = vcvt.f32.s32 %v611_v7  ;;  %v1465_v16 = vor.u32 %v1464_v57, %v1463_v8  ;;  %v1480_v17 = vand.u32 2147483648, %v611_v7 }
  0x29   :  { %v1483_v18 = vand.u32 2147483647, %v612_v9  ;;  %v1485_v19 = vcvt.f32.s32 %v612_v9  ;;  %v1458_v20 = vsel %vm3072_vm8, %v1457_v12, %v608_v44  ;;  %v1473_v21 = vor.u32 %v1472_v3, %v1471_v13 }
  0x2a   :  { %vm3089_vm11 = vcmp.lt.f32.partialorder %v1475_v14, 8388608.0  ;;  %v1478_v23 = vcvt.s32.f32 %v1477_v15  ;;  %v999_v24 = vmul.f32 %v1458_v20, %v3020_v42  ;;  %v1466_v25 = vsel %vm3076_vm9, %v1465_v16, %v609_v45 }
  0x2b   :  { %vm3096_vm12 = vcmp.lt.f32.partialorder %v1483_v18, 8388608.0  ;;  %v1486_v28 = vcvt.s32.f32 %v1485_v19  ;;  %v1000_v35 = vmul.f32 %v1466_v25, %v3020_v42  ;;  %v1474_v36 = vsel %vm3082_vm10, %v1473_v21, %v610_v46  ;;  %v43_v21 = vld [vmem:[#allocation2 + $0x90] sm:$0xff] }
  0x2c   :  { %v1479_v27 = vand.u32 2147483647, %v1478_v23  ;;  %v1488_v29 = vand.u32 2147483648, %v612_v9  ;;  %1191 = vst [vmem:[#allocation5 + $0x38] sm:$0xff] %v999_v24  ;;  %v1001_v38 = vmul.f32 %v1474_v36, %v3020_v42  ;;  %v422_v40 = vmin.f32 %v230_v11, 1.0  ;;  %v46_v36 = vld [vmem:[#allocation2 + $0xa8] sm:$0xff] }
  0x2d   :  { %v1487_v39 = vand.u32 2147483647, %v1486_v28  ;;  %1192 = vst [vmem:[#allocation5 + $0x40] sm:$0xff] %v1000_v35  ;;  %v232_v44 = vmax.f32 %v40_v33, 0.0  ;;  %v233_v45 = vmax.f32 %v41_v34, 0.0  ;;  %v613_v48 = vmul.f32 255.0, %v421_v30 }
  0x2e   :  { %v1481_v41 = vor.u32 %v1480_v17, %v1479_v27  ;;  %1193 = vst [vmem:[#allocation5 + $0x48] sm:$0xff] %v1001_v38  ;;  %v614_v49 = vmul.f32 255.0, %v422_v40  ;;  %v234_v46 = vmax.f32 %v3103_v37, 0.0  ;;  %v423_v51 = vmin.f32 %v231_v43, 1.0  ;;  %v45_v28 = vld [vmem:[#allocation2 + $0xa0] sm:$0xff]  ;;  %v47_v18 = vld [vmem:[#allocation2 + $0xb0] sm:$0xff] }
  0x2f   :  { %v1489_v47 = vor.u32 %v1488_v29, %v1487_v39  ;;  %v424_v52 = vmin.f32 %v232_v44, 1.0  ;;  %v425_v53 = vmin.f32 %v233_v45, 1.0  ;;  %v1491_v56 = vand.u32 2147483647, %v613_v48  ;;  %v49_v24 = vld [vmem:[#allocation2 + $0xc0] sm:$0xff] }
  0x30   :  { %v1482_v50 = vsel %vm3089_vm11, %v1481_v41, %v611_v7  ;;  %v1493_v57 = vcvt.f32.s32 %v613_v48  ;;  %v1496_v59 = vand.u32 2147483648, %v613_v48  ;;  %v1499_v31 = vand.u32 2147483647, %v614_v49 }
  0x31   :  { %v1002_v54 = vmul.f32 %v1482_v50, %v3020_v42  ;;  %v1490_v55 = vsel %vm3096_vm12, %v1489_v47, %v612_v9  ;;  %v1501_v60 = vcvt.f32.s32 %v614_v49  ;;  %vm3113_vm13 = vcmp.lt.f32.partialorder %v1491_v56, 8388608.0 }
  0x32   :  { %v1003_v58 = vmul.f32 %v1490_v55, %v3020_v42  ;;  %v1494_v62 = vcvt.s32.f32 %v1493_v57  ;;  %v1504_v63 = vand.u32 2147483648, %v614_v49  ;;  %v615_v0 = vmul.f32 255.0, %v423_v51 }
  0x33   :  { %1194 = vst [vmem:[#allocation5 + $0x50] sm:$0xff] %v1002_v54  ;;  %vm3117_vm14 = vcmp.lt.f32.partialorder %v1499_v31, 8388608.0  ;;  %v1502_v2 = vcvt.s32.f32 %v1501_v60  ;;  %v616_v3 = vmul.f32 255.0, %v424_v52  ;;  %v617_v4 = vmul.f32 255.0, %v425_v53 }
  0x34   :  { %1195 = vst [vmem:[#allocation5 + $0x58] sm:$0xff] %v1003_v58  ;;  %v1495_v5 = vand.u32 2147483647, %v1494_v62  ;;  %v1507_v6 = vand.u32 2147483647, %v615_v0  ;;  %v1509_v7 = vcvt.f32.s32 %v615_v0  ;;  %v1512_v8 = vand.u32 2147483648, %v615_v0 }
  0x35   :  { %v1503_v9 = vand.u32 2147483647, %v1502_v2  ;;  %v1515_v10 = vand.u32 2147483647, %v616_v3  ;;  %v1517_v11 = vcvt.f32.s32 %v616_v3  ;;  %v1520_v12 = vand.u32 2147483648, %v616_v3 }
  0x36   :  { %v1497_v13 = vor.u32 %v1496_v59, %v1495_v5  ;;  %vm3121_vm15 = vcmp.lt.f32.partialorder %v1507_v6, 8388608.0  ;;  %v1510_v15 = vcvt.s32.f32 %v1509_v7  ;;  %v1523_v16 = vand.u32 2147483647, %v617_v4  ;;  %v54_v6 = vld [vmem:[#allocation2 + $0xe8] sm:$0xff] }
  0x37   :  { %v1505_v17 = vor.u32 %v1504_v63, %v1503_v9  ;;  %vm3125_vm0 = vcmp.lt.f32.partialorder %v1515_v10, 8388608.0  ;;  %v1518_v19 = vcvt.s32.f32 %v1517_v11  ;;  %v1525_v20 = vcvt.f32.s32 %v617_v4 }
  0x38   :  { %v1498_v22 = vsel %vm3113_vm13, %v1497_v13, %v613_v48  ;;  %v1511_v23 = vand.u32 2147483647, %v1510_v15  ;;  %vm3131_vm1 = vcmp.lt.f32.partialorder %v1523_v16, 8388608.0  ;;  %v1528_v25 = vand.u32 2147483648, %v617_v4 }
  0x39   :  { %v1004_v32 = vmul.f32 %v1498_v22, %v3020_v42  ;;  %v1506_v33 = vsel %vm3117_vm14, %v1505_v17, %v614_v49  ;;  %v1519_v34 = vand.u32 2147483647, %v1518_v19  ;;  %v1526_v35 = vcvt.s32.f32 %v1525_v20 }
  0x3a   :  { %v1005_v27 = vmul.f32 %v1506_v33, %v3020_v42  ;;  %v1513_v29 = vor.u32 %v1512_v8, %v1511_v23  ;;  %v426_v37 = vmin.f32 %v234_v46, 1.0  ;;  %v235_v38 = vmax.f32 %v43_v21, 0.0  ;;  %v48_v23 = vld [vmem:[#allocation2 + $0xb8] sm:$0xff] }
  0x3b   :  { %1196 = vst [vmem:[#allocation5 + $0x60] sm:$0xff] %v1004_v32  ;;  %v1521_v39 = vor.u32 %v1520_v12, %v1519_v34  ;;  %v1527_v30 = vand.u32 2147483647, %v1526_v35  ;;  %v236_v40 = vmax.f32 %v44_v26, 0.0  ;;  %v237_v41 = vmax.f32 %v45_v28, 0.0 }
  0x3c   :  { %1197 = vst [vmem:[#allocation5 + $0x68] sm:$0xff] %v1005_v27  ;;  %v1514_v43 = vsel %vm3121_vm15, %v1513_v29, %v615_v0  ;;  %v618_v44 = vmul.f32 255.0, %v426_v37  ;;  %v427_v45 = vmin.f32 %v235_v38, 1.0  ;;  %v238_v47 = vmax.f32 %v46_v36, 0.0  ;;  %v50_v27 = vld [vmem:[#allocation2 + $0xc8] sm:$0xff] }
  0x3d   :  { %v1006_v48 = vmul.f32 %v1514_v43, %v3020_v42  ;;  %v1522_v49 = vsel %vm3125_vm0, %v1521_v39, %v616_v3  ;;  %v1529_v50 = vor.u32 %v1528_v25, %v1527_v30  ;;  %v428_v46 = vmin.f32 %v236_v40, 1.0  ;;  %v51_v30 = vld [vmem:[#allocation2 + $0xd0] sm:$0xff] }
  0x3e   :  { %v1007_v51 = vmul.f32 %v1522_v49, %v3020_v42  ;;  %v1531_v52 = vand.u32 2147483647, %v618_v44  ;;  %v1533_v53 = vcvt.f32.s32 %v618_v44  ;;  %v1536_v54 = vand.u32 2147483648, %v618_v44 }
  0x3f   :  { %1198 = vst [vmem:[#allocation5 + $0x70] sm:$0xff] %v1006_v48  ;;  %v1530_v55 = vsel %vm3131_vm1, %v1529_v50, %v617_v4  ;;  %v619_v56 = vmul.f32 255.0, %v427_v45  ;;  %v620_v57 = vmul.f32 255.0, %v428_v46  ;;  %v429_v58 = vmin.f32 %v237_v41, 1.0 }
  0x40   :  { %1199 = vst [vmem:[#allocation5 + $0x78] sm:$0xff] %v1007_v51  ;;  %v1008_v59 = vmul.f32 %v1530_v55, %v3020_v42  ;;  %vm3148_vm2 = vcmp.lt.f32.partialorder %v1531_v52, 8388608.0  ;;  %v1534_v60 = vcvt.s32.f32 %v1533_v53  ;;  %v430_v61 = vmin.f32 %v238_v47, 1.0 }
  0x41   :  { %v1539_v62 = vand.u32 2147483647, %v619_v56  ;;  %v1541_v63 = vcvt.f32.s32 %v619_v56  ;;  %v1544_v0 = vand.u32 2147483648, %v619_v56  ;;  %v1547_v1 = vand.u32 2147483647, %v620_v57 }
  0x42   :  { %1200 = vst [vmem:[#allocation5 + $0x80] sm:$0xff] %v1008_v59  ;;  %v1535_v2 = vand.u32 2147483647, %v1534_v60  ;;  %v1549_v3 = vcvt.f32.s32 %v620_v57  ;;  %v1552_v4 = vand.u32 2147483648, %v620_v57  ;;  %v621_v5 = vmul.f32 255.0, %v429_v58  ;;  %v52_v60 = vld [vmem:[#allocation2 + $0xd8] sm:$0xff] }
  0x43   :  { %vm3152_vm3 = vcmp.lt.f32.partialorder %v1539_v62, 8388608.0  ;;  %v1542_v7 = vcvt.s32.f32 %v1541_v63  ;;  %vm3156_vm4 = vcmp.lt.f32.partialorder %v1547_v1, 8388608.0  ;;  %v622_v9 = vmul.f32 255.0, %v430_v61 }
  0x44   :  { %v1537_v10 = vor.u32 %v1536_v54, %v1535_v2  ;;  %v1550_v11 = vcvt.s32.f32 %v1549_v3  ;;  %v1555_v12 = vand.u32 2147483647, %v621_v5  ;;  %v1557_v13 = vcvt.f32.s32 %v621_v5 }
  0x45   :  { %v1543_v14 = vand.u32 2147483647, %v1542_v7  ;;  %v1560_v15 = vand.u32 2147483648, %v621_v5  ;;  %v1563_v16 = vand.u32 2147483647, %v622_v9  ;;  %v1565_v17 = vcvt.f32.s32 %v622_v9  ;;  %v58_v7 = vld [vmem:[#allocation2 + $0x108] sm:$0xff] }
  0x46   :  { %v1538_v19 = vsel %vm3148_vm2, %v1537_v10, %v618_v44  ;;  %v1551_v20 = vand.u32 2147483647, %v1550_v11  ;;  %vm3162_vm5 = vcmp.lt.f32.partialorder %v1555_v12, 8388608.0  ;;  %v1558_v22 = vcvt.s32.f32 %v1557_v13 }
  0x47   :  { %v1009_v25 = vmul.f32 %v1538_v19, %v3020_v42  ;;  %v1545_v26 = vor.u32 %v1544_v0, %v1543_v14  ;;  %vm3167_vm6 = vcmp.lt.f32.partialorder %v1563_v16, 8388608.0  ;;  %v1566_v32 = vcvt.s32.f32 %v1565_v17 }
  0x48   :  { %v1553_v33 = vor.u32 %v1552_v4, %v1551_v20  ;;  %v1559_v34 = vand.u32 2147483647, %v1558_v22  ;;  %v1568_v35 = vand.u32 2147483648, %v622_v9  ;;  %v239_v36 = vmax.f32 %v47_v18, 0.0 }
  0x49   :  { %1201 = vst [vmem:[#allocation5 + $0x88] sm:$0xff] %v1009_v25  ;;  %v1546_v29 = vsel %vm3152_vm3, %v1545_v26, %v619_v56  ;;  %v1567_v37 = vand.u32 2147483647, %v1566_v32  ;;  %v240_v38 = vmax.f32 %v48_v23, 0.0  ;;  %v241_v39 = vmax.f32 %v49_v24, 0.0 }
  0x4a   :  { %v1010_v40 = vmul.f32 %v1546_v29, %v3020_v42  ;;  %v1554_v41 = vsel %vm3156_vm4, %v1553_v33, %v620_v57  ;;  %v1561_v43 = vor.u32 %v1560_v15, %v1559_v34  ;;  %v431_v44 = vmin.f32 %v239_v36, 1.0 }
  0x4b   :  { %v1011_v45 = vmul.f32 %v1554_v41, %v3020_v42  ;;  %v1569_v47 = vor.u32 %v1568_v35, %v1567_v37  ;;  %v432_v48 = vmin.f32 %v240_v38, 1.0  ;;  %v433_v49 = vmin.f32 %v241_v39, 1.0  ;;  %v55_v37 = vld [vmem:[#allocation2 + $0xf0] sm:$0xff] }
  0x4c   :  { %1202 = vst [vmem:[#allocation5 + $0x90] sm:$0xff] %v1010_v40  ;;  %v1562_v50 = vsel %vm3162_vm5, %v1561_v43, %v621_v5  ;;  %v623_v46 = vmul.f32 255.0, %v431_v44  ;;  %v242_v51 = vmax.f32 %v50_v27, 0.0  ;;  %v243_v52 = vmax.f32 %v51_v30, 0.0  ;;  %v53_v5 = vld [vmem:[#allocation2 + $0xe0] sm:$0xff] }
  0x4d   :  { %1203 = vst [vmem:[#allocation5 + $0x98] sm:$0xff] %v1011_v45  ;;  %v1012_v53 = vmul.f32 %v1562_v50, %v3020_v42  ;;  %v1570_v54 = vsel %vm3167_vm6, %v1569_v47, %v622_v9  ;;  %v624_v55 = vmul.f32 255.0, %v432_v48  ;;  %v625_v56 = vmul.f32 255.0, %v433_v49  ;;  %v56_v47 = vld [vmem:[#allocation2 + $0xf8] sm:$0xff] }
  0x4e   :  { %v1013_v57 = vmul.f32 %v1570_v54, %v3020_v42  ;;  %v1571_v58 = vand.u32 2147483647, %v623_v46  ;;  %v1573_v59 = vcvt.f32.s32 %v623_v46  ;;  %v1576_v31 = vand.u32 2147483648, %v623_v46 }
  0x4f   :  { %1204 = vst [vmem:[#allocation5 + $0xa0] sm:$0xff] %v1012_v53  ;;  %v1579_v61 = vand.u32 2147483647, %v624_v55  ;;  %v1581_v62 = vcvt.f32.s32 %v624_v55  ;;  %v1584_v63 = vand.u32 2147483648, %v624_v55  ;;  %v1587_v0 = vand.u32 2147483647, %v625_v56 }
  0x50   :  { %1205 = vst [vmem:[#allocation5 + $0xa8] sm:$0xff] %v1013_v57  ;;  %vm3183_vm7 = vcmp.lt.f32.partialorder %v1571_v58, 8388608.0  ;;  %v1574_v2 = vcvt.s32.f32 %v1573_v59  ;;  %v1589_v3 = vcvt.f32.s32 %v625_v56  ;;  %v1592_v4 = vand.u32 2147483648, %v625_v56 }
  0x51   :  { %vm3187_vm8 = vcmp.lt.f32.partialorder %v1579_v61, 8388608.0  ;;  %v1582_v8 = vcvt.s32.f32 %v1581_v62  ;;  %vm3191_vm9 = vcmp.lt.f32.partialorder %v1587_v0, 8388608.0  ;;  %v434_v10 = vmin.f32 %v242_v51, 1.0 }
  0x52   :  { %v1575_v11 = vand.u32 2147483647, %v1574_v2  ;;  %v1590_v12 = vcvt.s32.f32 %v1589_v3  ;;  %v435_v13 = vmin.f32 %v243_v52, 1.0  ;;  %v244_v14 = vmax.f32 %v52_v60, 0.0  ;;  %v57_v2 = vld [vmem:[#allocation2 + $0x100] sm:$0xff] }
  0x53   :  { %v1583_v15 = vand.u32 2147483647, %v1582_v8  ;;  %v626_v16 = vmul.f32 255.0, %v434_v10  ;;  %v245_v17 = vmax.f32 %v53_v5, 0.0  ;;  %v246_v18 = vmax.f32 %v54_v6, 0.0 }
  0x54   :  { %v1577_v19 = vor.u32 %v1576_v31, %v1575_v11  ;;  %v1591_v20 = vand.u32 2147483647, %v1590_v12  ;;  %v627_v21 = vmul.f32 255.0, %v435_v13  ;;  %v436_v22 = vmin.f32 %v244_v14, 1.0 }
  0x55   :  { %v1585_v23 = vor.u32 %v1584_v63, %v1583_v15  ;;  %v1595_v24 = vand.u32 2147483647, %v626_v16  ;;  %v1597_v25 = vcvt.f32.s32 %v626_v16  ;;  %v1600_v26 = vand.u32 2147483648, %v626_v16 }
  0x56   :  { %v1578_v28 = vsel %vm3183_vm7, %v1577_v19, %v623_v46  ;;  %v1593_v32 = vor.u32 %v1592_v4, %v1591_v20  ;;  %v1603_v33 = vand.u32 2147483647, %v627_v21  ;;  %v1605_v34 = vcvt.f32.s32 %v627_v21 }
  0x57   :  { %v1014_v35 = vmul.f32 %v1578_v28, %v3020_v42  ;;  %v1586_v36 = vsel %vm3187_vm8, %v1585_v23, %v624_v55  ;;  %vm3200_vm10 = vcmp.lt.f32.partialorder %v1595_v24, 8388608.0  ;;  %v1598_v29 = vcvt.s32.f32 %v1597_v25 }
  0x58   :  { %v1015_v38 = vmul.f32 %v1586_v36, %v3020_v42  ;;  %v1594_v39 = vsel %vm3191_vm9, %v1593_v32, %v625_v56  ;;  %vm3207_vm11 = vcmp.lt.f32.partialorder %v1603_v33, 8388608.0  ;;  %v1606_v40 = vcvt.s32.f32 %v1605_v34 }
  0x59   :  { %1206 = vst [vmem:[#allocation5 + $0xb0] sm:$0xff] %v1014_v35  ;;  %v1016_v41 = vmul.f32 %v1594_v39, %v3020_v42  ;;  %v1599_v43 = vand.u32 2147483647, %v1598_v29  ;;  %v1608_v44 = vand.u32 2147483648, %v627_v21  ;;  %v628_v45 = vmul.f32 255.0, %v436_v22 }
  0x5a   :  { %1207 = vst [vmem:[#allocation5 + $0xb8] sm:$0xff] %v1015_v38  ;;  %v1607_v48 = vand.u32 2147483647, %v1606_v40  ;;  %v437_v49 = vmin.f32 %v245_v17, 1.0  ;;  %v438_v50 = vmin.f32 %v246_v18, 1.0  ;;  %v247_v46 = vmax.f32 %v55_v37, 0.0 }
  0x5b   :  { %1208 = vst [vmem:[#allocation5 + $0xc0] sm:$0xff] %v1016_v41  ;;  %v1601_v51 = vor.u32 %v1600_v26, %v1599_v43  ;;  %v1611_v52 = vand.u32 2147483647, %v628_v45  ;;  %v1613_v53 = vcvt.f32.s32 %v628_v45  ;;  %v1616_v54 = vand.u32 2147483648, %v628_v45 }
  0x5c   :  { %v1609_v55 = vor.u32 %v1608_v44, %v1607_v48  ;;  %v629_v56 = vmul.f32 255.0, %v437_v49  ;;  %v630_v57 = vmul.f32 255.0, %v438_v50  ;;  %v439_v58 = vmin.f32 %v247_v46, 1.0  ;;  %v59_v46 = vld [vmem:[#allocation2 + $0x110] sm:$0xff] }
  0x5d   :  { %v1602_v59 = vsel %vm3200_vm10, %v1601_v51, %v626_v16  ;;  %vm3214_vm12 = vcmp.lt.f32.partialorder %v1611_v52, 8388608.0  ;;  %v1614_v60 = vcvt.s32.f32 %v1613_v53  ;;  %v248_v61 = vmax.f32 %v56_v47, 0.0  ;;  %v60_v51 = vld [vmem:[#allocation2 + $0x118] sm:$0xff] }
  0x5e   :  { %v1017_v62 = vmul.f32 %v1602_v59, %v3020_v42  ;;  %v1610_v63 = vsel %vm3207_vm11, %v1609_v55, %v627_v21  ;;  %v1619_v0 = vand.u32 2147483647, %v629_v56  ;;  %v1621_v1 = vcvt.f32.s32 %v629_v56 }
  0x5f   :  { %v1018_v3 = vmul.f32 %v1610_v63, %v3020_v42  ;;  %v1615_v4 = vand.u32 2147483647, %v1614_v60  ;;  %v1624_v5 = vand.u32 2147483648, %v629_v56  ;;  %v1627_v6 = vand.u32 2147483647, %v630_v57  ;;  %v62_v60 = vld [vmem:[#allocation2 + $0x128] sm:$0xff] }
  0x60   :  { %1209 = vst [vmem:[#allocation5 + $0xc8] sm:$0xff] %v1017_v62  ;;  %vm3222_vm13 = vcmp.lt.f32.partialorder %v1619_v0, 8388608.0  ;;  %v1622_v9 = vcvt.s32.f32 %v1621_v1  ;;  %v1629_v10 = vcvt.f32.s32 %v630_v57  ;;  %v1632_v11 = vand.u32 2147483648, %v630_v57 }
  0x61   :  { %1210 = vst [vmem:[#allocation5 + $0xd0] sm:$0xff] %v1018_v3  ;;  %v1617_v12 = vor.u32 %v1616_v54, %v1615_v4  ;;  %vm3226_vm14 = vcmp.lt.f32.partialorder %v1627_v6, 8388608.0  ;;  %v631_v14 = vmul.f32 255.0, %v439_v58  ;;  %v440_v15 = vmin.f32 %v248_v61, 1.0  ;;  %v63_v61 = vld [vmem:[#allocation2 + $0x130] sm:$0xff] }
  0x62   :  { %v1623_v16 = vand.u32 2147483647, %v1622_v9  ;;  %v1630_v17 = vcvt.s32.f32 %v1629_v10  ;;  %v249_v18 = vmax.f32 %v57_v2, 0.0  ;;  %v250_v19 = vmax.f32 %v58_v7, 0.0  ;;  %v64_v10 = vld [vmem:[#allocation2 + $0x138] sm:$0xff] }
  0x63   :  { %v1618_v20 = vsel %vm3214_vm12, %v1617_v12, %v628_v45  ;;  %v1635_v21 = vand.u32 2147483647, %v631_v14  ;;  %v1637_v22 = vcvt.f32.s32 %v631_v14  ;;  %v1640_v23 = vand.u32 2147483648, %v631_v14 }
  0x64   :  { %v1019_v24 = vmul.f32 %v1618_v20, %v3020_v42  ;;  %v1625_v25 = vor.u32 %v1624_v5, %v1623_v16  ;;  %v1631_v26 = vand.u32 2147483647, %v1630_v17  ;;  %v632_v28 = vmul.f32 255.0, %v440_v15 }
  0x65   :  { %vm3233_vm15 = vcmp.lt.f32.partialorder %v1635_v21, 8388608.0  ;;  %v1638_v33 = vcvt.s32.f32 %v1637_v22  ;;  %v441_v34 = vmin.f32 %v249_v18, 1.0  ;;  %v442_v35 = vmin.f32 %v250_v19, 1.0 }
  0x66   :  { %1211 = vst [vmem:[#allocation5 + $0xd8] sm:$0xff] %v1019_v24  ;;  %v1626_v36 = vsel %vm3222_vm13, %v1625_v25, %v629_v56  ;;  %v1633_v27 = vor.u32 %v1632_v11, %v1631_v26  ;;  %v1643_v29 = vand.u32 2147483647, %v632_v28  ;;  %v1645_v37 = vcvt.f32.s32 %v632_v28  ;;  %v61_v56 = vld [vmem:[#allocation2 + $0x120] sm:$0xff] }
  0x67   :  { %v1020_v38 = vmul.f32 %v1626_v36, %v3020_v42  ;;  %v1639_v39 = vand.u32 2147483647, %v1638_v33  ;;  %v1648_v30 = vand.u32 2147483648, %v632_v28  ;;  %v633_v40 = vmul.f32 255.0, %v441_v34 }
  0x68   :  { %v1634_v41 = vsel %vm3226_vm14, %v1633_v27, %v630_v57  ;;  %vm3242_vm0 = vcmp.lt.f32.partialorder %v1643_v29, 8388608.0  ;;  %v1646_v44 = vcvt.s32.f32 %v1645_v37  ;;  %v634_v45 = vmul.f32 255.0, %v442_v35 }
  0x69   :  { %1212 = vst [vmem:[#allocation5 + $0xe0] sm:$0xff] %v1020_v38  ;;  %v1021_v47 = vmul.f32 %v1634_v41, %v3020_v42  ;;  %v1641_v48 = vor.u32 %v1640_v23, %v1639_v39  ;;  %v1651_v49 = vand.u32 2147483647, %v633_v40  ;;  %v1653_v50 = vcvt.f32.s32 %v633_v40 }
  0x6a   :  { %v1647_v52 = vand.u32 2147483647, %v1646_v44  ;;  %v1656_v53 = vand.u32 2147483648, %v633_v40  ;;  %v1659_v54 = vand.u32 2147483647, %v634_v45  ;;  %v1661_v55 = vcvt.f32.s32 %v634_v45 }
  0x6b   :  { %1213 = vst [vmem:[#allocation5 + $0xe8] sm:$0xff] %v1021_v47  ;;  %v1642_v57 = vsel %vm3233_vm15, %v1641_v48, %v631_v14  ;;  %vm3249_vm1 = vcmp.lt.f32.partialorder %v1651_v49, 8388608.0  ;;  %v1654_v59 = vcvt.s32.f32 %v1653_v50  ;;  %v1664_v31 = vand.u32 2147483648, %v634_v45 }
  0x6c   :  { %v1022_v62 = vmul.f32 %v1642_v57, %v3020_v42  ;;  %v1649_v63 = vor.u32 %v1648_v30, %v1647_v52  ;;  %vm3254_vm2 = vcmp.lt.f32.partialorder %v1659_v54, 8388608.0  ;;  %v1662_v1 = vcvt.s32.f32 %v1661_v55 }
  0x6d   :  { %v1655_v2 = vand.u32 2147483647, %v1654_v59  ;;  %v251_v3 = vmax.f32 %v59_v46, 0.0  ;;  %v252_v4 = vmax.f32 %v60_v51, 0.0  ;;  %v253_v5 = vmax.f32 %v61_v56, 0.0 }
  0x6e   :  { %1214 = vst [vmem:[#allocation5 + $0xf0] sm:$0xff] %v1022_v62  ;;  %v1650_v6 = vsel %vm3242_vm0, %v1649_v63, %v632_v28  ;;  %v1663_v7 = vand.u32 2147483647, %v1662_v1  ;;  %v254_v8 = vmax.f32 %v62_v60, 0.0  ;;  %v255_v9 = vmax.f32 %v63_v61, 0.0 }
  0x6f   :  { %v1023_v11 = vmul.f32 %v1650_v6, %v3020_v42  ;;  %v1657_v12 = vor.u32 %v1656_v53, %v1655_v2  ;;  %v443_v13 = vmin.f32 %v251_v3, 1.0  ;;  %v444_v14 = vmin.f32 %v252_v4, 1.0 }
  0x70   :  { %v1665_v15 = vor.u32 %v1664_v31, %v1663_v7  ;;  %v445_v16 = vmin.f32 %v253_v5, 1.0  ;;  %v446_v17 = vmin.f32 %v254_v8, 1.0  ;;  %v447_v18 = vmin.f32 %v255_v9, 1.0  ;;  %v66_v5 = vld [vmem:[#allocation2 + $0x148] sm:$0xff] }
  0x71   :  { %1215 = vst [vmem:[#allocation5 + $0xf8] sm:$0xff] %v1023_v11  ;;  %v1658_v19 = vsel %vm3249_vm1, %v1657_v12, %v633_v40  ;;  %v635_v20 = vmul.f32 255.0, %v443_v13  ;;  %v636_v21 = vmul.f32 255.0, %v444_v14  ;;  %v256_v22 = vmax.f32 %v64_v10, 0.0  ;;  %v67_v10 = vld [vmem:[#allocation2 + $0x150] sm:$0xff] }
  0x72   :  { %v1024_v23 = vmul.f32 %v1658_v19, %v3020_v42  ;;  %v1666_v24 = vsel %vm3254_vm2, %v1665_v15, %v634_v45  ;;  %v637_v25 = vmul.f32 255.0, %v445_v16  ;;  %v3266_v26 = vmul.f32 255.0, %v446_v17  ;;  %v65_v45 = vld [vmem:[#allocation2 + $0x140] sm:$0xff]  ;;  %v68_v15 = vld [vmem:[#allocation2 + $0x158] sm:$0xff] }
  0x73   :  { %v1025_v28 = vmul.f32 %v1666_v24, %v3020_v42  ;;  %v1667_v32 = vand.u32 2147483647, %v635_v20  ;;  %v1669_v33 = vcvt.f32.s32 %v635_v20  ;;  %v1672_v34 = vand.u32 2147483648, %v635_v20  ;;  %v69_v16 = vld [vmem:[#allocation2 + $0x160] sm:$0xff] }
  0x74   :  { %1216 = vst [vmem:[#allocation5 + $0x100] sm:$0xff] %v1024_v23  ;;  %v1675_v35 = vand.u32 2147483647, %v636_v21  ;;  %v1677_v36 = vcvt.f32.s32 %v636_v21  ;;  %v1680_v27 = vand.u32 2147483648, %v636_v21  ;;  %v1683_v29 = vand.u32 2147483647, %v637_v25 }
  0x75   :  { %1217 = vst [vmem:[#allocation5 + $0x108] sm:$0xff] %v1025_v28  ;;  %vm3269_vm3 = vcmp.lt.f32.partialorder %v1667_v32, 8388608.0  ;;  %v1670_v38 = vcvt.s32.f32 %v1669_v33  ;;  %v1685_v39 = vcvt.f32.s32 %v637_v25  ;;  %v1688_v30 = vand.u32 2147483648, %v637_v25 }
  0x76   :  { %vm3273_vm4 = vcmp.lt.f32.partialorder %v1675_v35, 8388608.0  ;;  %v1678_v41 = vcvt.s32.f32 %v1677_v36  ;;  %vm3277_vm5 = vcmp.lt.f32.partialorder %v1683_v29, 8388608.0  ;;  %v1691_v44 = vand.u32 2147483647, %v3266_v26 }
  0x77   :  { %v1671_v47 = vand.u32 2147483647, %v1670_v38  ;;  %v1686_v48 = vcvt.s32.f32 %v1685_v39  ;;  %v1693_v49 = vcvt.f32.s32 %v3266_v26  ;;  %v1696_v50 = vand.u32 2147483648, %v3266_v26 }
  0x78   :  { %v1679_v46 = vand.u32 2147483647, %v1678_v41  ;;  %vm3284_vm6 = vcmp.lt.f32.partialorder %v1691_v44, 8388608.0  ;;  %v639_v52 = vmul.f32 255.0, %v447_v18  ;;  %v448_v53 = vmin.f32 %v256_v22, 1.0 }
  0x79   :  { %v1673_v54 = vor.u32 %v1672_v34, %v1671_v47  ;;  %v1687_v55 = vand.u32 2147483647, %v1686_v48  ;;  %v1694_v56 = vcvt.s32.f32 %v1693_v49  ;;  %v257_v57 = vmax.f32 %v65_v45, 0.0 }
  0x7a   :  { %v1681_v58 = vor.u32 %v1680_v27, %v1679_v46  ;;  %v1699_v59 = vand.u32 2147483647, %v639_v52  ;;  %v1701_v31 = vcvt.f32.s32 %v639_v52  ;;  %v1704_v60 = vand.u32 2147483648, %v639_v52 }
  0x7b   :  { %v1674_v61 = vsel %vm3269_vm3, %v1673_v54, %v635_v20  ;;  %v1689_v62 = vor.u32 %v1688_v30, %v1687_v55  ;;  %v1695_v63 = vand.u32 2147483647, %v1694_v56  ;;  %v640_v0 = vmul.f32 255.0, %v448_v53 }
  0x7c   :  { %v1026_v1 = vmul.f32 %v1674_v61, %v3020_v42  ;;  %v1682_v2 = vsel %vm3273_vm4, %v1681_v58, %v636_v21  ;;  %vm3293_vm7 = vcmp.lt.f32.partialorder %v1699_v59, 8388608.0  ;;  %v1702_v4 = vcvt.s32.f32 %v1701_v31  ;;  %v70_v21 = vld [vmem:[#allocation2 + $0x168] sm:$0xff] }
  0x7d   :  { %v1027_v6 = vmul.f32 %v1682_v2, %v3020_v42  ;;  %v1690_v7 = vsel %vm3277_vm5, %v1689_v62, %v637_v25  ;;  %v1697_v8 = vor.u32 %v1696_v50, %v1695_v63  ;;  %v1707_v9 = vand.u32 2147483647, %v640_v0 }
  0x7e   :  { %1218 = vst [vmem:[#allocation5 + $0x110] sm:$0xff] %v1026_v1  ;;  %v1028_v11 = vmul.f32 %v1690_v7, %v3020_v42  ;;  %v1703_v12 = vand.u32 2147483647, %v1702_v4  ;;  %v1709_v13 = vcvt.f32.s32 %v640_v0  ;;  %v1712_v14 = vand.u32 2147483648, %v640_v0  ;;  %v71_v7 = vld [vmem:[#allocation2 + $0x170] sm:$0xff] }
  0x7f   :  { %1219 = vst [vmem:[#allocation5 + $0x118] sm:$0xff] %v1027_v6  ;;  %v1698_v17 = vsel %vm3284_vm6, %v1697_v8, %v3266_v26  ;;  %vm3304_vm8 = vcmp.lt.f32.partialorder %v1707_v9, 8388608.0  ;;  %v449_v19 = vmin.f32 %v257_v57, 1.0  ;;  %v258_v20 = vmax.f32 %v66_v5, 0.0 }
  0x80   :  { %1220 = vst [vmem:[#allocation5 + $0x120] sm:$0xff] %v1028_v11  ;;  %v1029_v22 = vmul.f32 %v1698_v17, %v3020_v42  ;;  %v1705_v23 = vor.u32 %v1704_v60, %v1703_v12  ;;  %v1710_v24 = vcvt.s32.f32 %v1709_v13  ;;  %v259_v25 = vmax.f32 %v67_v10, 0.0  ;;  %v72_v12 = vld [vmem:[#allocation2 + $0x178] sm:$0xff]  ;;  %v75_v60 = vld [vmem:[#allocation2 + $0x190] sm:$0xff]  ;;  %v77_v10 = vld [vmem:[#allocation2 + $0x1a0] sm:$0xff] }
  0x81   :  { %v641_v28 = vmul.f32 255.0, %v449_v19  ;;  %v450_v32 = vmin.f32 %v258_v20, 1.0  ;;  %v260_v33 = vmax.f32 %v68_v15, 0.0  ;;  %v261_v34 = vmax.f32 %v69_v16, 0.0 }
  0x82   :  { %1221 = vst [vmem:[#allocation5 + $0x128] sm:$0xff] %v1029_v22  ;;  %v1706_v26 = vsel %vm3293_vm7, %v1705_v23, %v639_v52  ;;  %v1711_v35 = vand.u32 2147483647, %v1710_v24  ;;  %v451_v36 = vmin.f32 %v259_v25, 1.0  ;;  %v262_v27 = vmax.f32 %v70_v21, 0.0  ;;  %v73_v25 = vld [vmem:[#allocation2 + $0x180] sm:$0xff] }
  0x83   :  { %v1030_v29 = vmul.f32 %v1706_v26, %v3020_v42  ;;  %v1715_v37 = vand.u32 2147483647, %v641_v28  ;;  %v1717_v38 = vcvt.f32.s32 %v641_v28  ;;  %v1720_v39 = vand.u32 2147483648, %v641_v28 }
  0x84   :  { %v1713_v30 = vor.u32 %v1712_v14, %v1711_v35  ;;  %v642_v40 = vmul.f32 255.0, %v450_v32  ;;  %v643_v41 = vmul.f32 255.0, %v451_v36  ;;  %v452_v43 = vmin.f32 %v260_v33, 1.0 }
  0x85   :  { %1222 = vst [vmem:[#allocation5 + $0x130] sm:$0xff] %v1030_v29  ;;  %vm3312_vm9 = vcmp.lt.f32.partialorder %v1715_v37, 8388608.0  ;;  %v1718_v45 = vcvt.s32.f32 %v1717_v38  ;;  %v453_v47 = vmin.f32 %v261_v34, 1.0  ;;  %v454_v48 = vmin.f32 %v262_v27, 1.0  ;;  %v74_v29 = vld [vmem:[#allocation2 + $0x188] sm:$0xff] }
  0x86   :  { %v1714_v49 = vsel %vm3304_vm8, %v1713_v30, %v640_v0  ;;  %v1723_v50 = vand.u32 2147483647, %v642_v40  ;;  %v1725_v46 = vcvt.f32.s32 %v642_v40  ;;  %v1728_v51 = vand.u32 2147483648, %v642_v40 }
  0x87   :  { %v1031_v52 = vmul.f32 %v1714_v49, %v3020_v42  ;;  %v1719_v53 = vand.u32 2147483647, %v1718_v45  ;;  %v1731_v54 = vand.u32 2147483647, %v643_v41  ;;  %v1733_v55 = vcvt.f32.s32 %v643_v41 }
  0x88   :  { %vm3319_vm10 = vcmp.lt.f32.partialorder %v1723_v50, 8388608.0  ;;  %v1726_v57 = vcvt.s32.f32 %v1725_v46  ;;  %v1736_v58 = vand.u32 2147483648, %v643_v41  ;;  %v644_v59 = vmul.f32 255.0, %v452_v43 }
  0x89   :  { %1223 = vst [vmem:[#allocation5 + $0x138] sm:$0xff] %v1031_v52  ;;  %v1721_v31 = vor.u32 %v1720_v39, %v1719_v53  ;;  %vm3323_vm11 = vcmp.lt.f32.partialorder %v1731_v54, 8388608.0  ;;  %v1734_v61 = vcvt.s32.f32 %v1733_v55  ;;  %v645_v62 = vmul.f32 255.0, %v453_v47 }
  0x8a   :  { %v1727_v63 = vand.u32 2147483647, %v1726_v57  ;;  %v1739_v0 = vand.u32 2147483647, %v644_v59  ;;  %v1741_v1 = vcvt.f32.s32 %v644_v59  ;;  %v1744_v2 = vand.u32 2147483648, %v644_v59 }
  0x8b   :  { %v1722_v3 = vsel %vm3312_vm9, %v1721_v31, %v641_v28  ;;  %v1735_v4 = vand.u32 2147483647, %v1734_v61  ;;  %v1747_v5 = vand.u32 2147483647, %v645_v62  ;;  %v1749_v6 = vcvt.f32.s32 %v645_v62 }
  0x8c   :  { %v1032_v8 = vmul.f32 %v1722_v3, %v3020_v42  ;;  %v1729_v9 = vor.u32 %v1728_v51, %v1727_v63  ;;  %vm3330_vm12 = vcmp.lt.f32.partialorder %v1739_v0, 8388608.0  ;;  %v1742_v11 = vcvt.s32.f32 %v1741_v1 }
  0x8d   :  { %v1737_v13 = vor.u32 %v1736_v58, %v1735_v4  ;;  %vm3334_vm13 = vcmp.lt.f32.partialorder %v1747_v5, 8388608.0  ;;  %v1750_v15 = vcvt.s32.f32 %v1749_v6  ;;  %v1752_v16 = vand.u32 2147483648, %v645_v62  ;;  %v76_v5 = vld [vmem:[#allocation2 + $0x198] sm:$0xff] }
  0x8e   :  { %1224 = vst [vmem:[#allocation5 + $0x140] sm:$0xff] %v1032_v8  ;;  %v1730_v17 = vsel %vm3319_vm10, %v1729_v9, %v642_v40  ;;  %v1743_v18 = vand.u32 2147483647, %v1742_v11  ;;  %v646_v19 = vmul.f32 255.0, %v454_v48  ;;  %v263_v20 = vmax.f32 %v71_v7, 0.0 }
  0x8f   :  { %v1033_v21 = vmul.f32 %v1730_v17, %v3020_v42  ;;  %v1738_v22 = vsel %vm3323_vm11, %v1737_v13, %v643_v41  ;;  %v1751_v23 = vand.u32 2147483647, %v1750_v15  ;;  %v264_v24 = vmax.f32 %v72_v12, 0.0 }
  0x90   :  { %v1034_v28 = vmul.f32 %v1738_v22, %v3020_v42  ;;  %v1745_v32 = vor.u32 %v1744_v2, %v1743_v18  ;;  %v1755_v33 = vand.u32 2147483647, %v646_v19  ;;  %v1757_v34 = vcvt.f32.s32 %v646_v19 }
  0x91   :  { %1225 = vst [vmem:[#allocation5 + $0x148] sm:$0xff] %v1033_v21  ;;  %v1753_v26 = vor.u32 %v1752_v16, %v1751_v23  ;;  %v1760_v35 = vand.u32 2147483648, %v646_v19  ;;  %v455_v36 = vmin.f32 %v263_v20, 1.0  ;;  %v456_v27 = vmin.f32 %v264_v24, 1.0 }
  0x92   :  { %1226 = vst [vmem:[#allocation5 + $0x150] sm:$0xff] %v1034_v28  ;;  %v1746_v37 = vsel %vm3330_vm12, %v1745_v32, %v644_v59  ;;  %vm3346_vm14 = vcmp.lt.f32.partialorder %v1755_v33, 8388608.0  ;;  %v1758_v39 = vcvt.s32.f32 %v1757_v34  ;;  %v265_v30 = vmax.f32 %v73_v25, 0.0 }
  0x93   :  { %v1035_v40 = vmul.f32 %v1746_v37, %v3020_v42  ;;  %v1754_v41 = vsel %vm3334_vm13, %v1753_v26, %v645_v62  ;;  %v647_v43 = vmul.f32 255.0, %v455_v36  ;;  %v648_v44 = vmul.f32 255.0, %v456_v27  ;;  %v79_v36 = vld [vmem:[#allocation2 + $0x1b0] sm:$0xff] }
  0x94   :  { %v1036_v45 = vmul.f32 %v1754_v41, %v3020_v42  ;;  %v1759_v47 = vand.u32 2147483647, %v1758_v39  ;;  %v457_v48 = vmin.f32 %v265_v30, 1.0  ;;  %v266_v49 = vmax.f32 %v74_v29, 0.0 }
  0x95   :  { %1227 = vst [vmem:[#allocation5 + $0x158] sm:$0xff] %v1035_v40  ;;  %v1763_v50 = vand.u32 2147483647, %v647_v43  ;;  %v1765_v46 = vcvt.f32.s32 %v647_v43  ;;  %v1768_v51 = vand.u32 2147483648, %v647_v43  ;;  %v1771_v52 = vand.u32 2147483647, %v648_v44 }
  0x96   :  { %1228 = vst [vmem:[#allocation5 + $0x160] sm:$0xff] %v1036_v45  ;;  %v1761_v53 = vor.u32 %v1760_v35, %v1759_v47  ;;  %v1773_v54 = vcvt.f32.s32 %v648_v44  ;;  %v1776_v55 = vand.u32 2147483648, %v648_v44  ;;  %v649_v56 = vmul.f32 255.0, %v457_v48  ;;  %v78_v35 = vld [vmem:[#allocation2 + $0x1a8] sm:$0xff] }
  0x97   :  { %vm3354_vm15 = vcmp.lt.f32.partialorder %v1763_v50, 8388608.0  ;;  %v1766_v58 = vcvt.s32.f32 %v1765_v46  ;;  %vm3358_vm0 = vcmp.lt.f32.partialorder %v1771_v52, 8388608.0  ;;  %v458_v31 = vmin.f32 %v266_v49, 1.0 }
  0x98   :  { %v1762_v61 = vsel %vm3346_vm14, %v1761_v53, %v646_v19  ;;  %v1774_v62 = vcvt.s32.f32 %v1773_v54  ;;  %v1779_v63 = vand.u32 2147483647, %v649_v56  ;;  %v1781_v0 = vcvt.f32.s32 %v649_v56 }
  0x99   :  { %v1037_v1 = vmul.f32 %v1762_v61, %v3020_v42  ;;  %v1767_v2 = vand.u32 2147483647, %v1766_v58  ;;  %v1784_v3 = vand.u32 2147483648, %v649_v56  ;;  %v650_v4 = vmul.f32 255.0, %v458_v31 }
  0x9a   :  { %v1775_v6 = vand.u32 2147483647, %v1774_v62  ;;  %vm3365_vm1 = vcmp.lt.f32.partialorder %v1779_v63, 8388608.0  ;;  %v1782_v8 = vcvt.s32.f32 %v1781_v0  ;;  %v267_v9 = vmax.f32 %v75_v60, 0.0  ;;  %v82_v60 = vld [vmem:[#allocation2 + $0x1c8] sm:$0xff] }
  0x9b   :  { %1229 = vst [vmem:[#allocation5 + $0x168] sm:$0xff] %v1037_v1  ;;  %v1769_v11 = vor.u32 %v1768_v51, %v1767_v2  ;;  %v1787_v12 = vand.u32 2147483647, %v650_v4  ;;  %v1789_v13 = vcvt.f32.s32 %v650_v4  ;;  %v1792_v14 = vand.u32 2147483648, %v650_v4 }
  0x9c   :  { %v1777_v15 = vor.u32 %v1776_v55, %v1775_v6  ;;  %v1783_v16 = vand.u32 2147483647, %v1782_v8  ;;  %v459_v17 = vmin.f32 %v267_v9, 1.0  ;;  %v268_v18 = vmax.f32 %v76_v5, 0.0  ;;  %v80_v55 = vld [vmem:[#allocation2 + $0x1b8] sm:$0xff] }
  0x9d   :  { %v1770_v19 = vsel %vm3354_vm15, %v1769_v11, %v647_v43  ;;  %vm3371_vm2 = vcmp.lt.f32.partialorder %v1787_v12, 8388608.0  ;;  %v1790_v21 = vcvt.s32.f32 %v1789_v13  ;;  %v269_v22 = vmax.f32 %v77_v10, 0.0 }
  0x9e   :  { %v1038_v23 = vmul.f32 %v1770_v19, %v3020_v42  ;;  %v1778_v24 = vsel %vm3358_vm0, %v1777_v15, %v648_v44  ;;  %v1785_v25 = vor.u32 %v1784_v3, %v1783_v16  ;;  %v651_v28 = vmul.f32 255.0, %v459_v17 }
  0x9f   :  { %v1039_v32 = vmul.f32 %v1778_v24, %v3020_v42  ;;  %v1791_v33 = vand.u32 2147483647, %v1790_v21  ;;  %v460_v34 = vmin.f32 %v268_v18, 1.0  ;;  %v461_v26 = vmin.f32 %v269_v22, 1.0  ;;  %v83_v21 = vld [vmem:[#allocation2 + $0x1d0] sm:$0xff]  ;;  %v84_v22 = vld [vmem:[#allocation2 + $0x1d8] sm:$0xff] }
  0xa0   :  { %1230 = vst [vmem:[#allocation5 + $0x170] sm:$0xff] %v1038_v23  ;;  %v1786_v27 = vsel %vm3365_vm1, %v1785_v25, %v649_v56  ;;  %v1795_v29 = vand.u32 2147483647, %v651_v28  ;;  %v1797_v37 = vcvt.f32.s32 %v651_v28  ;;  %v1800_v38 = vand.u32 2147483648, %v651_v28  ;;  %v81_v56 = vld [vmem:[#allocation2 + $0x1c0] sm:$0xff]  ;;  %v87_v18 = vld [vmem:[#allocation2 + $0x1f0] sm:$0xff] }
  0xa1   :  { %1231 = vst [vmem:[#allocation5 + $0x178] sm:$0xff] %v1039_v32  ;;  %v1040_v39 = vmul.f32 %v1786_v27, %v3020_v42  ;;  %v1793_v30 = vor.u32 %v1792_v14, %v1791_v33  ;;  %v652_v40 = vmul.f32 255.0, %v460_v34  ;;  %v653_v41 = vmul.f32 255.0, %v461_v26  ;;  %v85_v32 = vld [vmem:[#allocation2 + $0x1e0] sm:$0xff] }
  0xa2   :  { %vm3382_vm3 = vcmp.lt.f32.partialorder %v1795_v29, 8388608.0  ;;  %v1798_v44 = vcvt.s32.f32 %v1797_v37  ;;  %v270_v45 = vmax.f32 %v78_v35, 0.0  ;;  %v271_v47 = vmax.f32 %v79_v36, 0.0 }
  0xa3   :  { %1232 = vst [vmem:[#allocation5 + $0x180] sm:$0xff] %v1040_v39  ;;  %v1794_v48 = vsel %vm3371_vm2, %v1793_v30, %v650_v4  ;;  %v1803_v49 = vand.u32 2147483647, %v652_v40  ;;  %v1805_v50 = vcvt.f32.s32 %v652_v40  ;;  %v1808_v46 = vand.u32 2147483648, %v652_v40 }
  0xa4   :  { %v1041_v51 = vmul.f32 %v1794_v48, %v3020_v42  ;;  %v1799_v52 = vand.u32 2147483647, %v1798_v44  ;;  %v1811_v53 = vand.u32 2147483647, %v653_v41  ;;  %v1813_v54 = vcvt.f32.s32 %v653_v41 }
  0xa5   :  { %vm3389_vm4 = vcmp.lt.f32.partialorder %v1803_v49, 8388608.0  ;;  %v1806_v58 = vcvt.s32.f32 %v1805_v50  ;;  %v1816_v59 = vand.u32 2147483648, %v653_v41  ;;  %v462_v31 = vmin.f32 %v270_v45, 1.0 }
  0xa6   :  { %1233 = vst [vmem:[#allocation5 + $0x188] sm:$0xff] %v1041_v51  ;;  %v1801_v61 = vor.u32 %v1800_v38, %v1799_v52  ;;  %vm3393_vm5 = vcmp.lt.f32.partialorder %v1811_v53, 8388608.0  ;;  %v1814_v63 = vcvt.s32.f32 %v1813_v54  ;;  %v463_v0 = vmin.f32 %v271_v47, 1.0 }
  0xa7   :  { %v1807_v1 = vand.u32 2147483647, %v1806_v58  ;;  %v654_v2 = vmul.f32 255.0, %v462_v31  ;;  %v272_v3 = vmax.f32 %v80_v55, 0.0  ;;  %v273_v4 = vmax.f32 %v81_v56, 0.0 }
  0xa8   :  { %v1802_v5 = vsel %vm3382_vm3, %v1801_v61, %v651_v28  ;;  %v1815_v6 = vand.u32 2147483647, %v1814_v63  ;;  %v655_v7 = vmul.f32 255.0, %v463_v0  ;;  %v274_v8 = vmax.f32 %v82_v60, 0.0 }
  0xa9   :  { %v1042_v9 = vmul.f32 %v1802_v5, %v3020_v42  ;;  %v1809_v10 = vor.u32 %v1808_v46, %v1807_v1  ;;  %v1819_v11 = vand.u32 2147483647, %v654_v2  ;;  %v1821_v12 = vcvt.f32.s32 %v654_v2 }
  0xaa   :  { %v1817_v13 = vor.u32 %v1816_v59, %v1815_v6  ;;  %v1824_v14 = vand.u32 2147483648, %v654_v2  ;;  %v1827_v15 = vand.u32 2147483647, %v655_v7  ;;  %v1829_v16 = vcvt.f32.s32 %v655_v7 }
  0xab   :  { %1234 = vst [vmem:[#allocation5 + $0x190] sm:$0xff] %v1042_v9  ;;  %v1810_v17 = vsel %vm3389_vm4, %v1809_v10, %v652_v40  ;;  %vm3402_vm6 = vcmp.lt.f32.partialorder %v1819_v11, 8388608.0  ;;  %v1822_v19 = vcvt.s32.f32 %v1821_v12  ;;  %v1832_v20 = vand.u32 2147483648, %v655_v7 }
  0xac   :  { %v1043_v23 = vmul.f32 %v1810_v17, %v3020_v42  ;;  %v1818_v24 = vsel %vm3393_vm5, %v1817_v13, %v653_v41  ;;  %vm3409_vm7 = vcmp.lt.f32.partialorder %v1827_v15, 8388608.0  ;;  %v1830_v28 = vcvt.s32.f32 %v1829_v16  ;;  %v86_v17 = vld [vmem:[#allocation2 + $0x1e8] sm:$0xff] }
  0xad   :  { %v1044_v33 = vmul.f32 %v1818_v24, %v3020_v42  ;;  %v1823_v34 = vand.u32 2147483647, %v1822_v19  ;;  %v464_v26 = vmin.f32 %v272_v3, 1.0  ;;  %v465_v35 = vmin.f32 %v273_v4, 1.0  ;;  %v88_v19 = vld [vmem:[#allocation2 + $0x1f8] sm:$0xff] }
  0xae   :  { %1235 = vst [vmem:[#allocation5 + $0x198] sm:$0xff] %v1043_v23  ;;  %v1831_v36 = vand.u32 2147483647, %v1830_v28  ;;  %v466_v27 = vmin.f32 %v274_v8, 1.0  ;;  %v275_v29 = vmax.f32 %v83_v21, 0.0  ;;  %v276_v37 = vmax.f32 %v84_v22, 0.0 }
  0xaf   :  { %1236 = vst [vmem:[#allocation5 + $0x1a0] sm:$0xff] %v1044_v33  ;;  %v1825_v38 = vor.u32 %v1824_v14, %v1823_v34  ;;  %v656_v39 = vmul.f32 255.0, %v464_v26  ;;  %v657_v30 = vmul.f32 255.0, %v465_v35  ;;  %v277_v40 = vmax.f32 %v85_v32, 0.0 }
  0xb0   :  { %v1833_v41 = vor.u32 %v1832_v20, %v1831_v36  ;;  %v658_v43 = vmul.f32 255.0, %v466_v27  ;;  %v467_v44 = vmin.f32 %v275_v29, 1.0  ;;  %v468_v45 = vmin.f32 %v276_v37, 1.0 }
  0xb1   :  { %v1826_v47 = vsel %vm3402_vm6, %v1825_v38, %v654_v2  ;;  %v1835_v48 = vand.u32 2147483647, %v656_v39  ;;  %v1837_v49 = vcvt.f32.s32 %v656_v39  ;;  %v1840_v50 = vand.u32 2147483648, %v656_v39 }
  0xb2   :  { %v1045_v46 = vmul.f32 %v1826_v47, %v3020_v42  ;;  %v1834_v51 = vsel %vm3409_vm7, %v1833_v41, %v655_v7  ;;  %v1843_v52 = vand.u32 2147483647, %v657_v30  ;;  %v1845_v53 = vcvt.f32.s32 %v657_v30  ;;  %v89_v41 = vld [vmem:[#allocation2 + $0x200] sm:$0xff]  ;;  %v96_v47 = vld [vmem:[#allocation2 + $0x238] sm:$0xff] }
  0xb3   :  { %v1046_v54 = vmul.f32 %v1834_v51, %v3020_v42  ;;  %vm3420_vm8 = vcmp.lt.f32.partialorder %v1835_v48, 8388608.0  ;;  %v1838_v56 = vcvt.s32.f32 %v1837_v49  ;;  %v1848_v57 = vand.u32 2147483648, %v657_v30 }
  0xb4   :  { %1237 = vst [vmem:[#allocation5 + $0x1a8] sm:$0xff] %v1045_v46  ;;  %vm3424_vm9 = vcmp.lt.f32.partialorder %v1843_v52, 8388608.0  ;;  %v1846_v59 = vcvt.s32.f32 %v1845_v53  ;;  %v1851_v31 = vand.u32 2147483647, %v658_v43  ;;  %v1853_v60 = vcvt.f32.s32 %v658_v43 }
  0xb5   :  { %1238 = vst [vmem:[#allocation5 + $0x1b0] sm:$0xff] %v1046_v54  ;;  %v1839_v61 = vand.u32 2147483647, %v1838_v56  ;;  %v1856_v62 = vand.u32 2147483648, %v658_v43  ;;  %v659_v63 = vmul.f32 255.0, %v467_v44  ;;  %v660_v0 = vmul.f32 255.0, %v468_v45 }
  0xb6   :  { %v1847_v1 = vand.u32 2147483647, %v1846_v59  ;;  %vm3428_vm10 = vcmp.lt.f32.partialorder %v1851_v31, 8388608.0  ;;  %v1854_v3 = vcvt.s32.f32 %v1853_v60  ;;  %v469_v4 = vmin.f32 %v277_v40, 1.0  ;;  %v90_v44 = vld [vmem:[#allocation2 + $0x208] sm:$0xff] }
  0xb7   :  { %v1841_v5 = vor.u32 %v1840_v50, %v1839_v61  ;;  %v1859_v6 = vand.u32 2147483647, %v659_v63  ;;  %v1861_v7 = vcvt.f32.s32 %v659_v63  ;;  %v1864_v8 = vand.u32 2147483648, %v659_v63 }
  0xb8   :  { %v1849_v9 = vor.u32 %v1848_v57, %v1847_v1  ;;  %v1855_v10 = vand.u32 2147483647, %v1854_v3  ;;  %v1867_v11 = vand.u32 2147483647, %v660_v0  ;;  %v1869_v12 = vcvt.f32.s32 %v660_v0 }
  0xb9   :  { %v1842_v13 = vsel %vm3420_vm8, %v1841_v5, %v656_v39  ;;  %vm3434_vm11 = vcmp.lt.f32.partialorder %v1859_v6, 8388608.0  ;;  %v1862_v15 = vcvt.s32.f32 %v1861_v7  ;;  %v1872_v16 = vand.u32 2147483648, %v660_v0  ;;  %v91_v7 = vld [vmem:[#allocation2 + $0x210] sm:$0xff] }
  0xba   :  { %v1047_v20 = vmul.f32 %v1842_v13, %v3020_v42  ;;  %v1850_v21 = vsel %vm3424_vm9, %v1849_v9, %v657_v30  ;;  %v1857_v22 = vor.u32 %v1856_v62, %v1855_v10  ;;  %vm3441_vm12 = vcmp.lt.f32.partialorder %v1867_v11, 8388608.0  ;;  %v93_v13 = vld [vmem:[#allocation2 + $0x220] sm:$0xff] }
  0xbb   :  { %v1048_v24 = vmul.f32 %v1850_v21, %v3020_v42  ;;  %v1863_v25 = vand.u32 2147483647, %v1862_v15  ;;  %v1870_v28 = vcvt.s32.f32 %v1869_v12  ;;  %v661_v32 = vmul.f32 255.0, %v469_v4 }
  0xbc   :  { %1239 = vst [vmem:[#allocation5 + $0x1b8] sm:$0xff] %v1047_v20  ;;  %v1858_v33 = vsel %vm3428_vm10, %v1857_v22, %v658_v43  ;;  %v278_v34 = vmax.f32 %v86_v17, 0.0  ;;  %v279_v26 = vmax.f32 %v87_v18, 0.0  ;;  %v280_v35 = vmax.f32 %v88_v19, 0.0 }
  0xbd   :  { %1240 = vst [vmem:[#allocation5 + $0x1c0] sm:$0xff] %v1048_v24  ;;  %v1049_v36 = vmul.f32 %v1858_v33, %v3020_v42  ;;  %v1865_v27 = vor.u32 %v1864_v8, %v1863_v25  ;;  %v1871_v29 = vand.u32 2147483647, %v1870_v28  ;;  %v1875_v37 = vand.u32 2147483647, %v661_v32  ;;  %v92_v8 = vld [vmem:[#allocation2 + $0x218] sm:$0xff] }
  0xbe   :  { %v1877_v38 = vcvt.f32.s32 %v661_v32  ;;  %v1880_v39 = vand.u32 2147483648, %v661_v32  ;;  %v470_v30 = vmin.f32 %v278_v34, 1.0  ;;  %v471_v40 = vmin.f32 %v279_v26, 1.0 }
  0xbf   :  { %1241 = vst [vmem:[#allocation5 + $0x1c8] sm:$0xff] %v1049_v36  ;;  %v1866_v45 = vsel %vm3434_vm11, %v1865_v27, %v659_v63  ;;  %v1873_v43 = vor.u32 %v1872_v16, %v1871_v29  ;;  %vm3451_vm13 = vcmp.lt.f32.partialorder %v1875_v37, 8388608.0  ;;  %v472_v48 = vmin.f32 %v280_v35, 1.0 }
  0xc0   :  { %v1050_v49 = vmul.f32 %v1866_v45, %v3020_v42  ;;  %v1878_v50 = vcvt.s32.f32 %v1877_v38  ;;  %v662_v46 = vmul.f32 255.0, %v470_v30  ;;  %v663_v51 = vmul.f32 255.0, %v471_v40  ;;  %v94_v30 = vld [vmem:[#allocation2 + $0x228] sm:$0xff]  ;;  %v95_v40 = vld [vmem:[#allocation2 + $0x230] sm:$0xff] }
  0xc1   :  { %v1874_v52 = vsel %vm3441_vm12, %v1873_v43, %v660_v0  ;;  %v3458_v53 = vmul.f32 255.0, %v472_v48  ;;  %v281_v54 = vmax.f32 %v89_v41, 0.0  ;;  %v282_v55 = vmax.f32 %v90_v44, 0.0 }
  0xc2   :  { %1242 = vst [vmem:[#allocation5 + $0x1d0] sm:$0xff] %v1050_v49  ;;  %v1051_v56 = vmul.f32 %v1874_v52, %v3020_v42  ;;  %v1879_v57 = vand.u32 2147483647, %v1878_v50  ;;  %v1883_v58 = vand.u32 2147483647, %v662_v46  ;;  %v1885_v59 = vcvt.f32.s32 %v662_v46 }
  0xc3   :  { %v1888_v31 = vand.u32 2147483648, %v662_v46  ;;  %v1891_v60 = vand.u32 2147483647, %v663_v51  ;;  %v1893_v61 = vcvt.f32.s32 %v663_v51  ;;  %v1896_v62 = vand.u32 2147483648, %v663_v51 }
  0xc4   :  { %1243 = vst [vmem:[#allocation5 + $0x1d8] sm:$0xff] %v1051_v56  ;;  %v1881_v63 = vor.u32 %v1880_v39, %v1879_v57  ;;  %vm3461_vm14 = vcmp.lt.f32.partialorder %v1883_v58, 8388608.0  ;;  %v1886_v0 = vcvt.s32.f32 %v1885_v59  ;;  %v1899_v2 = vand.u32 2147483647, %v3458_v53 }
  0xc5   :  { %vm3466_vm15 = vcmp.lt.f32.partialorder %v1891_v60, 8388608.0  ;;  %v1894_v4 = vcvt.s32.f32 %v1893_v61  ;;  %v1901_v5 = vcvt.f32.s32 %v3458_v53  ;;  %v1904_v6 = vand.u32 2147483648, %v3458_v53 }
  0xc6   :  { %v1882_v9 = vsel %vm3451_vm13, %v1881_v63, %v661_v32  ;;  %v1887_v10 = vand.u32 2147483647, %v1886_v0  ;;  %vm3474_vm0 = vcmp.lt.f32.partialorder %v1899_v2, 8388608.0  ;;  %v473_v12 = vmin.f32 %v281_v54, 1.0 }
  0xc7   :  { %v1052_v14 = vmul.f32 %v1882_v9, %v3020_v42  ;;  %v1895_v15 = vand.u32 2147483647, %v1894_v4  ;;  %v1902_v16 = vcvt.s32.f32 %v1901_v5  ;;  %v474_v17 = vmin.f32 %v282_v55, 1.0 }
  0xc8   :  { %v1889_v18 = vor.u32 %v1888_v31, %v1887_v10  ;;  %v665_v19 = vmul.f32 255.0, %v473_v12  ;;  %v283_v20 = vmax.f32 %v91_v7, 0.0  ;;  %v284_v21 = vmax.f32 %v92_v8, 0.0  ;;  %v97_v10 = vld [vmem:[#allocation2 + $0x240] sm:$0xff] }
  0xc9   :  { %1244 = vst [vmem:[#allocation5 + $0x1e0] sm:$0xff] %v1052_v14  ;;  %v1897_v22 = vor.u32 %v1896_v62, %v1895_v15  ;;  %v1903_v23 = vand.u32 2147483647, %v1902_v16  ;;  %v666_v24 = vmul.f32 255.0, %v474_v17  ;;  %v285_v25 = vmax.f32 %v93_v13, 0.0  ;;  %v98_v15 = vld [vmem:[#allocation2 + $0x248] sm:$0xff] }
  0xca   :  { %v1890_v28 = vsel %vm3461_vm14, %v1889_v18, %v662_v46  ;;  %v1907_v32 = vand.u32 2147483647, %v665_v19  ;;  %v1909_v33 = vcvt.f32.s32 %v665_v19  ;;  %v1912_v34 = vand.u32 2147483648, %v665_v19 }
  0xcb   :  { %v1053_v26 = vmul.f32 %v1890_v28, %v3020_v42  ;;  %v1898_v35 = vsel %vm3466_vm15, %v1897_v22, %v663_v51  ;;  %v1905_v36 = vor.u32 %v1904_v6, %v1903_v23  ;;  %v1915_v27 = vand.u32 2147483647, %v666_v24 }
  0xcc   :  { %v1054_v29 = vmul.f32 %v1898_v35, %v3020_v42  ;;  %vm3485_vm1 = vcmp.lt.f32.partialorder %v1907_v32, 8388608.0  ;;  %v1910_v38 = vcvt.s32.f32 %v1909_v33  ;;  %v1917_v39 = vcvt.f32.s32 %v666_v24 }
  0xcd   :  { %1245 = vst [vmem:[#allocation5 + $0x1e8] sm:$0xff] %v1053_v26  ;;  %v1906_v41 = vsel %vm3474_vm0, %v1905_v36, %v3458_v53  ;;  %vm3492_vm2 = vcmp.lt.f32.partialorder %v1915_v27, 8388608.0  ;;  %v1920_v45 = vand.u32 2147483648, %v666_v24  ;;  %v475_v43 = vmin.f32 %v283_v20, 1.0 }
  0xce   :  { %1246 = vst [vmem:[#allocation5 + $0x1f0] sm:$0xff] %v1054_v29  ;;  %v1055_v48 = vmul.f32 %v1906_v41, %v3020_v42  ;;  %v1911_v49 = vand.u32 2147483647, %v1910_v38  ;;  %v1918_v50 = vcvt.s32.f32 %v1917_v39  ;;  %v476_v46 = vmin.f32 %v284_v21, 1.0 }
  0xcf   :  { %v667_v51 = vmul.f32 255.0, %v475_v43  ;;  %v477_v52 = vmin.f32 %v285_v25, 1.0  ;;  %v286_v54 = vmax.f32 %v94_v30, 0.0  ;;  %v287_v55 = vmax.f32 %v95_v40, 0.0 }
  0xd0   :  { %1247 = vst [vmem:[#allocation5 + $0x1f8] sm:$0xff] %v1055_v48  ;;  %v1913_v56 = vor.u32 %v1912_v34, %v1911_v49  ;;  %v1919_v53 = vand.u32 2147483647, %v1918_v50  ;;  %v668_v57 = vmul.f32 255.0, %v476_v46  ;;  %v288_v58 = vmax.f32 %v96_v47, 0.0  ;;  %v99_v46 = vld [vmem:[#allocation2 + $0x250] sm:$0xff] }
  0xd1   :  { %v1923_v59 = vand.u32 2147483647, %v667_v51  ;;  %v1925_v31 = vcvt.f32.s32 %v667_v51  ;;  %v1928_v60 = vand.u32 2147483648, %v667_v51  ;;  %v669_v61 = vmul.f32 255.0, %v477_v52 }
  0xd2   :  { %v1914_v62 = vsel %vm3485_vm1, %v1913_v56, %v665_v19  ;;  %v1921_v63 = vor.u32 %v1920_v45, %v1919_v53  ;;  %v1931_v1 = vand.u32 2147483647, %v668_v57  ;;  %v1933_v0 = vcvt.f32.s32 %v668_v57 }
  0xd3   :  { %v1056_v2 = vmul.f32 %v1914_v62, %v3020_v42  ;;  %vm3500_vm3 = vcmp.lt.f32.partialorder %v1923_v59, 8388608.0  ;;  %v1926_v4 = vcvt.s32.f32 %v1925_v31  ;;  %v1936_v5 = vand.u32 2147483648, %v668_v57 }
  0xd4   :  { %v1922_v6 = vsel %vm3492_vm2, %v1921_v63, %v666_v24  ;;  %vm3506_vm4 = vcmp.lt.f32.partialorder %v1931_v1, 8388608.0  ;;  %v1934_v8 = vcvt.s32.f32 %v1933_v0  ;;  %v1939_v9 = vand.u32 2147483647, %v669_v61 }
  0xd5   :  { %1248 = vst [vmem:[#allocation5 + $0x200] sm:$0xff] %v1056_v2  ;;  %v1057_v11 = vmul.f32 %v1922_v6, %v3020_v42  ;;  %v1927_v12 = vand.u32 2147483647, %v1926_v4  ;;  %v1941_v13 = vcvt.f32.s32 %v669_v61  ;;  %v1944_v14 = vand.u32 2147483648, %v669_v61 }
  0xd6   :  { %v1935_v16 = vand.u32 2147483647, %v1934_v8  ;;  %vm3511_vm5 = vcmp.lt.f32.partialorder %v1939_v9, 8388608.0  ;;  %v478_v18 = vmin.f32 %v286_v54, 1.0  ;;  %v479_v19 = vmin.f32 %v287_v55, 1.0 }
  0xd7   :  { %1249 = vst [vmem:[#allocation5 + $0x208] sm:$0xff] %v1057_v11  ;;  %v1929_v20 = vor.u32 %v1928_v60, %v1927_v12  ;;  %v1942_v21 = vcvt.s32.f32 %v1941_v13  ;;  %v480_v22 = vmin.f32 %v288_v58, 1.0  ;;  %v289_v23 = vmax.f32 %v97_v10, 0.0 }
  0xd8   :  { %v1937_v24 = vor.u32 %v1936_v5, %v1935_v16  ;;  %v670_v25 = vmul.f32 255.0, %v478_v18  ;;  %v671_v28 = vmul.f32 255.0, %v479_v19  ;;  %v290_v32 = vmax.f32 %v98_v15, 0.0  ;;  %v101_v19 = vld [vmem:[#allocation2 + $0x260] sm:$0xff] }
  0xd9   :  { %v1930_v33 = vsel %vm3500_vm3, %v1929_v20, %v667_v51  ;;  %v1943_v34 = vand.u32 2147483647, %v1942_v21  ;;  %v672_v26 = vmul.f32 255.0, %v480_v22  ;;  %v481_v35 = vmin.f32 %v289_v23, 1.0  ;;  %v100_v51 = vld [vmem:[#allocation2 + $0x258] sm:$0xff]  ;;  %v102_v20 = vld [vmem:[#allocation2 + $0x268] sm:$0xff] }
  0xda   :  { %v1058_v36 = vmul.f32 %v1930_v33, %v3020_v42  ;;  %v1938_v27 = vsel %vm3506_vm4, %v1937_v24, %v668_v57  ;;  %v1947_v29 = vand.u32 2147483647, %v670_v25  ;;  %v1949_v37 = vcvt.f32.s32 %v670_v25 }
  0xdb   :  { %v1059_v38 = vmul.f32 %v1938_v27, %v3020_v42  ;;  %v1945_v39 = vor.u32 %v1944_v14, %v1943_v34  ;;  %v1952_v30 = vand.u32 2147483648, %v670_v25  ;;  %v1955_v40 = vand.u32 2147483647, %v671_v28 }
  0xdc   :  { %1250 = vst [vmem:[#allocation5 + $0x210] sm:$0xff] %v1058_v36  ;;  %vm3521_vm6 = vcmp.lt.f32.partialorder %v1947_v29, 8388608.0  ;;  %v1950_v44 = vcvt.s32.f32 %v1949_v37  ;;  %v1957_v45 = vcvt.f32.s32 %v671_v28  ;;  %v1960_v43 = vand.u32 2147483648, %v671_v28 }
  0xdd   :  { %1251 = vst [vmem:[#allocation5 + $0x218] sm:$0xff] %v1059_v38  ;;  %v1946_v47 = vsel %vm3511_vm5, %v1945_v39, %v669_v61  ;;  %vm3527_vm7 = vcmp.lt.f32.partialorder %v1955_v40, 8388608.0  ;;  %v1963_v49 = vand.u32 2147483647, %v672_v26  ;;  %v1965_v50 = vcvt.f32.s32 %v672_v26 }
  0xde   :  { %v1060_v52 = vmul.f32 %v1946_v47, %v3020_v42  ;;  %v1951_v54 = vand.u32 2147483647, %v1950_v44  ;;  %v1958_v55 = vcvt.s32.f32 %v1957_v45  ;;  %v1968_v56 = vand.u32 2147483648, %v672_v26  ;;  %v104_v45 = vld [vmem:[#allocation2 + $0x278] sm:$0xff] }
  0xdf   :  { %vm3532_vm8 = vcmp.lt.f32.partialorder %v1963_v49, 8388608.0  ;;  %v1966_v57 = vcvt.s32.f32 %v1965_v50  ;;  %v673_v58 = vmul.f32 255.0, %v481_v35  ;;  %v482_v59 = vmin.f32 %v290_v32, 1.0  ;;  %v105_v50 = vld [vmem:[#allocation2 + $0x280] sm:$0xff] }
  0xe0   :  { %1252 = vst [vmem:[#allocation5 + $0x220] sm:$0xff] %v1060_v52  ;;  %v1953_v31 = vor.u32 %v1952_v30, %v1951_v54  ;;  %v1959_v60 = vand.u32 2147483647, %v1958_v55  ;;  %v291_v61 = vmax.f32 %v99_v46, 0.0  ;;  %v292_v62 = vmax.f32 %v100_v51, 0.0 }
  0xe1   :  { %v1967_v63 = vand.u32 2147483647, %v1966_v57  ;;  %v1971_v1 = vand.u32 2147483647, %v673_v58  ;;  %v1973_v0 = vcvt.f32.s32 %v673_v58  ;;  %v1976_v2 = vand.u32 2147483648, %v673_v58 }
  0xe2   :  { %v1954_v3 = vsel %vm3521_vm6, %v1953_v31, %v670_v25  ;;  %v1961_v4 = vor.u32 %v1960_v43, %v1959_v60  ;;  %v674_v5 = vmul.f32 255.0, %v482_v59  ;;  %v483_v6 = vmin.f32 %v291_v61, 1.0  ;;  %v103_v25 = vld [vmem:[#allocation2 + $0x270] sm:$0xff] }
  0xe3   :  { %v1061_v7 = vmul.f32 %v1954_v3, %v3020_v42  ;;  %v1969_v8 = vor.u32 %v1968_v56, %v1967_v63  ;;  %vm3539_vm9 = vcmp.lt.f32.partialorder %v1971_v1, 8388608.0  ;;  %v1974_v10 = vcvt.s32.f32 %v1973_v0 }
  0xe4   :  { %v1962_v11 = vsel %vm3527_vm7, %v1961_v4, %v671_v28  ;;  %v1979_v12 = vand.u32 2147483647, %v674_v5  ;;  %v1981_v13 = vcvt.f32.s32 %v674_v5  ;;  %v1984_v14 = vand.u32 2147483648, %v674_v5 }
  0xe5   :  { %1253 = vst [vmem:[#allocation5 + $0x228] sm:$0xff] %v1061_v7  ;;  %v1062_v15 = vmul.f32 %v1962_v11, %v3020_v42  ;;  %v1970_v16 = vsel %vm3532_vm8, %v1969_v8, %v672_v26  ;;  %v1975_v17 = vand.u32 2147483647, %v1974_v10  ;;  %v675_v18 = vmul.f32 255.0, %v483_v6  ;;  %v110_v10 = vld [vmem:[#allocation2 + $0x2a8] sm:$0xff] }
  0xe6   :  { %v1063_v21 = vmul.f32 %v1970_v16, %v3020_v42  ;;  %vm3549_vm10 = vcmp.lt.f32.partialorder %v1979_v12, 8388608.0  ;;  %v1982_v23 = vcvt.s32.f32 %v1981_v13  ;;  %v484_v24 = vmin.f32 %v292_v62, 1.0  ;;  %v106_v13 = vld [vmem:[#allocation2 + $0x288] sm:$0xff] }
  0xe7   :  { %1254 = vst [vmem:[#allocation5 + $0x230] sm:$0xff] %v1062_v15  ;;  %v1977_v28 = vor.u32 %v1976_v2, %v1975_v17  ;;  %v1987_v32 = vand.u32 2147483647, %v675_v18  ;;  %v1989_v33 = vcvt.f32.s32 %v675_v18  ;;  %v1992_v34 = vand.u32 2147483648, %v675_v18  ;;  %v108_v15 = vld [vmem:[#allocation2 + $0x298] sm:$0xff] }
  0xe8   :  { %1255 = vst [vmem:[#allocation5 + $0x238] sm:$0xff] %v1063_v21  ;;  %v1983_v26 = vand.u32 2147483647, %v1982_v23  ;;  %v676_v35 = vmul.f32 255.0, %v484_v24  ;;  %v293_v36 = vmax.f32 %v101_v19, 0.0  ;;  %v294_v27 = vmax.f32 %v102_v20, 0.0 }
  0xe9   :  { %v1978_v29 = vsel %vm3539_vm9, %v1977_v28, %v673_v58  ;;  %vm3555_vm11 = vcmp.lt.f32.partialorder %v1987_v32, 8388608.0  ;;  %v1990_v38 = vcvt.s32.f32 %v1989_v33  ;;  %v295_v39 = vmax.f32 %v103_v25, 0.0 }
  0xea   :  { %v1064_v30 = vmul.f32 %v1978_v29, %v3020_v42  ;;  %v1985_v40 = vor.u32 %v1984_v14, %v1983_v26  ;;  %v1995_v41 = vand.u32 2147483647, %v676_v35  ;;  %v1997_v44 = vcvt.f32.s32 %v676_v35  ;;  %v107_v14 = vld [vmem:[#allocation2 + $0x290] sm:$0xff] }
  0xeb   :  { %v1991_v43 = vand.u32 2147483647, %v1990_v38  ;;  %v2000_v47 = vand.u32 2147483648, %v676_v35  ;;  %v485_v48 = vmin.f32 %v293_v36, 1.0  ;;  %v486_v49 = vmin.f32 %v294_v27, 1.0 }
  0xec   :  { %1256 = vst [vmem:[#allocation5 + $0x240] sm:$0xff] %v1064_v30  ;;  %v1986_v46 = vsel %vm3549_vm10, %v1985_v40, %v674_v5  ;;  %vm3562_vm12 = vcmp.lt.f32.partialorder %v1995_v41, 8388608.0  ;;  %v1998_v52 = vcvt.s32.f32 %v1997_v44  ;;  %v487_v54 = vmin.f32 %v295_v39, 1.0 }
  0xed   :  { %v1065_v55 = vmul.f32 %v1986_v46, %v3020_v42  ;;  %v1993_v56 = vor.u32 %v1992_v34, %v1991_v43  ;;  %v677_v53 = vmul.f32 255.0, %v485_v48  ;;  %v678_v57 = vmul.f32 255.0, %v486_v49 }
  0xee   :  { %v1999_v58 = vand.u32 2147483647, %v1998_v52  ;;  %v679_v59 = vmul.f32 255.0, %v487_v54  ;;  %v296_v31 = vmax.f32 %v104_v45, 0.0  ;;  %v297_v60 = vmax.f32 %v105_v50, 0.0 }
  0xef   :  { %1257 = vst [vmem:[#allocation5 + $0x248] sm:$0xff] %v1065_v55  ;;  %v1994_v61 = vsel %vm3555_vm11, %v1993_v56, %v675_v18  ;;  %v2003_v62 = vand.u32 2147483647, %v677_v53  ;;  %v2005_v63 = vcvt.f32.s32 %v677_v53  ;;  %v2008_v1 = vand.u32 2147483648, %v677_v53 }
  0xf0   :  { %v1066_v0 = vmul.f32 %v1994_v61, %v3020_v42  ;;  %v2001_v2 = vor.u32 %v2000_v47, %v1999_v58  ;;  %v2011_v3 = vand.u32 2147483647, %v678_v57  ;;  %v2013_v4 = vcvt.f32.s32 %v678_v57  ;;  %v109_v47 = vld [vmem:[#allocation2 + $0x2a0] sm:$0xff] }
  0xf1   :  { %vm3570_vm13 = vcmp.lt.f32.partialorder %v2003_v62, 8388608.0  ;;  %v2006_v6 = vcvt.s32.f32 %v2005_v63  ;;  %v2016_v7 = vand.u32 2147483648, %v678_v57  ;;  %v2019_v8 = vand.u32 2147483647, %v679_v59 }
  0xf2   :  { %1258 = vst [vmem:[#allocation5 + $0x250] sm:$0xff] %v1066_v0  ;;  %v2002_v9 = vsel %vm3562_vm12, %v2001_v2, %v676_v35  ;;  %vm3576_vm14 = vcmp.lt.f32.partialorder %v2011_v3, 8388608.0  ;;  %v2014_v11 = vcvt.s32.f32 %v2013_v4  ;;  %v2021_v12 = vcvt.f32.s32 %v679_v59 }
  0xf3   :  { %v1067_v16 = vmul.f32 %v2002_v9, %v3020_v42  ;;  %v2007_v17 = vand.u32 2147483647, %v2006_v6  ;;  %vm3581_vm15 = vcmp.lt.f32.partialorder %v2019_v8, 8388608.0  ;;  %v2024_v19 = vand.u32 2147483648, %v679_v59 }
  0xf4   :  { %v2015_v20 = vand.u32 2147483647, %v2014_v11  ;;  %v2022_v21 = vcvt.s32.f32 %v2021_v12  ;;  %v488_v22 = vmin.f32 %v296_v31, 1.0  ;;  %v489_v23 = vmin.f32 %v297_v60, 1.0 }
  0xf5   :  { %1259 = vst [vmem:[#allocation5 + $0x258] sm:$0xff] %v1067_v16  ;;  %v2009_v24 = vor.u32 %v2008_v1, %v2007_v17  ;;  %v298_v25 = vmax.f32 %v106_v13, 0.0  ;;  %v299_v28 = vmax.f32 %v107_v14, 0.0  ;;  %v300_v32 = vmax.f32 %v108_v15, 0.0  ;;  %v111_v15 = vld [vmem:[#allocation2 + $0x2b0] sm:$0xff]  ;;  %v112_v16 = vld [vmem:[#allocation2 + $0x2b8] sm:$0xff] }
  0xf6   :  { %v2017_v33 = vor.u32 %v2016_v7, %v2015_v20  ;;  %v2023_v34 = vand.u32 2147483647, %v2022_v21  ;;  %v680_v26 = vmul.f32 255.0, %v488_v22  ;;  %v681_v35 = vmul.f32 255.0, %v489_v23  ;;  %v113_v21 = vld [vmem:[#allocation2 + $0x2c0] sm:$0xff]  ;;  %v114_v7 = vld [vmem:[#allocation2 + $0x2c8] sm:$0xff] }
  0xf7   :  { %v2010_v36 = vsel %vm3570_vm13, %v2009_v24, %v677_v53  ;;  %v490_v27 = vmin.f32 %v298_v25, 1.0  ;;  %v491_v29 = vmin.f32 %v299_v28, 1.0  ;;  %v492_v37 = vmin.f32 %v300_v32, 1.0  ;;  %v116_v13 = vld [vmem:[#allocation2 + $0x2d8] sm:$0xff] }
  0xf8   :  { %v1068_v38 = vmul.f32 %v2010_v36, %v3020_v42  ;;  %v2018_v39 = vsel %vm3576_vm14, %v2017_v33, %v678_v57  ;;  %v2025_v30 = vor.u32 %v2024_v19, %v2023_v34  ;;  %v2027_v40 = vand.u32 2147483647, %v680_v26 }
  0xf9   :  { %v1069_v41 = vmul.f32 %v2018_v39, %v3020_v42  ;;  %v2029_v44 = vcvt.f32.s32 %v680_v26  ;;  %v2032_v45 = vand.u32 2147483648, %v680_v26  ;;  %v2035_v43 = vand.u32 2147483647, %v681_v35 }
  0xfa   :  { %1260 = vst [vmem:[#allocation5 + $0x260] sm:$0xff] %v1068_v38  ;;  %v2026_v48 = vsel %vm3581_vm15, %v2025_v30, %v679_v59  ;;  %vm3593_vm0 = vcmp.lt.f32.partialorder %v2027_v40, 8388608.0  ;;  %v2037_v50 = vcvt.f32.s32 %v681_v35  ;;  %v2040_v46 = vand.u32 2147483648, %v681_v35 }
  0xfb   :  { %1261 = vst [vmem:[#allocation5 + $0x268] sm:$0xff] %v1069_v41  ;;  %v1070_v51 = vmul.f32 %v2026_v48, %v3020_v42  ;;  %v2030_v52 = vcvt.s32.f32 %v2029_v44  ;;  %vm3598_vm1 = vcmp.lt.f32.partialorder %v2035_v43, 8388608.0  ;;  %v682_v55 = vmul.f32 255.0, %v490_v27 }
  0xfc   :  { %v2038_v56 = vcvt.s32.f32 %v2037_v50  ;;  %v683_v53 = vmul.f32 255.0, %v491_v29  ;;  %v684_v57 = vmul.f32 255.0, %v492_v37  ;;  %v301_v58 = vmax.f32 %v109_v47, 0.0 }
  0xfd   :  { %1262 = vst [vmem:[#allocation5 + $0x270] sm:$0xff] %v1070_v51  ;;  %v2031_v59 = vand.u32 2147483647, %v2030_v52  ;;  %v2043_v31 = vand.u32 2147483647, %v682_v55  ;;  %v2045_v60 = vcvt.f32.s32 %v682_v55  ;;  %v2048_v61 = vand.u32 2147483648, %v682_v55 }
  0xfe   :  { %v2039_v62 = vand.u32 2147483647, %v2038_v56  ;;  %v2051_v63 = vand.u32 2147483647, %v683_v53  ;;  %v2053_v1 = vcvt.f32.s32 %v683_v53  ;;  %v2056_v0 = vand.u32 2147483648, %v683_v53 }
  0xff   :  { %v2033_v2 = vor.u32 %v2032_v45, %v2031_v59  ;;  %vm3602_vm2 = vcmp.lt.f32.partialorder %v2043_v31, 8388608.0  ;;  %v2046_v4 = vcvt.s32.f32 %v2045_v60  ;;  %v2059_v5 = vand.u32 2147483647, %v684_v57  ;;  %v121_v31 = vld [vmem:[#allocation2 + $0x300] sm:$0xff] }
 0x100   :  { %v2041_v6 = vor.u32 %v2040_v46, %v2039_v62  ;;  %vm3606_vm3 = vcmp.lt.f32.partialorder %v2051_v63, 8388608.0  ;;  %v2054_v8 = vcvt.s32.f32 %v2053_v1  ;;  %v2061_v9 = vcvt.f32.s32 %v684_v57 }
 0x101   :  { %v2034_v11 = vsel %vm3593_vm0, %v2033_v2, %v680_v26  ;;  %v2047_v12 = vand.u32 2147483647, %v2046_v4  ;;  %vm3612_vm4 = vcmp.lt.f32.partialorder %v2059_v5, 8388608.0  ;;  %v2064_v14 = vand.u32 2147483648, %v684_v57 }
 0x102   :  { %v1071_v17 = vmul.f32 %v2034_v11, %v3020_v42  ;;  %v2042_v18 = vsel %vm3598_vm1, %v2041_v6, %v681_v35  ;;  %v2055_v19 = vand.u32 2147483647, %v2054_v8  ;;  %v2062_v20 = vcvt.s32.f32 %v2061_v9 }
 0x103   :  { %v1072_v22 = vmul.f32 %v2042_v18, %v3020_v42  ;;  %v2049_v23 = vor.u32 %v2048_v61, %v2047_v12  ;;  %v493_v24 = vmin.f32 %v301_v58, 1.0  ;;  %v302_v25 = vmax.f32 %v110_v10, 0.0  ;;  %v115_v12 = vld [vmem:[#allocation2 + $0x2d0] sm:$0xff] }
 0x104   :  { %1263 = vst [vmem:[#allocation5 + $0x278] sm:$0xff] %v1071_v17  ;;  %v2057_v28 = vor.u32 %v2056_v0, %v2055_v19  ;;  %v2063_v32 = vand.u32 2147483647, %v2062_v20  ;;  %v303_v33 = vmax.f32 %v111_v15, 0.0  ;;  %v304_v34 = vmax.f32 %v112_v16, 0.0 }
 0x105   :  { %1264 = vst [vmem:[#allocation5 + $0x280] sm:$0xff] %v1072_v22  ;;  %v2050_v26 = vsel %vm3602_vm2, %v2049_v23, %v682_v55  ;;  %v685_v36 = vmul.f32 255.0, %v493_v24  ;;  %v494_v27 = vmin.f32 %v302_v25, 1.0  ;;  %v305_v35 = vmax.f32 %v113_v21, 0.0  ;;  %v117_v22 = vld [vmem:[#allocation2 + $0x2e0] sm:$0xff] }
 0x106   :  { %v1073_v29 = vmul.f32 %v2050_v26, %v3020_v42  ;;  %v2058_v37 = vsel %vm3606_vm3, %v2057_v28, %v683_v53  ;;  %v2065_v38 = vor.u32 %v2064_v14, %v2063_v32  ;;  %v495_v39 = vmin.f32 %v303_v33, 1.0  ;;  %v118_v32 = vld [vmem:[#allocation2 + $0x2e8] sm:$0xff] }
 0x107   :  { %v1074_v30 = vmul.f32 %v2058_v37, %v3020_v42  ;;  %v2067_v40 = vand.u32 2147483647, %v685_v36  ;;  %v2069_v41 = vcvt.f32.s32 %v685_v36  ;;  %v2072_v44 = vand.u32 2147483648, %v685_v36 }
 0x108   :  { %1265 = vst [vmem:[#allocation5 + $0x288] sm:$0xff] %v1073_v29  ;;  %v2066_v45 = vsel %vm3612_vm4, %v2065_v38, %v684_v57  ;;  %v686_v43 = vmul.f32 255.0, %v494_v27  ;;  %v687_v47 = vmul.f32 255.0, %v495_v39  ;;  %v496_v48 = vmin.f32 %v304_v34, 1.0 }
 0x109   :  { %1266 = vst [vmem:[#allocation5 + $0x290] sm:$0xff] %v1074_v30  ;;  %v1075_v49 = vmul.f32 %v2066_v45, %v3020_v42  ;;  %vm3629_vm5 = vcmp.lt.f32.partialorder %v2067_v40, 8388608.0  ;;  %v2070_v46 = vcvt.s32.f32 %v2069_v41  ;;  %v497_v51 = vmin.f32 %v305_v35, 1.0 }
 0x10a   :  { %v2075_v52 = vand.u32 2147483647, %v686_v43  ;;  %v2077_v54 = vcvt.f32.s32 %v686_v43  ;;  %v2080_v55 = vand.u32 2147483648, %v686_v43  ;;  %v2083_v56 = vand.u32 2147483647, %v687_v47 }
 0x10b   :  { %1267 = vst [vmem:[#allocation5 + $0x298] sm:$0xff] %v1075_v49  ;;  %v2071_v53 = vand.u32 2147483647, %v2070_v46  ;;  %v2085_v58 = vcvt.f32.s32 %v687_v47  ;;  %v2088_v57 = vand.u32 2147483648, %v687_v47  ;;  %v688_v59 = vmul.f32 255.0, %v496_v48  ;;  %v119_v46 = vld [vmem:[#allocation2 + $0x2f0] sm:$0xff] }
 0x10c   :  { %vm3633_vm6 = vcmp.lt.f32.partialorder %v2075_v52, 8388608.0  ;;  %v2078_v60 = vcvt.s32.f32 %v2077_v54  ;;  %vm3637_vm7 = vcmp.lt.f32.partialorder %v2083_v56, 8388608.0  ;;  %v689_v62 = vmul.f32 255.0, %v497_v51 }
 0x10d   :  { %v2073_v63 = vor.u32 %v2072_v44, %v2071_v53  ;;  %v2086_v1 = vcvt.s32.f32 %v2085_v58  ;;  %v2091_v0 = vand.u32 2147483647, %v688_v59  ;;  %v2093_v2 = vcvt.f32.s32 %v688_v59 }
 0x10e   :  { %v2079_v3 = vand.u32 2147483647, %v2078_v60  ;;  %v2096_v4 = vand.u32 2147483648, %v688_v59  ;;  %v2099_v5 = vand.u32 2147483647, %v689_v62  ;;  %v2101_v6 = vcvt.f32.s32 %v689_v62  ;;  %v125_v60 = vld [vmem:[#allocation2 + $0x320] sm:$0xff] }
 0x10f   :  { %v2074_v8 = vsel %vm3629_vm5, %v2073_v63, %v685_v36  ;;  %v2087_v9 = vand.u32 2147483647, %v2086_v1  ;;  %vm3643_vm8 = vcmp.lt.f32.partialorder %v2091_v0, 8388608.0  ;;  %v2094_v11 = vcvt.s32.f32 %v2093_v2 }
 0x110   :  { %v1076_v14 = vmul.f32 %v2074_v8, %v3020_v42  ;;  %v2081_v15 = vor.u32 %v2080_v55, %v2079_v3  ;;  %vm3648_vm9 = vcmp.lt.f32.partialorder %v2099_v5, 8388608.0  ;;  %v2102_v17 = vcvt.s32.f32 %v2101_v6 }
 0x111   :  { %v2089_v18 = vor.u32 %v2088_v57, %v2087_v9  ;;  %v2095_v19 = vand.u32 2147483647, %v2094_v11  ;;  %v2104_v20 = vand.u32 2147483648, %v689_v62  ;;  %v306_v21 = vmax.f32 %v114_v7, 0.0 }
 0x112   :  { %1268 = vst [vmem:[#allocation5 + $0x2a0] sm:$0xff] %v1076_v14  ;;  %v2082_v23 = vsel %vm3633_vm6, %v2081_v15, %v686_v43  ;;  %v2103_v24 = vand.u32 2147483647, %v2102_v17  ;;  %v307_v25 = vmax.f32 %v115_v12, 0.0  ;;  %v308_v28 = vmax.f32 %v116_v13, 0.0 }
 0x113   :  { %v1077_v33 = vmul.f32 %v2082_v23, %v3020_v42  ;;  %v2090_v34 = vsel %vm3637_vm7, %v2089_v18, %v687_v47  ;;  %v2097_v26 = vor.u32 %v2096_v4, %v2095_v19  ;;  %v498_v36 = vmin.f32 %v306_v21, 1.0 }
 0x114   :  { %v1078_v27 = vmul.f32 %v2090_v34, %v3020_v42  ;;  %v2105_v35 = vor.u32 %v2104_v20, %v2103_v24  ;;  %v499_v29 = vmin.f32 %v307_v25, 1.0  ;;  %v500_v37 = vmin.f32 %v308_v28, 1.0  ;;  %v122_v24 = vld [vmem:[#allocation2 + $0x308] sm:$0xff] }
 0x115   :  { %1269 = vst [vmem:[#allocation5 + $0x2a8] sm:$0xff] %v1077_v33  ;;  %v2098_v38 = vsel %vm3643_vm8, %v2097_v26, %v688_v59  ;;  %v690_v39 = vmul.f32 255.0, %v498_v36  ;;  %v309_v30 = vmax.f32 %v117_v22, 0.0  ;;  %v310_v40 = vmax.f32 %v118_v32, 0.0  ;;  %v120_v59 = vld [vmem:[#allocation2 + $0x2f8] sm:$0xff] }
 0x116   :  { %1270 = vst [vmem:[#allocation5 + $0x2b0] sm:$0xff] %v1078_v27  ;;  %v1079_v41 = vmul.f32 %v2098_v38, %v3020_v42  ;;  %v2106_v44 = vsel %vm3648_vm9, %v2105_v35, %v689_v62  ;;  %v691_v45 = vmul.f32 255.0, %v499_v29  ;;  %v692_v43 = vmul.f32 255.0, %v500_v37  ;;  %v123_v35 = vld [vmem:[#allocation2 + $0x310] sm:$0xff] }
 0x117   :  { %v1080_v47 = vmul.f32 %v2106_v44, %v3020_v42  ;;  %v2107_v48 = vand.u32 2147483647, %v690_v39  ;;  %v2109_v49 = vcvt.f32.s32 %v690_v39  ;;  %v2112_v50 = vand.u32 2147483648, %v690_v39 }
 0x118   :  { %1271 = vst [vmem:[#allocation5 + $0x2b8] sm:$0xff] %v1079_v41  ;;  %v2115_v51 = vand.u32 2147483647, %v691_v45  ;;  %v2117_v52 = vcvt.f32.s32 %v691_v45  ;;  %v2120_v54 = vand.u32 2147483648, %v691_v45  ;;  %v2123_v55 = vand.u32 2147483647, %v692_v43 }
 0x119   :  { %1272 = vst [vmem:[#allocation5 + $0x2c0] sm:$0xff] %v1080_v47  ;;  %vm3664_vm10 = vcmp.lt.f32.partialorder %v2107_v48, 8388608.0  ;;  %v2110_v53 = vcvt.s32.f32 %v2109_v49  ;;  %v2125_v58 = vcvt.f32.s32 %v692_v43  ;;  %v2128_v57 = vand.u32 2147483648, %v692_v43 }
 0x11a   :  { %vm3668_vm11 = vcmp.lt.f32.partialorder %v2115_v51, 8388608.0  ;;  %v2118_v61 = vcvt.s32.f32 %v2117_v52  ;;  %vm3672_vm12 = vcmp.lt.f32.partialorder %v2123_v55, 8388608.0  ;;  %v501_v63 = vmin.f32 %v309_v30, 1.0 }
 0x11b   :  { %v2111_v1 = vand.u32 2147483647, %v2110_v53  ;;  %v2126_v0 = vcvt.s32.f32 %v2125_v58  ;;  %v502_v2 = vmin.f32 %v310_v40, 1.0  ;;  %v311_v3 = vmax.f32 %v119_v46, 0.0  ;;  %v124_v53 = vld [vmem:[#allocation2 + $0x318] sm:$0xff] }
 0x11c   :  { %v2119_v4 = vand.u32 2147483647, %v2118_v61  ;;  %v693_v5 = vmul.f32 255.0, %v501_v63  ;;  %v312_v6 = vmax.f32 %v120_v59, 0.0  ;;  %v313_v7 = vmax.f32 %v121_v31, 0.0 }
 0x11d   :  { %v2113_v8 = vor.u32 %v2112_v50, %v2111_v1  ;;  %v2127_v9 = vand.u32 2147483647, %v2126_v0  ;;  %v694_v10 = vmul.f32 255.0, %v502_v2  ;;  %v503_v11 = vmin.f32 %v311_v3, 1.0 }
 0x11e   :  { %v2121_v12 = vor.u32 %v2120_v54, %v2119_v4  ;;  %v2131_v13 = vand.u32 2147483647, %v693_v5  ;;  %v2133_v14 = vcvt.f32.s32 %v693_v5  ;;  %v2136_v15 = vand.u32 2147483648, %v693_v5 }
 0x11f   :  { %v2114_v16 = vsel %vm3664_vm10, %v2113_v8, %v690_v39  ;;  %v2129_v17 = vor.u32 %v2128_v57, %v2127_v9  ;;  %v2139_v18 = vand.u32 2147483647, %v694_v10  ;;  %v2141_v19 = vcvt.f32.s32 %v694_v10 }
 0x120   :  { %v1081_v20 = vmul.f32 %v2114_v16, %v3020_v42  ;;  %v2122_v21 = vsel %vm3668_vm11, %v2121_v12, %v691_v45  ;;  %vm3681_vm13 = vcmp.lt.f32.partialorder %v2131_v13, 8388608.0  ;;  %v2134_v23 = vcvt.s32.f32 %v2133_v14 }
 0x121   :  { %v1082_v25 = vmul.f32 %v2122_v21, %v3020_v42  ;;  %v2130_v28 = vsel %vm3672_vm12, %v2129_v17, %v692_v43  ;;  %vm3688_vm14 = vcmp.lt.f32.partialorder %v2139_v18, 8388608.0  ;;  %v2142_v33 = vcvt.s32.f32 %v2141_v19 }
 0x122   :  { %1273 = vst [vmem:[#allocation5 + $0x2c8] sm:$0xff] %v1081_v20  ;;  %v1083_v34 = vmul.f32 %v2130_v28, %v3020_v42  ;;  %v2135_v26 = vand.u32 2147483647, %v2134_v23  ;;  %v2144_v36 = vand.u32 2147483648, %v694_v10  ;;  %v695_v27 = vmul.f32 255.0, %v503_v11 }
 0x123   :  { %1274 = vst [vmem:[#allocation5 + $0x2d0] sm:$0xff] %v1082_v25  ;;  %v2143_v29 = vand.u32 2147483647, %v2142_v33  ;;  %v504_v37 = vmin.f32 %v312_v6, 1.0  ;;  %v505_v38 = vmin.f32 %v313_v7, 1.0  ;;  %v314_v39 = vmax.f32 %v122_v24, 0.0 }
 0x124   :  { %1275 = vst [vmem:[#allocation5 + $0x2d8] sm:$0xff] %v1083_v34  ;;  %v2137_v30 = vor.u32 %v2136_v15, %v2135_v26  ;;  %v2147_v40 = vand.u32 2147483647, %v695_v27  ;;  %v2149_v41 = vcvt.f32.s32 %v695_v27  ;;  %v2152_v44 = vand.u32 2147483648, %v695_v27 }
 0x125   :  { %v2145_v45 = vor.u32 %v2144_v36, %v2143_v29  ;;  %v696_v43 = vmul.f32 255.0, %v504_v37  ;;  %v697_v47 = vmul.f32 255.0, %v505_v38  ;;  %v506_v48 = vmin.f32 %v314_v39, 1.0  ;;  %v126_v39 = vld [vmem:[#allocation2 + $0x328] sm:$0xff] }
 0x126   :  { %v2138_v49 = vsel %vm3681_vm13, %v2137_v30, %v693_v5  ;;  %vm3695_vm15 = vcmp.lt.f32.partialorder %v2147_v40, 8388608.0  ;;  %v2150_v46 = vcvt.s32.f32 %v2149_v41  ;;  %v315_v51 = vmax.f32 %v123_v35, 0.0  ;;  %v127_v30 = vld [vmem:[#allocation2 + $0x330] sm:$0xff] }
 0x127   :  { %v1084_v52 = vmul.f32 %v2138_v49, %v3020_v42  ;;  %v2146_v54 = vsel %vm3688_vm14, %v2145_v45, %v694_v10  ;;  %v2155_v55 = vand.u32 2147483647, %v696_v43  ;;  %v2157_v56 = vcvt.f32.s32 %v696_v43 }
 0x128   :  { %v1085_v58 = vmul.f32 %v2146_v54, %v3020_v42  ;;  %v2151_v57 = vand.u32 2147483647, %v2150_v46  ;;  %v2160_v59 = vand.u32 2147483648, %v696_v43  ;;  %v2163_v31 = vand.u32 2147483647, %v697_v47  ;;  %v129_v46 = vld [vmem:[#allocation2 + $0x340] sm:$0xff] }
 0x129   :  { %1276 = vst [vmem:[#allocation5 + $0x2e0] sm:$0xff] %v1084_v52  ;;  %vm3703_vm0 = vcmp.lt.f32.partialorder %v2155_v55, 8388608.0  ;;  %v2158_v62 = vcvt.s32.f32 %v2157_v56  ;;  %v2165_v63 = vcvt.f32.s32 %v697_v47  ;;  %v2168_v1 = vand.u32 2147483648, %v697_v47 }
 0x12a   :  { %1277 = vst [vmem:[#allocation5 + $0x2e8] sm:$0xff] %v1085_v58  ;;  %v2153_v0 = vor.u32 %v2152_v44, %v2151_v57  ;;  %vm3707_vm1 = vcmp.lt.f32.partialorder %v2163_v31, 8388608.0  ;;  %v698_v3 = vmul.f32 255.0, %v506_v48  ;;  %v507_v4 = vmin.f32 %v315_v51, 1.0  ;;  %v130_v51 = vld [vmem:[#allocation2 + $0x348] sm:$0xff] }
 0x12b   :  { %v2159_v5 = vand.u32 2147483647, %v2158_v62  ;;  %v2166_v6 = vcvt.s32.f32 %v2165_v63  ;;  %v316_v7 = vmax.f32 %v124_v53, 0.0  ;;  %v317_v8 = vmax.f32 %v125_v60, 0.0  ;;  %v131_v63 = vld [vmem:[#allocation2 + $0x350] sm:$0xff] }
 0x12c   :  { %v2154_v9 = vsel %vm3695_vm15, %v2153_v0, %v695_v27  ;;  %v2171_v10 = vand.u32 2147483647, %v698_v3  ;;  %v2173_v11 = vcvt.f32.s32 %v698_v3  ;;  %v2176_v12 = vand.u32 2147483648, %v698_v3 }
 0x12d   :  { %v1086_v13 = vmul.f32 %v2154_v9, %v3020_v42  ;;  %v2161_v14 = vor.u32 %v2160_v59, %v2159_v5  ;;  %v2167_v15 = vand.u32 2147483647, %v2166_v6  ;;  %v699_v16 = vmul.f32 255.0, %v507_v4 }
 0x12e   :  { %vm3714_vm2 = vcmp.lt.f32.partialorder %v2171_v10, 8388608.0  ;;  %v2174_v18 = vcvt.s32.f32 %v2173_v11  ;;  %v508_v19 = vmin.f32 %v316_v7, 1.0  ;;  %v509_v20 = vmin.f32 %v317_v8, 1.0 }
 0x12f   :  { %1278 = vst [vmem:[#allocation5 + $0x2f0] sm:$0xff] %v1086_v13  ;;  %v2162_v21 = vsel %vm3703_vm0, %v2161_v14, %v696_v43  ;;  %v2169_v22 = vor.u32 %v2168_v1, %v2167_v15  ;;  %v2179_v23 = vand.u32 2147483647, %v699_v16  ;;  %v2181_v24 = vcvt.f32.s32 %v699_v16  ;;  %v128_v43 = vld [vmem:[#allocation2 + $0x338] sm:$0xff] }
 0x130   :  { %v1087_v25 = vmul.f32 %v2162_v21, %v3020_v42  ;;  %v2175_v28 = vand.u32 2147483647, %v2174_v18  ;;  %v2184_v32 = vand.u32 2147483648, %v699_v16  ;;  %v700_v33 = vmul.f32 255.0, %v508_v19 }
 0x131   :  { %v2170_v34 = vsel %vm3707_vm1, %v2169_v22, %v697_v47  ;;  %vm3723_vm3 = vcmp.lt.f32.partialorder %v2179_v23, 8388608.0  ;;  %v2182_v36 = vcvt.s32.f32 %v2181_v24  ;;  %v701_v27 = vmul.f32 255.0, %v509_v20 }
 0x132   :  { %1279 = vst [vmem:[#allocation5 + $0x2f8] sm:$0xff] %v1087_v25  ;;  %v1088_v35 = vmul.f32 %v2170_v34, %v3020_v42  ;;  %v2177_v29 = vor.u32 %v2176_v12, %v2175_v28  ;;  %v2187_v37 = vand.u32 2147483647, %v700_v33  ;;  %v2189_v38 = vcvt.f32.s32 %v700_v33 }
 0x133   :  { %v2183_v40 = vand.u32 2147483647, %v2182_v36  ;;  %v2192_v41 = vand.u32 2147483648, %v700_v33  ;;  %v2195_v44 = vand.u32 2147483647, %v701_v27  ;;  %v2197_v45 = vcvt.f32.s32 %v701_v27 }
 0x134   :  { %1280 = vst [vmem:[#allocation5 + $0x300] sm:$0xff] %v1088_v35  ;;  %v2178_v47 = vsel %vm3714_vm2, %v2177_v29, %v698_v3  ;;  %vm3730_vm4 = vcmp.lt.f32.partialorder %v2187_v37, 8388608.0  ;;  %v2190_v49 = vcvt.s32.f32 %v2189_v38  ;;  %v2200_v50 = vand.u32 2147483648, %v701_v27 }
 0x135   :  { %v1089_v52 = vmul.f32 %v2178_v47, %v3020_v42  ;;  %v2185_v54 = vor.u32 %v2184_v32, %v2183_v40  ;;  %vm3735_vm5 = vcmp.lt.f32.partialorder %v2195_v44, 8388608.0  ;;  %v2198_v56 = vcvt.s32.f32 %v2197_v45 }
 0x136   :  { %v2191_v53 = vand.u32 2147483647, %v2190_v49  ;;  %v318_v58 = vmax.f32 %v126_v39, 0.0  ;;  %v319_v57 = vmax.f32 %v127_v30, 0.0  ;;  %v320_v59 = vmax.f32 %v128_v43, 0.0 }
 0x137   :  { %1281 = vst [vmem:[#allocation5 + $0x308] sm:$0xff] %v1089_v52  ;;  %v2186_v31 = vsel %vm3723_vm3, %v2185_v54, %v699_v16  ;;  %v2199_v60 = vand.u32 2147483647, %v2198_v56  ;;  %v321_v61 = vmax.f32 %v129_v46, 0.0  ;;  %v322_v62 = vmax.f32 %v130_v51, 0.0 }
 0x138   :  { %v1090_v1 = vmul.f32 %v2186_v31, %v3020_v42  ;;  %v2193_v0 = vor.u32 %v2192_v41, %v2191_v53  ;;  %v510_v2 = vmin.f32 %v318_v58, 1.0  ;;  %v511_v3 = vmin.f32 %v319_v57, 1.0 }
 0x139   :  { %v2201_v4 = vor.u32 %v2200_v50, %v2199_v60  ;;  %v512_v5 = vmin.f32 %v320_v59, 1.0  ;;  %v513_v6 = vmin.f32 %v321_v61, 1.0  ;;  %v514_v7 = vmin.f32 %v322_v62, 1.0  ;;  %v133_v59 = vld [vmem:[#allocation2 + $0x360] sm:$0xff] }
 0x13a   :  { %1282 = vst [vmem:[#allocation5 + $0x310] sm:$0xff] %v1090_v1  ;;  %v2194_v8 = vsel %vm3730_vm4, %v2193_v0, %v700_v33  ;;  %v702_v9 = vmul.f32 255.0, %v510_v2  ;;  %v703_v10 = vmul.f32 255.0, %v511_v3  ;;  %v323_v11 = vmax.f32 %v131_v63, 0.0  ;;  %v134_v63 = vld [vmem:[#allocation2 + $0x368] sm:$0xff] }
 0x13b   :  { %v1091_v12 = vmul.f32 %v2194_v8, %v3020_v42  ;;  %v2202_v13 = vsel %vm3735_vm5, %v2201_v4, %v701_v27  ;;  %v704_v14 = vmul.f32 255.0, %v512_v5  ;;  %v3747_v15 = vmul.f32 255.0, %v513_v6  ;;  %v132_v27 = vld [vmem:[#allocation2 + $0x358] sm:$0xff]  ;;  %v135_v4 = vld [vmem:[#allocation2 + $0x370] sm:$0xff] }
 0x13c   :  { %v1092_v16 = vmul.f32 %v2202_v13, %v3020_v42  ;;  %v2203_v17 = vand.u32 2147483647, %v702_v9  ;;  %v2205_v18 = vcvt.f32.s32 %v702_v9  ;;  %v2208_v19 = vand.u32 2147483648, %v702_v9  ;;  %v136_v5 = vld [vmem:[#allocation2 + $0x378] sm:$0xff] }
 0x13d   :  { %1283 = vst [vmem:[#allocation5 + $0x318] sm:$0xff] %v1091_v12  ;;  %v2211_v20 = vand.u32 2147483647, %v703_v10  ;;  %v2213_v21 = vcvt.f32.s32 %v703_v10  ;;  %v2216_v22 = vand.u32 2147483648, %v703_v10  ;;  %v2219_v23 = vand.u32 2147483647, %v704_v14 }
 0x13e   :  { %1284 = vst [vmem:[#allocation5 + $0x320] sm:$0xff] %v1092_v16  ;;  %vm3750_vm6 = vcmp.lt.f32.partialorder %v2203_v17, 8388608.0  ;;  %v2206_v25 = vcvt.s32.f32 %v2205_v18  ;;  %v2221_v28 = vcvt.f32.s32 %v704_v14  ;;  %v2224_v32 = vand.u32 2147483648, %v704_v14 }
 0x13f   :  { %vm3754_vm7 = vcmp.lt.f32.partialorder %v2211_v20, 8388608.0  ;;  %v2214_v34 = vcvt.s32.f32 %v2213_v21  ;;  %vm3758_vm8 = vcmp.lt.f32.partialorder %v2219_v23, 8388608.0  ;;  %v2227_v36 = vand.u32 2147483647, %v3747_v15 }
 0x140   :  { %v2207_v35 = vand.u32 2147483647, %v2206_v25  ;;  %v2222_v29 = vcvt.s32.f32 %v2221_v28  ;;  %v2229_v37 = vcvt.f32.s32 %v3747_v15  ;;  %v2232_v38 = vand.u32 2147483648, %v3747_v15 }
 0x141   :  { %v2215_v39 = vand.u32 2147483647, %v2214_v34  ;;  %vm3765_vm9 = vcmp.lt.f32.partialorder %v2227_v36, 8388608.0  ;;  %v706_v40 = vmul.f32 255.0, %v514_v7  ;;  %v515_v41 = vmin.f32 %v323_v11, 1.0 }
 0x142   :  { %v2209_v44 = vor.u32 %v2208_v19, %v2207_v35  ;;  %v2223_v45 = vand.u32 2147483647, %v2222_v29  ;;  %v2230_v43 = vcvt.s32.f32 %v2229_v37  ;;  %v324_v47 = vmax.f32 %v132_v27, 0.0 }
 0x143   :  { %v2217_v48 = vor.u32 %v2216_v22, %v2215_v39  ;;  %v2235_v49 = vand.u32 2147483647, %v706_v40  ;;  %v2237_v50 = vcvt.f32.s32 %v706_v40  ;;  %v2240_v46 = vand.u32 2147483648, %v706_v40 }
 0x144   :  { %v2210_v51 = vsel %vm3750_vm6, %v2209_v44, %v702_v9  ;;  %v2225_v52 = vor.u32 %v2224_v32, %v2223_v45  ;;  %v2231_v54 = vand.u32 2147483647, %v2230_v43  ;;  %v707_v55 = vmul.f32 255.0, %v515_v41 }
 0x145   :  { %v1093_v56 = vmul.f32 %v2210_v51, %v3020_v42  ;;  %v2218_v53 = vsel %vm3754_vm7, %v2217_v48, %v703_v10  ;;  %vm3774_vm10 = vcmp.lt.f32.partialorder %v2235_v49, 8388608.0  ;;  %v2238_v57 = vcvt.s32.f32 %v2237_v50  ;;  %v137_v10 = vld [vmem:[#allocation2 + $0x380] sm:$0xff] }
 0x146   :  { %v1094_v31 = vmul.f32 %v2218_v53, %v3020_v42  ;;  %v2226_v60 = vsel %vm3758_vm8, %v2225_v52, %v704_v14  ;;  %v2233_v61 = vor.u32 %v2232_v38, %v2231_v54  ;;  %v2243_v62 = vand.u32 2147483647, %v707_v55 }
 0x147   :  { %1285 = vst [vmem:[#allocation5 + $0x328] sm:$0xff] %v1093_v56  ;;  %v1095_v1 = vmul.f32 %v2226_v60, %v3020_v42  ;;  %v2239_v0 = vand.u32 2147483647, %v2238_v57  ;;  %v2245_v2 = vcvt.f32.s32 %v707_v55  ;;  %v2248_v3 = vand.u32 2147483648, %v707_v55  ;;  %v138_v60 = vld [vmem:[#allocation2 + $0x388] sm:$0xff] }
 0x148   :  { %1286 = vst [vmem:[#allocation5 + $0x330] sm:$0xff] %v1094_v31  ;;  %v2234_v6 = vsel %vm3765_vm9, %v2233_v61, %v3747_v15  ;;  %vm3785_vm11 = vcmp.lt.f32.partialorder %v2243_v62, 8388608.0  ;;  %v516_v8 = vmin.f32 %v324_v47, 1.0  ;;  %v325_v9 = vmax.f32 %v133_v59, 0.0 }
 0x149   :  { %1287 = vst [vmem:[#allocation5 + $0x338] sm:$0xff] %v1095_v1  ;;  %v1096_v11 = vmul.f32 %v2234_v6, %v3020_v42  ;;  %v2241_v12 = vor.u32 %v2240_v46, %v2239_v0  ;;  %v2246_v13 = vcvt.s32.f32 %v2245_v2  ;;  %v326_v14 = vmax.f32 %v134_v63, 0.0  ;;  %v139_v0 = vld [vmem:[#allocation2 + $0x390] sm:$0xff]  ;;  %v142_v46 = vld [vmem:[#allocation2 + $0x3a8] sm:$0xff]  ;;  %v144_v63 = vld [vmem:[#allocation2 + $0x3b8] sm:$0xff] }
 0x14a   :  { %v708_v16 = vmul.f32 255.0, %v516_v8  ;;  %v517_v17 = vmin.f32 %v325_v9, 1.0  ;;  %v327_v18 = vmax.f32 %v135_v4, 0.0  ;;  %v328_v19 = vmax.f32 %v136_v5, 0.0 }
 0x14b   :  { %1288 = vst [vmem:[#allocation5 + $0x340] sm:$0xff] %v1096_v11  ;;  %v2242_v15 = vsel %vm3774_vm10, %v2241_v12, %v706_v40  ;;  %v2247_v20 = vand.u32 2147483647, %v2246_v13  ;;  %v518_v21 = vmin.f32 %v326_v14, 1.0  ;;  %v329_v22 = vmax.f32 %v137_v10, 0.0  ;;  %v140_v14 = vld [vmem:[#allocation2 + $0x398] sm:$0xff] }
 0x14c   :  { %v1097_v23 = vmul.f32 %v2242_v15, %v3020_v42  ;;  %v2251_v24 = vand.u32 2147483647, %v708_v16  ;;  %v2253_v25 = vcvt.f32.s32 %v708_v16  ;;  %v2256_v28 = vand.u32 2147483648, %v708_v16 }
 0x14d   :  { %v2249_v32 = vor.u32 %v2248_v3, %v2247_v20  ;;  %v709_v33 = vmul.f32 255.0, %v517_v17  ;;  %v710_v34 = vmul.f32 255.0, %v518_v21  ;;  %v519_v26 = vmin.f32 %v327_v18, 1.0 }
 0x14e   :  { %1289 = vst [vmem:[#allocation5 + $0x348] sm:$0xff] %v1097_v23  ;;  %vm3793_vm12 = vcmp.lt.f32.partialorder %v2251_v24, 8388608.0  ;;  %v2254_v27 = vcvt.s32.f32 %v2253_v25  ;;  %v520_v35 = vmin.f32 %v328_v19, 1.0  ;;  %v521_v29 = vmin.f32 %v329_v22, 1.0  ;;  %v141_v23 = vld [vmem:[#allocation2 + $0x3a0] sm:$0xff] }
 0x14f   :  { %v2250_v37 = vsel %vm3785_vm11, %v2249_v32, %v707_v55  ;;  %v2259_v38 = vand.u32 2147483647, %v709_v33  ;;  %v2261_v39 = vcvt.f32.s32 %v709_v33  ;;  %v2264_v30 = vand.u32 2147483648, %v709_v33 }
 0x150   :  { %v1098_v40 = vmul.f32 %v2250_v37, %v3020_v42  ;;  %v2255_v41 = vand.u32 2147483647, %v2254_v27  ;;  %v2267_v44 = vand.u32 2147483647, %v710_v34  ;;  %v2269_v45 = vcvt.f32.s32 %v710_v34 }
 0x151   :  { %vm3800_vm13 = vcmp.lt.f32.partialorder %v2259_v38, 8388608.0  ;;  %v2262_v47 = vcvt.s32.f32 %v2261_v39  ;;  %v2272_v48 = vand.u32 2147483648, %v710_v34  ;;  %v711_v49 = vmul.f32 255.0, %v519_v26 }
 0x152   :  { %1290 = vst [vmem:[#allocation5 + $0x350] sm:$0xff] %v1098_v40  ;;  %v2257_v50 = vor.u32 %v2256_v28, %v2255_v41  ;;  %vm3804_vm14 = vcmp.lt.f32.partialorder %v2267_v44, 8388608.0  ;;  %v2270_v51 = vcvt.s32.f32 %v2269_v45  ;;  %v712_v52 = vmul.f32 255.0, %v520_v35 }
 0x153   :  { %v2263_v54 = vand.u32 2147483647, %v2262_v47  ;;  %v2275_v55 = vand.u32 2147483647, %v711_v49  ;;  %v2277_v56 = vcvt.f32.s32 %v711_v49  ;;  %v2280_v53 = vand.u32 2147483648, %v711_v49 }
 0x154   :  { %v2258_v58 = vsel %vm3793_vm12, %v2257_v50, %v708_v16  ;;  %v2271_v57 = vand.u32 2147483647, %v2270_v51  ;;  %v2283_v59 = vand.u32 2147483647, %v712_v52  ;;  %v2285_v31 = vcvt.f32.s32 %v712_v52 }
 0x155   :  { %v1099_v61 = vmul.f32 %v2258_v58, %v3020_v42  ;;  %v2265_v62 = vor.u32 %v2264_v30, %v2263_v54  ;;  %vm3811_vm15 = vcmp.lt.f32.partialorder %v2275_v55, 8388608.0  ;;  %v2278_v1 = vcvt.s32.f32 %v2277_v56 }
 0x156   :  { %v2273_v2 = vor.u32 %v2272_v48, %v2271_v57  ;;  %vm3815_vm0 = vcmp.lt.f32.partialorder %v2283_v59, 8388608.0  ;;  %v2286_v4 = vcvt.s32.f32 %v2285_v31  ;;  %v2288_v5 = vand.u32 2147483648, %v712_v52  ;;  %v143_v59 = vld [vmem:[#allocation2 + $0x3b0] sm:$0xff] }
 0x157   :  { %1291 = vst [vmem:[#allocation5 + $0x358] sm:$0xff] %v1099_v61  ;;  %v2266_v6 = vsel %vm3800_vm13, %v2265_v62, %v709_v33  ;;  %v2279_v7 = vand.u32 2147483647, %v2278_v1  ;;  %v713_v8 = vmul.f32 255.0, %v521_v29  ;;  %v330_v9 = vmax.f32 %v138_v60, 0.0 }
 0x158   :  { %v1100_v10 = vmul.f32 %v2266_v6, %v3020_v42  ;;  %v2274_v11 = vsel %vm3804_vm14, %v2273_v2, %v710_v34  ;;  %v2287_v12 = vand.u32 2147483647, %v2286_v4  ;;  %v331_v13 = vmax.f32 %v139_v0, 0.0 }
 0x159   :  { %v1101_v16 = vmul.f32 %v2274_v11, %v3020_v42  ;;  %v2281_v17 = vor.u32 %v2280_v53, %v2279_v7  ;;  %v2291_v18 = vand.u32 2147483647, %v713_v8  ;;  %v2293_v19 = vcvt.f32.s32 %v713_v8 }
 0x15a   :  { %1292 = vst [vmem:[#allocation5 + $0x360] sm:$0xff] %v1100_v10  ;;  %v2289_v15 = vor.u32 %v2288_v5, %v2287_v12  ;;  %v2296_v20 = vand.u32 2147483648, %v713_v8  ;;  %v522_v21 = vmin.f32 %v330_v9, 1.0  ;;  %v523_v22 = vmin.f32 %v331_v13, 1.0 }
 0x15b   :  { %1293 = vst [vmem:[#allocation5 + $0x368] sm:$0xff] %v1101_v16  ;;  %v2282_v24 = vsel %vm3811_vm15, %v2281_v17, %v711_v49  ;;  %vm3827_vm1 = vcmp.lt.f32.partialorder %v2291_v18, 8388608.0  ;;  %v2294_v28 = vcvt.s32.f32 %v2293_v19  ;;  %v332_v32 = vmax.f32 %v140_v14, 0.0 }
 0x15c   :  { %v1102_v33 = vmul.f32 %v2282_v24, %v3020_v42  ;;  %v2290_v34 = vsel %vm3815_vm0, %v2289_v15, %v712_v52  ;;  %v714_v26 = vmul.f32 255.0, %v522_v21  ;;  %v715_v36 = vmul.f32 255.0, %v523_v22  ;;  %v146_v21 = vld [vmem:[#allocation2 + $0x3c8] sm:$0xff] }
 0x15d   :  { %v1103_v27 = vmul.f32 %v2290_v34, %v3020_v42  ;;  %v2295_v35 = vand.u32 2147483647, %v2294_v28  ;;  %v524_v29 = vmin.f32 %v332_v32, 1.0  ;;  %v333_v37 = vmax.f32 %v141_v23, 0.0 }
 0x15e   :  { %1294 = vst [vmem:[#allocation5 + $0x370] sm:$0xff] %v1102_v33  ;;  %v2299_v38 = vand.u32 2147483647, %v714_v26  ;;  %v2301_v39 = vcvt.f32.s32 %v714_v26  ;;  %v2304_v30 = vand.u32 2147483648, %v714_v26  ;;  %v2307_v40 = vand.u32 2147483647, %v715_v36 }
 0x15f   :  { %1295 = vst [vmem:[#allocation5 + $0x378] sm:$0xff] %v1103_v27  ;;  %v2297_v41 = vor.u32 %v2296_v20, %v2295_v35  ;;  %v2309_v44 = vcvt.f32.s32 %v715_v36  ;;  %v2312_v45 = vand.u32 2147483648, %v715_v36  ;;  %v716_v43 = vmul.f32 255.0, %v524_v29  ;;  %v145_v20 = vld [vmem:[#allocation2 + $0x3c0] sm:$0xff] }
 0x160   :  { %vm3835_vm2 = vcmp.lt.f32.partialorder %v2299_v38, 8388608.0  ;;  %v2302_v48 = vcvt.s32.f32 %v2301_v39  ;;  %vm3839_vm3 = vcmp.lt.f32.partialorder %v2307_v40, 8388608.0  ;;  %v525_v50 = vmin.f32 %v333_v37, 1.0 }
 0x161   :  { %v2298_v51 = vsel %vm3827_vm1, %v2297_v41, %v713_v8  ;;  %v2310_v52 = vcvt.s32.f32 %v2309_v44  ;;  %v2315_v54 = vand.u32 2147483647, %v716_v43  ;;  %v2317_v55 = vcvt.f32.s32 %v716_v43 }
 0x162   :  { %v1104_v56 = vmul.f32 %v2298_v51, %v3020_v42  ;;  %v2303_v53 = vand.u32 2147483647, %v2302_v48  ;;  %v2320_v58 = vand.u32 2147483648, %v716_v43  ;;  %v717_v57 = vmul.f32 255.0, %v525_v50 }
 0x163   :  { %v2311_v31 = vand.u32 2147483647, %v2310_v52  ;;  %vm3846_vm4 = vcmp.lt.f32.partialorder %v2315_v54, 8388608.0  ;;  %v2318_v61 = vcvt.s32.f32 %v2317_v55  ;;  %v334_v62 = vmax.f32 %v142_v46, 0.0  ;;  %v149_v46 = vld [vmem:[#allocation2 + $0x3e0] sm:$0xff] }
 0x164   :  { %1296 = vst [vmem:[#allocation5 + $0x380] sm:$0xff] %v1104_v56  ;;  %v2305_v1 = vor.u32 %v2304_v30, %v2303_v53  ;;  %v2323_v0 = vand.u32 2147483647, %v717_v57  ;;  %v2325_v2 = vcvt.f32.s32 %v717_v57  ;;  %v2328_v3 = vand.u32 2147483648, %v717_v57 }
 0x165   :  { %v2313_v4 = vor.u32 %v2312_v45, %v2311_v31  ;;  %v2319_v5 = vand.u32 2147483647, %v2318_v61  ;;  %v526_v6 = vmin.f32 %v334_v62, 1.0  ;;  %v335_v7 = vmax.f32 %v143_v59, 0.0  ;;  %v147_v45 = vld [vmem:[#allocation2 + $0x3d0] sm:$0xff] }
 0x166   :  { %v2306_v8 = vsel %vm3835_vm2, %v2305_v1, %v714_v26  ;;  %vm3852_vm5 = vcmp.lt.f32.partialorder %v2323_v0, 8388608.0  ;;  %v2326_v10 = vcvt.s32.f32 %v2325_v2  ;;  %v336_v11 = vmax.f32 %v144_v63, 0.0 }
 0x167   :  { %v1105_v12 = vmul.f32 %v2306_v8, %v3020_v42  ;;  %v2314_v13 = vsel %vm3839_vm3, %v2313_v4, %v715_v36  ;;  %v2321_v14 = vor.u32 %v2320_v58, %v2319_v5  ;;  %v718_v16 = vmul.f32 255.0, %v526_v6 }
 0x168   :  { %v1106_v17 = vmul.f32 %v2314_v13, %v3020_v42  ;;  %v2327_v18 = vand.u32 2147483647, %v2326_v10  ;;  %v527_v19 = vmin.f32 %v335_v7, 1.0  ;;  %v528_v15 = vmin.f32 %v336_v11, 1.0  ;;  %v150_v10 = vld [vmem:[#allocation2 + $0x3e8] sm:$0xff]  ;;  %v151_v11 = vld [vmem:[#allocation2 + $0x3f0] sm:$0xff] }
 0x169   :  { %1297 = vst [vmem:[#allocation5 + $0x388] sm:$0xff] %v1105_v12  ;;  %v2322_v22 = vsel %vm3846_vm4, %v2321_v14, %v716_v43  ;;  %v2331_v23 = vand.u32 2147483647, %v718_v16  ;;  %v2333_v24 = vcvt.f32.s32 %v718_v16  ;;  %v2336_v25 = vand.u32 2147483648, %v718_v16  ;;  %v148_v43 = vld [vmem:[#allocation2 + $0x3d8] sm:$0xff]  ;;  %v154_v7 = vld [vmem:[#allocation2 + $0x408] sm:$0xff] }
 0x16a   :  { %1298 = vst [vmem:[#allocation5 + $0x390] sm:$0xff] %v1106_v17  ;;  %v1107_v28 = vmul.f32 %v2322_v22, %v3020_v42  ;;  %v2329_v32 = vor.u32 %v2328_v3, %v2327_v18  ;;  %v719_v33 = vmul.f32 255.0, %v527_v19  ;;  %v720_v34 = vmul.f32 255.0, %v528_v15  ;;  %v152_v17 = vld [vmem:[#allocation2 + $0x3f8] sm:$0xff] }
 0x16b   :  { %vm3863_vm6 = vcmp.lt.f32.partialorder %v2331_v23, 8388608.0  ;;  %v2334_v36 = vcvt.s32.f32 %v2333_v24  ;;  %v337_v27 = vmax.f32 %v145_v20, 0.0  ;;  %v338_v35 = vmax.f32 %v146_v21, 0.0 }
 0x16c   :  { %1299 = vst [vmem:[#allocation5 + $0x398] sm:$0xff] %v1107_v28  ;;  %v2330_v29 = vsel %vm3852_vm5, %v2329_v32, %v717_v57  ;;  %v2339_v37 = vand.u32 2147483647, %v719_v33  ;;  %v2341_v38 = vcvt.f32.s32 %v719_v33  ;;  %v2344_v39 = vand.u32 2147483648, %v719_v33 }
 0x16d   :  { %v1108_v30 = vmul.f32 %v2330_v29, %v3020_v42  ;;  %v2335_v40 = vand.u32 2147483647, %v2334_v36  ;;  %v2347_v41 = vand.u32 2147483647, %v720_v34  ;;  %v2349_v44 = vcvt.f32.s32 %v720_v34 }
 0x16e   :  { %vm3870_vm7 = vcmp.lt.f32.partialorder %v2339_v37, 8388608.0  ;;  %v2342_v48 = vcvt.s32.f32 %v2341_v38  ;;  %v2352_v49 = vand.u32 2147483648, %v720_v34  ;;  %v529_v50 = vmin.f32 %v337_v27, 1.0 }
 0x16f   :  { %1300 = vst [vmem:[#allocation5 + $0x3a0] sm:$0xff] %v1108_v30  ;;  %v2337_v51 = vor.u32 %v2336_v25, %v2335_v40  ;;  %vm3874_vm8 = vcmp.lt.f32.partialorder %v2347_v41, 8388608.0  ;;  %v2350_v54 = vcvt.s32.f32 %v2349_v44  ;;  %v530_v55 = vmin.f32 %v338_v35, 1.0 }
 0x170   :  { %v2343_v56 = vand.u32 2147483647, %v2342_v48  ;;  %v721_v53 = vmul.f32 255.0, %v529_v50  ;;  %v339_v58 = vmax.f32 %v147_v45, 0.0  ;;  %v340_v57 = vmax.f32 %v148_v43, 0.0 }
 0x171   :  { %v2338_v59 = vsel %vm3863_vm6, %v2337_v51, %v718_v16  ;;  %v2351_v31 = vand.u32 2147483647, %v2350_v54  ;;  %v722_v60 = vmul.f32 255.0, %v530_v55  ;;  %v341_v61 = vmax.f32 %v149_v46, 0.0 }
 0x172   :  { %v1109_v62 = vmul.f32 %v2338_v59, %v3020_v42  ;;  %v2345_v63 = vor.u32 %v2344_v39, %v2343_v56  ;;  %v2355_v1 = vand.u32 2147483647, %v721_v53  ;;  %v2357_v0 = vcvt.f32.s32 %v721_v53 }
 0x173   :  { %v2353_v2 = vor.u32 %v2352_v49, %v2351_v31  ;;  %v2360_v3 = vand.u32 2147483648, %v721_v53  ;;  %v2363_v4 = vand.u32 2147483647, %v722_v60  ;;  %v2365_v5 = vcvt.f32.s32 %v722_v60 }
 0x174   :  { %1301 = vst [vmem:[#allocation5 + $0x3a8] sm:$0xff] %v1109_v62  ;;  %v2346_v6 = vsel %vm3870_vm7, %v2345_v63, %v719_v33  ;;  %vm3883_vm9 = vcmp.lt.f32.partialorder %v2355_v1, 8388608.0  ;;  %v2358_v8 = vcvt.s32.f32 %v2357_v0  ;;  %v2368_v9 = vand.u32 2147483648, %v722_v60 }
 0x175   :  { %v1110_v12 = vmul.f32 %v2346_v6, %v3020_v42  ;;  %v2354_v13 = vsel %vm3874_vm8, %v2353_v2, %v720_v34  ;;  %vm3890_vm10 = vcmp.lt.f32.partialorder %v2363_v4, 8388608.0  ;;  %v2366_v16 = vcvt.s32.f32 %v2365_v5  ;;  %v153_v6 = vld [vmem:[#allocation2 + $0x400] sm:$0xff] }
 0x176   :  { %v1111_v18 = vmul.f32 %v2354_v13, %v3020_v42  ;;  %v2359_v19 = vand.u32 2147483647, %v2358_v8  ;;  %v531_v15 = vmin.f32 %v339_v58, 1.0  ;;  %v532_v20 = vmin.f32 %v340_v57, 1.0  ;;  %v155_v8 = vld [vmem:[#allocation2 + $0x410] sm:$0xff] }
 0x177   :  { %1302 = vst [vmem:[#allocation5 + $0x3b0] sm:$0xff] %v1110_v12  ;;  %v2367_v21 = vand.u32 2147483647, %v2366_v16  ;;  %v533_v22 = vmin.f32 %v341_v61, 1.0  ;;  %v342_v23 = vmax.f32 %v150_v10, 0.0  ;;  %v343_v24 = vmax.f32 %v151_v11, 0.0 }
 0x178   :  { %1303 = vst [vmem:[#allocation5 + $0x3b8] sm:$0xff] %v1111_v18  ;;  %v2361_v25 = vor.u32 %v2360_v3, %v2359_v19  ;;  %v723_v28 = vmul.f32 255.0, %v531_v15  ;;  %v724_v32 = vmul.f32 255.0, %v532_v20  ;;  %v344_v33 = vmax.f32 %v152_v17, 0.0 }
 0x179   :  { %v2369_v34 = vor.u32 %v2368_v9, %v2367_v21  ;;  %v725_v26 = vmul.f32 255.0, %v533_v22  ;;  %v534_v36 = vmin.f32 %v342_v23, 1.0  ;;  %v535_v27 = vmin.f32 %v343_v24, 1.0 }
 0x17a   :  { %v2362_v35 = vsel %vm3883_vm9, %v2361_v25, %v721_v53  ;;  %v2371_v29 = vand.u32 2147483647, %v723_v28  ;;  %v2373_v37 = vcvt.f32.s32 %v723_v28  ;;  %v2376_v38 = vand.u32 2147483648, %v723_v28 }
 0x17b   :  { %v1112_v39 = vmul.f32 %v2362_v35, %v3020_v42  ;;  %v2370_v30 = vsel %vm3890_vm10, %v2369_v34, %v722_v60  ;;  %v2379_v40 = vand.u32 2147483647, %v724_v32  ;;  %v2381_v41 = vcvt.f32.s32 %v724_v32  ;;  %v156_v34 = vld [vmem:[#allocation2 + $0x418] sm:$0xff]  ;;  %v163_v35 = vld [vmem:[#allocation2 + $0x450] sm:$0xff] }
 0x17c   :  { %v1113_v44 = vmul.f32 %v2370_v30, %v3020_v42  ;;  %vm3901_vm11 = vcmp.lt.f32.partialorder %v2371_v29, 8388608.0  ;;  %v2374_v43 = vcvt.s32.f32 %v2373_v37  ;;  %v2384_v47 = vand.u32 2147483648, %v724_v32 }
 0x17d   :  { %1304 = vst [vmem:[#allocation5 + $0x3c0] sm:$0xff] %v1112_v39  ;;  %vm3905_vm12 = vcmp.lt.f32.partialorder %v2379_v40, 8388608.0  ;;  %v2382_v49 = vcvt.s32.f32 %v2381_v41  ;;  %v2387_v50 = vand.u32 2147483647, %v725_v26  ;;  %v2389_v46 = vcvt.f32.s32 %v725_v26 }
 0x17e   :  { %1305 = vst [vmem:[#allocation5 + $0x3c8] sm:$0xff] %v1113_v44  ;;  %v2375_v51 = vand.u32 2147483647, %v2374_v43  ;;  %v2392_v52 = vand.u32 2147483648, %v725_v26  ;;  %v726_v54 = vmul.f32 255.0, %v534_v36  ;;  %v727_v55 = vmul.f32 255.0, %v535_v27 }
 0x17f   :  { %v2383_v56 = vand.u32 2147483647, %v2382_v49  ;;  %vm3909_vm13 = vcmp.lt.f32.partialorder %v2387_v50, 8388608.0  ;;  %v2390_v58 = vcvt.s32.f32 %v2389_v46  ;;  %v536_v57 = vmin.f32 %v344_v33, 1.0  ;;  %v157_v36 = vld [vmem:[#allocation2 + $0x420] sm:$0xff] }
 0x180   :  { %v2377_v59 = vor.u32 %v2376_v38, %v2375_v51  ;;  %v2395_v31 = vand.u32 2147483647, %v726_v54  ;;  %v2397_v60 = vcvt.f32.s32 %v726_v54  ;;  %v2400_v61 = vand.u32 2147483648, %v726_v54 }
 0x181   :  { %v2385_v62 = vor.u32 %v2384_v47, %v2383_v56  ;;  %v2391_v63 = vand.u32 2147483647, %v2390_v58  ;;  %v2403_v1 = vand.u32 2147483647, %v727_v55  ;;  %v2405_v0 = vcvt.f32.s32 %v727_v55 }
 0x182   :  { %v2378_v2 = vsel %vm3901_vm11, %v2377_v59, %v723_v28  ;;  %vm3915_vm14 = vcmp.lt.f32.partialorder %v2395_v31, 8388608.0  ;;  %v2398_v4 = vcvt.s32.f32 %v2397_v60  ;;  %v2408_v5 = vand.u32 2147483648, %v727_v55  ;;  %v158_v60 = vld [vmem:[#allocation2 + $0x428] sm:$0xff] }
 0x183   :  { %v1114_v9 = vmul.f32 %v2378_v2, %v3020_v42  ;;  %v2386_v10 = vsel %vm3905_vm12, %v2385_v62, %v724_v32  ;;  %v2393_v11 = vor.u32 %v2392_v52, %v2391_v63  ;;  %vm3922_vm15 = vcmp.lt.f32.partialorder %v2403_v1, 8388608.0  ;;  %v160_v2 = vld [vmem:[#allocation2 + $0x438] sm:$0xff] }
 0x184   :  { %v1115_v13 = vmul.f32 %v2386_v10, %v3020_v42  ;;  %v2399_v14 = vand.u32 2147483647, %v2398_v4  ;;  %v2406_v16 = vcvt.s32.f32 %v2405_v0  ;;  %v728_v17 = vmul.f32 255.0, %v536_v57 }
 0x185   :  { %1306 = vst [vmem:[#allocation5 + $0x3d0] sm:$0xff] %v1114_v9  ;;  %v2394_v18 = vsel %vm3909_vm13, %v2393_v11, %v725_v26  ;;  %v345_v19 = vmax.f32 %v153_v6, 0.0  ;;  %v346_v15 = vmax.f32 %v154_v7, 0.0  ;;  %v347_v20 = vmax.f32 %v155_v8, 0.0 }
 0x186   :  { %1307 = vst [vmem:[#allocation5 + $0x3d8] sm:$0xff] %v1115_v13  ;;  %v1116_v21 = vmul.f32 %v2394_v18, %v3020_v42  ;;  %v2401_v22 = vor.u32 %v2400_v61, %v2399_v14  ;;  %v2407_v23 = vand.u32 2147483647, %v2406_v16  ;;  %v2411_v24 = vand.u32 2147483647, %v728_v17  ;;  %v159_v61 = vld [vmem:[#allocation2 + $0x430] sm:$0xff] }
 0x187   :  { %v2413_v25 = vcvt.f32.s32 %v728_v17  ;;  %v2416_v28 = vand.u32 2147483648, %v728_v17  ;;  %v537_v32 = vmin.f32 %v345_v19, 1.0  ;;  %v538_v33 = vmin.f32 %v346_v15, 1.0 }
 0x188   :  { %1308 = vst [vmem:[#allocation5 + $0x3e0] sm:$0xff] %v1116_v21  ;;  %v2402_v27 = vsel %vm3915_vm14, %v2401_v22, %v726_v54  ;;  %v2409_v26 = vor.u32 %v2408_v5, %v2407_v23  ;;  %vm3932_vm0 = vcmp.lt.f32.partialorder %v2411_v24, 8388608.0  ;;  %v539_v29 = vmin.f32 %v347_v20, 1.0 }
 0x189   :  { %v1117_v37 = vmul.f32 %v2402_v27, %v3020_v42  ;;  %v2414_v38 = vcvt.s32.f32 %v2413_v25  ;;  %v729_v39 = vmul.f32 255.0, %v537_v32  ;;  %v730_v30 = vmul.f32 255.0, %v538_v33  ;;  %v161_v32 = vld [vmem:[#allocation2 + $0x440] sm:$0xff]  ;;  %v162_v33 = vld [vmem:[#allocation2 + $0x448] sm:$0xff] }
 0x18a   :  { %v2410_v40 = vsel %vm3922_vm15, %v2409_v26, %v727_v55  ;;  %v3939_v41 = vmul.f32 255.0, %v539_v29  ;;  %v348_v44 = vmax.f32 %v156_v34, 0.0  ;;  %v349_v45 = vmax.f32 %v157_v36, 0.0 }
 0x18b   :  { %1309 = vst [vmem:[#allocation5 + $0x3e8] sm:$0xff] %v1117_v37  ;;  %v1118_v43 = vmul.f32 %v2410_v40, %v3020_v42  ;;  %v2415_v47 = vand.u32 2147483647, %v2414_v38  ;;  %v2419_v48 = vand.u32 2147483647, %v729_v39  ;;  %v2421_v49 = vcvt.f32.s32 %v729_v39 }
 0x18c   :  { %v2424_v50 = vand.u32 2147483648, %v729_v39  ;;  %v2427_v46 = vand.u32 2147483647, %v730_v30  ;;  %v2429_v51 = vcvt.f32.s32 %v730_v30  ;;  %v2432_v52 = vand.u32 2147483648, %v730_v30 }
 0x18d   :  { %1310 = vst [vmem:[#allocation5 + $0x3f0] sm:$0xff] %v1118_v43  ;;  %v2417_v54 = vor.u32 %v2416_v28, %v2415_v47  ;;  %vm3942_vm1 = vcmp.lt.f32.partialorder %v2419_v48, 8388608.0  ;;  %v2422_v55 = vcvt.s32.f32 %v2421_v49  ;;  %v2435_v53 = vand.u32 2147483647, %v3939_v41 }
 0x18e   :  { %vm3947_vm2 = vcmp.lt.f32.partialorder %v2427_v46, 8388608.0  ;;  %v2430_v57 = vcvt.s32.f32 %v2429_v51  ;;  %v2437_v59 = vcvt.f32.s32 %v3939_v41  ;;  %v2440_v31 = vand.u32 2147483648, %v3939_v41 }
 0x18f   :  { %v2418_v62 = vsel %vm3932_vm0, %v2417_v54, %v728_v17  ;;  %v2423_v63 = vand.u32 2147483647, %v2422_v55  ;;  %vm3955_vm3 = vcmp.lt.f32.partialorder %v2435_v53, 8388608.0  ;;  %v540_v0 = vmin.f32 %v348_v44, 1.0 }
 0x190   :  { %v1119_v3 = vmul.f32 %v2418_v62, %v3020_v42  ;;  %v2431_v4 = vand.u32 2147483647, %v2430_v57  ;;  %v2438_v5 = vcvt.s32.f32 %v2437_v59  ;;  %v541_v6 = vmin.f32 %v349_v45, 1.0 }
 0x191   :  { %v2425_v7 = vor.u32 %v2424_v50, %v2423_v63  ;;  %v732_v8 = vmul.f32 255.0, %v540_v0  ;;  %v350_v9 = vmax.f32 %v158_v60, 0.0  ;;  %v351_v10 = vmax.f32 %v159_v61, 0.0  ;;  %v164_v63 = vld [vmem:[#allocation2 + $0x458] sm:$0xff] }
 0x192   :  { %1311 = vst [vmem:[#allocation5 + $0x3f8] sm:$0xff] %v1119_v3  ;;  %v2433_v11 = vor.u32 %v2432_v52, %v2431_v4  ;;  %v2439_v12 = vand.u32 2147483647, %v2438_v5  ;;  %v733_v13 = vmul.f32 255.0, %v541_v6  ;;  %v352_v14 = vmax.f32 %v160_v2, 0.0  ;;  %v165_v4 = vld [vmem:[#allocation2 + $0x460] sm:$0xff] }
 0x193   :  { %v2426_v16 = vsel %vm3942_vm1, %v2425_v7, %v729_v39  ;;  %v2443_v17 = vand.u32 2147483647, %v732_v8  ;;  %v2445_v18 = vcvt.f32.s32 %v732_v8  ;;  %v2448_v19 = vand.u32 2147483648, %v732_v8 }
 0x194   :  { %v1120_v15 = vmul.f32 %v2426_v16, %v3020_v42  ;;  %v2434_v20 = vsel %vm3947_vm2, %v2433_v11, %v730_v30  ;;  %v2441_v21 = vor.u32 %v2440_v31, %v2439_v12  ;;  %v2451_v22 = vand.u32 2147483647, %v733_v13 }
 0x195   :  { %v1121_v23 = vmul.f32 %v2434_v20, %v3020_v42  ;;  %vm3966_vm4 = vcmp.lt.f32.partialorder %v2443_v17, 8388608.0  ;;  %v2446_v25 = vcvt.s32.f32 %v2445_v18  ;;  %v2453_v28 = vcvt.f32.s32 %v733_v13 }
 0x196   :  { %1312 = vst [vmem:[#allocation5 + $0x400] sm:$0xff] %v1120_v15  ;;  %v2442_v34 = vsel %vm3955_vm3, %v2441_v21, %v3939_v41  ;;  %vm3973_vm5 = vcmp.lt.f32.partialorder %v2451_v22, 8388608.0  ;;  %v2456_v27 = vand.u32 2147483648, %v733_v13  ;;  %v542_v26 = vmin.f32 %v350_v9, 1.0 }
 0x197   :  { %1313 = vst [vmem:[#allocation5 + $0x408] sm:$0xff] %v1121_v23  ;;  %v1122_v29 = vmul.f32 %v2442_v34, %v3020_v42  ;;  %v2447_v37 = vand.u32 2147483647, %v2446_v25  ;;  %v2454_v38 = vcvt.s32.f32 %v2453_v28  ;;  %v543_v39 = vmin.f32 %v351_v10, 1.0 }
 0x198   :  { %v734_v30 = vmul.f32 255.0, %v542_v26  ;;  %v544_v40 = vmin.f32 %v352_v14, 1.0  ;;  %v353_v44 = vmax.f32 %v161_v32, 0.0  ;;  %v354_v45 = vmax.f32 %v162_v33, 0.0 }
 0x199   :  { %1314 = vst [vmem:[#allocation5 + $0x410] sm:$0xff] %v1122_v29  ;;  %v2449_v43 = vor.u32 %v2448_v19, %v2447_v37  ;;  %v2455_v41 = vand.u32 2147483647, %v2454_v38  ;;  %v735_v47 = vmul.f32 255.0, %v543_v39  ;;  %v355_v48 = vmax.f32 %v163_v35, 0.0  ;;  %v166_v39 = vld [vmem:[#allocation2 + $0x468] sm:$0xff] }
 0x19a   :  { %v2459_v49 = vand.u32 2147483647, %v734_v30  ;;  %v2461_v50 = vcvt.f32.s32 %v734_v30  ;;  %v2464_v46 = vand.u32 2147483648, %v734_v30  ;;  %v736_v51 = vmul.f32 255.0, %v544_v40 }
 0x19b   :  { %v2450_v52 = vsel %vm3966_vm4, %v2449_v43, %v732_v8  ;;  %v2457_v54 = vor.u32 %v2456_v27, %v2455_v41  ;;  %v2467_v56 = vand.u32 2147483647, %v735_v47  ;;  %v2469_v55 = vcvt.f32.s32 %v735_v47 }
 0x19c   :  { %v1123_v53 = vmul.f32 %v2450_v52, %v3020_v42  ;;  %vm3981_vm6 = vcmp.lt.f32.partialorder %v2459_v49, 8388608.0  ;;  %v2462_v57 = vcvt.s32.f32 %v2461_v50  ;;  %v2472_v59 = vand.u32 2147483648, %v735_v47 }
 0x19d   :  { %v2458_v31 = vsel %vm3973_vm5, %v2457_v54, %v733_v13  ;;  %vm3987_vm7 = vcmp.lt.f32.partialorder %v2467_v56, 8388608.0  ;;  %v2470_v61 = vcvt.s32.f32 %v2469_v55  ;;  %v2475_v62 = vand.u32 2147483647, %v736_v51 }
 0x19e   :  { %1315 = vst [vmem:[#allocation5 + $0x418] sm:$0xff] %v1123_v53  ;;  %v1124_v1 = vmul.f32 %v2458_v31, %v3020_v42  ;;  %v2463_v0 = vand.u32 2147483647, %v2462_v57  ;;  %v2477_v2 = vcvt.f32.s32 %v736_v51  ;;  %v2480_v3 = vand.u32 2147483648, %v736_v51 }
 0x19f   :  { %v2471_v5 = vand.u32 2147483647, %v2470_v61  ;;  %vm3992_vm8 = vcmp.lt.f32.partialorder %v2475_v62, 8388608.0  ;;  %v545_v7 = vmin.f32 %v353_v44, 1.0  ;;  %v546_v8 = vmin.f32 %v354_v45, 1.0 }
 0x1a0   :  { %1316 = vst [vmem:[#allocation5 + $0x420] sm:$0xff] %v1124_v1  ;;  %v2465_v9 = vor.u32 %v2464_v46, %v2463_v0  ;;  %v2478_v10 = vcvt.s32.f32 %v2477_v2  ;;  %v547_v11 = vmin.f32 %v355_v48, 1.0  ;;  %v356_v12 = vmax.f32 %v164_v63, 0.0 }
 0x1a1   :  { %v2473_v13 = vor.u32 %v2472_v59, %v2471_v5  ;;  %v737_v14 = vmul.f32 255.0, %v545_v7  ;;  %v738_v16 = vmul.f32 255.0, %v546_v8  ;;  %v357_v17 = vmax.f32 %v165_v4, 0.0  ;;  %v168_v8 = vld [vmem:[#allocation2 + $0x478] sm:$0xff] }
 0x1a2   :  { %v2466_v18 = vsel %vm3981_vm6, %v2465_v9, %v734_v30  ;;  %v2479_v19 = vand.u32 2147483647, %v2478_v10  ;;  %v739_v15 = vmul.f32 255.0, %v547_v11  ;;  %v548_v20 = vmin.f32 %v356_v12, 1.0  ;;  %v167_v30 = vld [vmem:[#allocation2 + $0x470] sm:$0xff]  ;;  %v169_v9 = vld [vmem:[#allocation2 + $0x480] sm:$0xff] }
 0x1a3   :  { %v1125_v21 = vmul.f32 %v2466_v18, %v3020_v42  ;;  %v2474_v22 = vsel %vm3987_vm7, %v2473_v13, %v735_v47  ;;  %v2483_v23 = vand.u32 2147483647, %v737_v14  ;;  %v2485_v24 = vcvt.f32.s32 %v737_v14 }
 0x1a4   :  { %v1126_v25 = vmul.f32 %v2474_v22, %v3020_v42  ;;  %v2481_v28 = vor.u32 %v2480_v3, %v2479_v19  ;;  %v2488_v32 = vand.u32 2147483648, %v737_v14  ;;  %v2491_v33 = vand.u32 2147483647, %v738_v16 }
 0x1a5   :  { %1317 = vst [vmem:[#allocation5 + $0x428] sm:$0xff] %v1125_v21  ;;  %vm4002_vm9 = vcmp.lt.f32.partialorder %v2483_v23, 8388608.0  ;;  %v2486_v36 = vcvt.s32.f32 %v2485_v24  ;;  %v2493_v27 = vcvt.f32.s32 %v738_v16  ;;  %v2496_v26 = vand.u32 2147483648, %v738_v16 }
 0x1a6   :  { %1318 = vst [vmem:[#allocation5 + $0x430] sm:$0xff] %v1126_v25  ;;  %v2482_v35 = vsel %vm3992_vm8, %v2481_v28, %v736_v51  ;;  %vm4008_vm10 = vcmp.lt.f32.partialorder %v2491_v33, 8388608.0  ;;  %v2499_v37 = vand.u32 2147483647, %v739_v15  ;;  %v2501_v38 = vcvt.f32.s32 %v739_v15 }
 0x1a7   :  { %v1127_v40 = vmul.f32 %v2482_v35, %v3020_v42  ;;  %v2487_v44 = vand.u32 2147483647, %v2486_v36  ;;  %v2494_v45 = vcvt.s32.f32 %v2493_v27  ;;  %v2504_v43 = vand.u32 2147483648, %v739_v15  ;;  %v171_v27 = vld [vmem:[#allocation2 + $0x490] sm:$0xff] }
 0x1a8   :  { %vm4013_vm11 = vcmp.lt.f32.partialorder %v2499_v37, 8388608.0  ;;  %v2502_v47 = vcvt.s32.f32 %v2501_v38  ;;  %v740_v48 = vmul.f32 255.0, %v548_v20  ;;  %v549_v49 = vmin.f32 %v357_v17, 1.0  ;;  %v172_v38 = vld [vmem:[#allocation2 + $0x498] sm:$0xff] }
 0x1a9   :  { %1319 = vst [vmem:[#allocation5 + $0x438] sm:$0xff] %v1127_v40  ;;  %v2489_v50 = vor.u32 %v2488_v32, %v2487_v44  ;;  %v2495_v46 = vand.u32 2147483647, %v2494_v45  ;;  %v358_v51 = vmax.f32 %v166_v39, 0.0  ;;  %v359_v52 = vmax.f32 %v167_v30, 0.0 }
 0x1aa   :  { %v2503_v54 = vand.u32 2147483647, %v2502_v47  ;;  %v2507_v56 = vand.u32 2147483647, %v740_v48  ;;  %v2509_v55 = vcvt.f32.s32 %v740_v48  ;;  %v2512_v53 = vand.u32 2147483648, %v740_v48 }
 0x1ab   :  { %v2490_v58 = vsel %vm4002_vm9, %v2489_v50, %v737_v14  ;;  %v2497_v57 = vor.u32 %v2496_v26, %v2495_v46  ;;  %v741_v59 = vmul.f32 255.0, %v549_v49  ;;  %v550_v31 = vmin.f32 %v358_v51, 1.0  ;;  %v170_v14 = vld [vmem:[#allocation2 + $0x488] sm:$0xff] }
 0x1ac   :  { %v1128_v60 = vmul.f32 %v2490_v58, %v3020_v42  ;;  %v2505_v61 = vor.u32 %v2504_v43, %v2503_v54  ;;  %vm4020_vm12 = vcmp.lt.f32.partialorder %v2507_v56, 8388608.0  ;;  %v2510_v63 = vcvt.s32.f32 %v2509_v55 }
 0x1ad   :  { %v2498_v1 = vsel %vm4008_vm10, %v2497_v57, %v738_v16  ;;  %v2515_v0 = vand.u32 2147483647, %v741_v59  ;;  %v2517_v2 = vcvt.f32.s32 %v741_v59  ;;  %v2520_v3 = vand.u32 2147483648, %v741_v59 }
 0x1ae   :  { %1320 = vst [vmem:[#allocation5 + $0x440] sm:$0xff] %v1128_v60  ;;  %v1129_v4 = vmul.f32 %v2498_v1, %v3020_v42  ;;  %v2506_v5 = vsel %vm4013_vm11, %v2505_v61, %v739_v15  ;;  %v2511_v6 = vand.u32 2147483647, %v2510_v63  ;;  %v742_v7 = vmul.f32 255.0, %v550_v31  ;;  %v177_v63 = vld [vmem:[#allocation2 + $0x4c0] sm:$0xff] }
 0x1af   :  { %v1130_v10 = vmul.f32 %v2506_v5, %v3020_v42  ;;  %vm4030_vm13 = vcmp.lt.f32.partialorder %v2515_v0, 8388608.0  ;;  %v2518_v12 = vcvt.s32.f32 %v2517_v2  ;;  %v551_v13 = vmin.f32 %v359_v52, 1.0  ;;  %v173_v2 = vld [vmem:[#allocation2 + $0x4a0] sm:$0xff] }
 0x1b0   :  { %1321 = vst [vmem:[#allocation5 + $0x448] sm:$0xff] %v1129_v4  ;;  %v2513_v16 = vor.u32 %v2512_v53, %v2511_v6  ;;  %v2523_v17 = vand.u32 2147483647, %v742_v7  ;;  %v2525_v18 = vcvt.f32.s32 %v742_v7  ;;  %v2528_v19 = vand.u32 2147483648, %v742_v7  ;;  %v175_v4 = vld [vmem:[#allocation2 + $0x4b0] sm:$0xff] }
 0x1b1   :  { %1322 = vst [vmem:[#allocation5 + $0x450] sm:$0xff] %v1130_v10  ;;  %v2519_v15 = vand.u32 2147483647, %v2518_v12  ;;  %v743_v20 = vmul.f32 255.0, %v551_v13  ;;  %v360_v21 = vmax.f32 %v168_v8, 0.0  ;;  %v361_v22 = vmax.f32 %v169_v9, 0.0 }
 0x1b2   :  { %v2514_v23 = vsel %vm4020_vm12, %v2513_v16, %v740_v48  ;;  %vm4036_vm14 = vcmp.lt.f32.partialorder %v2523_v17, 8388608.0  ;;  %v2526_v25 = vcvt.s32.f32 %v2525_v18  ;;  %v362_v28 = vmax.f32 %v170_v14, 0.0 }
 0x1b3   :  { %v1131_v32 = vmul.f32 %v2514_v23, %v3020_v42  ;;  %v2521_v33 = vor.u32 %v2520_v3, %v2519_v15  ;;  %v2531_v34 = vand.u32 2147483647, %v743_v20  ;;  %v2533_v36 = vcvt.f32.s32 %v743_v20  ;;  %v174_v3 = vld [vmem:[#allocation2 + $0x4a8] sm:$0xff] }
 0x1b4   :  { %v2527_v26 = vand.u32 2147483647, %v2526_v25  ;;  %v2536_v35 = vand.u32 2147483648, %v743_v20  ;;  %v552_v29 = vmin.f32 %v360_v21, 1.0  ;;  %v553_v37 = vmin.f32 %v361_v22, 1.0 }
 0x1b5   :  { %1323 = vst [vmem:[#allocation5 + $0x458] sm:$0xff] %v1131_v32  ;;  %v2522_v39 = vsel %vm4030_vm13, %v2521_v33, %v741_v59  ;;  %vm4043_vm15 = vcmp.lt.f32.partialorder %v2531_v34, 8388608.0  ;;  %v2534_v40 = vcvt.s32.f32 %v2533_v36  ;;  %v554_v44 = vmin.f32 %v362_v28, 1.0 }
 0x1b6   :  { %v1132_v45 = vmul.f32 %v2522_v39, %v3020_v42  ;;  %v2529_v43 = vor.u32 %v2528_v19, %v2527_v26  ;;  %v744_v41 = vmul.f32 255.0, %v552_v29  ;;  %v745_v47 = vmul.f32 255.0, %v553_v37 }
 0x1b7   :  { %v2535_v48 = vand.u32 2147483647, %v2534_v40  ;;  %v746_v49 = vmul.f32 255.0, %v554_v44  ;;  %v363_v50 = vmax.f32 %v171_v27, 0.0  ;;  %v364_v46 = vmax.f32 %v172_v38, 0.0 }
 0x1b8   :  { %1324 = vst [vmem:[#allocation5 + $0x460] sm:$0xff] %v1132_v45  ;;  %v2530_v51 = vsel %vm4036_vm14, %v2529_v43, %v742_v7  ;;  %v2539_v52 = vand.u32 2147483647, %v744_v41  ;;  %v2541_v54 = vcvt.f32.s32 %v744_v41  ;;  %v2544_v56 = vand.u32 2147483648, %v744_v41 }
 0x1b9   :  { %v1133_v55 = vmul.f32 %v2530_v51, %v3020_v42  ;;  %v2537_v53 = vor.u32 %v2536_v35, %v2535_v48  ;;  %v2547_v58 = vand.u32 2147483647, %v745_v47  ;;  %v2549_v57 = vcvt.f32.s32 %v745_v47  ;;  %v176_v35 = vld [vmem:[#allocation2 + $0x4b8] sm:$0xff] }
 0x1ba   :  { %vm4051_vm0 = vcmp.lt.f32.partialorder %v2539_v52, 8388608.0  ;;  %v2542_v31 = vcvt.s32.f32 %v2541_v54  ;;  %v2552_v60 = vand.u32 2147483648, %v745_v47  ;;  %v2555_v61 = vand.u32 2147483647, %v746_v49 }
 0x1bb   :  { %1325 = vst [vmem:[#allocation5 + $0x468] sm:$0xff] %v1133_v55  ;;  %v2538_v62 = vsel %vm4043_vm15, %v2537_v53, %v743_v20  ;;  %vm4057_vm1 = vcmp.lt.f32.partialorder %v2547_v58, 8388608.0  ;;  %v2550_v1 = vcvt.s32.f32 %v2549_v57  ;;  %v2557_v0 = vcvt.f32.s32 %v746_v49 }
 0x1bc   :  { %v1134_v5 = vmul.f32 %v2538_v62, %v3020_v42  ;;  %v2543_v6 = vand.u32 2147483647, %v2542_v31  ;;  %vm4062_vm2 = vcmp.lt.f32.partialorder %v2555_v61, 8388608.0  ;;  %v2560_v8 = vand.u32 2147483648, %v746_v49 }
 0x1bd   :  { %v2551_v9 = vand.u32 2147483647, %v2550_v1  ;;  %v2558_v10 = vcvt.s32.f32 %v2557_v0  ;;  %v555_v11 = vmin.f32 %v363_v50, 1.0  ;;  %v556_v12 = vmin.f32 %v364_v46, 1.0 }
 0x1be   :  { %1326 = vst [vmem:[#allocation5 + $0x470] sm:$0xff] %v1134_v5  ;;  %v2545_v13 = vor.u32 %v2544_v56, %v2543_v6  ;;  %v365_v14 = vmax.f32 %v173_v2, 0.0  ;;  %v366_v16 = vmax.f32 %v174_v3, 0.0  ;;  %v367_v17 = vmax.f32 %v175_v4, 0.0  ;;  %v178_v4 = vld [vmem:[#allocation2 + $0x4c8] sm:$0xff]  ;;  %v179_v5 = vld [vmem:[#allocation2 + $0x4d0] sm:$0xff] }
 0x1bf   :  { %v2553_v18 = vor.u32 %v2552_v60, %v2551_v9  ;;  %v2559_v19 = vand.u32 2147483647, %v2558_v10  ;;  %v747_v15 = vmul.f32 255.0, %v555_v11  ;;  %v748_v20 = vmul.f32 255.0, %v556_v12  ;;  %v180_v10 = vld [vmem:[#allocation2 + $0x4d8] sm:$0xff]  ;;  %v181_v60 = vld [vmem:[#allocation2 + $0x4e0] sm:$0xff] }
 0x1c0   :  { %v2546_v21 = vsel %vm4051_vm0, %v2545_v13, %v744_v41  ;;  %v557_v22 = vmin.f32 %v365_v14, 1.0  ;;  %v558_v23 = vmin.f32 %v366_v16, 1.0  ;;  %v559_v24 = vmin.f32 %v367_v17, 1.0  ;;  %v183_v2 = vld [vmem:[#allocation2 + $0x4f0] sm:$0xff] }
 0x1c1   :  { %v1135_v25 = vmul.f32 %v2546_v21, %v3020_v42  ;;  %v2554_v28 = vsel %vm4057_vm1, %v2553_v18, %v745_v47  ;;  %v2561_v32 = vor.u32 %v2560_v8, %v2559_v19  ;;  %v2563_v33 = vand.u32 2147483647, %v747_v15 }
 0x1c2   :  { %v1136_v34 = vmul.f32 %v2554_v28, %v3020_v42  ;;  %v2565_v36 = vcvt.f32.s32 %v747_v15  ;;  %v2568_v27 = vand.u32 2147483648, %v747_v15  ;;  %v2571_v26 = vand.u32 2147483647, %v748_v20 }
 0x1c3   :  { %1327 = vst [vmem:[#allocation5 + $0x478] sm:$0xff] %v1135_v25  ;;  %v2562_v29 = vsel %vm4062_vm2, %v2561_v32, %v746_v49  ;;  %vm4074_vm3 = vcmp.lt.f32.partialorder %v2563_v33, 8388608.0  ;;  %v2573_v38 = vcvt.f32.s32 %v748_v20  ;;  %v2576_v39 = vand.u32 2147483648, %v748_v20 }
 0x1c4   :  { %1328 = vst [vmem:[#allocation5 + $0x480] sm:$0xff] %v1136_v34  ;;  %v1137_v30 = vmul.f32 %v2562_v29, %v3020_v42  ;;  %v2566_v40 = vcvt.s32.f32 %v2565_v36  ;;  %vm4079_vm4 = vcmp.lt.f32.partialorder %v2571_v26, 8388608.0  ;;  %v749_v45 = vmul.f32 255.0, %v557_v22 }
 0x1c5   :  { %v2574_v43 = vcvt.s32.f32 %v2573_v38  ;;  %v750_v41 = vmul.f32 255.0, %v558_v23  ;;  %v751_v47 = vmul.f32 255.0, %v559_v24  ;;  %v368_v48 = vmax.f32 %v176_v35, 0.0 }
 0x1c6   :  { %1329 = vst [vmem:[#allocation5 + $0x488] sm:$0xff] %v1137_v30  ;;  %v2567_v49 = vand.u32 2147483647, %v2566_v40  ;;  %v2579_v50 = vand.u32 2147483647, %v749_v45  ;;  %v2581_v46 = vcvt.f32.s32 %v749_v45  ;;  %v2584_v51 = vand.u32 2147483648, %v749_v45 }
 0x1c7   :  { %v2575_v52 = vand.u32 2147483647, %v2574_v43  ;;  %v2587_v54 = vand.u32 2147483647, %v750_v41  ;;  %v2589_v56 = vcvt.f32.s32 %v750_v41  ;;  %v2592_v55 = vand.u32 2147483648, %v750_v41 }
 0x1c8   :  { %v2569_v53 = vor.u32 %v2568_v27, %v2567_v49  ;;  %vm4083_vm5 = vcmp.lt.f32.partialorder %v2579_v50, 8388608.0  ;;  %v2582_v57 = vcvt.s32.f32 %v2581_v46  ;;  %v2595_v59 = vand.u32 2147483647, %v751_v47  ;;  %v188_v50 = vld [vmem:[#allocation2 + $0x518] sm:$0xff] }
 0x1c9   :  { %v2577_v31 = vor.u32 %v2576_v39, %v2575_v52  ;;  %vm4087_vm6 = vcmp.lt.f32.partialorder %v2587_v54, 8388608.0  ;;  %v2590_v61 = vcvt.s32.f32 %v2589_v56  ;;  %v2597_v62 = vcvt.f32.s32 %v751_v47 }
 0x1ca   :  { %v2570_v1 = vsel %vm4074_vm3, %v2569_v53, %v747_v15  ;;  %v2583_v0 = vand.u32 2147483647, %v2582_v57  ;;  %vm4093_vm7 = vcmp.lt.f32.partialorder %v2595_v59, 8388608.0  ;;  %v2600_v3 = vand.u32 2147483648, %v751_v47 }
 0x1cb   :  { %v1138_v6 = vmul.f32 %v2570_v1, %v3020_v42  ;;  %v2578_v7 = vsel %vm4079_vm4, %v2577_v31, %v748_v20  ;;  %v2591_v8 = vand.u32 2147483647, %v2590_v61  ;;  %v2598_v9 = vcvt.s32.f32 %v2597_v62 }
 0x1cc   :  { %v1139_v11 = vmul.f32 %v2578_v7, %v3020_v42  ;;  %v2585_v12 = vor.u32 %v2584_v51, %v2583_v0  ;;  %v560_v13 = vmin.f32 %v368_v48, 1.0  ;;  %v369_v14 = vmax.f32 %v177_v63, 0.0  ;;  %v182_v0 = vld [vmem:[#allocation2 + $0x4e8] sm:$0xff] }
 0x1cd   :  { %1330 = vst [vmem:[#allocation5 + $0x490] sm:$0xff] %v1138_v6  ;;  %v2593_v16 = vor.u32 %v2592_v55, %v2591_v8  ;;  %v2599_v17 = vand.u32 2147483647, %v2598_v9  ;;  %v370_v18 = vmax.f32 %v178_v4, 0.0  ;;  %v371_v19 = vmax.f32 %v179_v5, 0.0 }
 0x1ce   :  { %1331 = vst [vmem:[#allocation5 + $0x498] sm:$0xff] %v1139_v11  ;;  %v2586_v15 = vsel %vm4083_vm5, %v2585_v12, %v749_v45  ;;  %v752_v21 = vmul.f32 255.0, %v560_v13  ;;  %v561_v22 = vmin.f32 %v369_v14, 1.0  ;;  %v372_v20 = vmax.f32 %v180_v10, 0.0  ;;  %v184_v11 = vld [vmem:[#allocation2 + $0x4f8] sm:$0xff] }
 0x1cf   :  { %v1140_v23 = vmul.f32 %v2586_v15, %v3020_v42  ;;  %v2594_v24 = vsel %vm4087_vm6, %v2593_v16, %v750_v41  ;;  %v2601_v25 = vor.u32 %v2600_v3, %v2599_v17  ;;  %v562_v28 = vmin.f32 %v370_v18, 1.0  ;;  %v185_v17 = vld [vmem:[#allocation2 + $0x500] sm:$0xff] }
 0x1d0   :  { %v1141_v32 = vmul.f32 %v2594_v24, %v3020_v42  ;;  %v2603_v33 = vand.u32 2147483647, %v752_v21  ;;  %v2605_v34 = vcvt.f32.s32 %v752_v21  ;;  %v2608_v36 = vand.u32 2147483648, %v752_v21 }
 0x1d1   :  { %1332 = vst [vmem:[#allocation5 + $0x4a0] sm:$0xff] %v1140_v23  ;;  %v2602_v27 = vsel %vm4093_vm7, %v2601_v25, %v751_v47  ;;  %v753_v26 = vmul.f32 255.0, %v561_v22  ;;  %v754_v35 = vmul.f32 255.0, %v562_v28  ;;  %v563_v29 = vmin.f32 %v371_v19, 1.0 }
 0x1d2   :  { %1333 = vst [vmem:[#allocation5 + $0x4a8] sm:$0xff] %v1141_v32  ;;  %v1142_v37 = vmul.f32 %v2602_v27, %v3020_v42  ;;  %vm4110_vm8 = vcmp.lt.f32.partialorder %v2603_v33, 8388608.0  ;;  %v2606_v39 = vcvt.s32.f32 %v2605_v34  ;;  %v564_v30 = vmin.f32 %v372_v20, 1.0 }
 0x1d3   :  { %v2611_v40 = vand.u32 2147483647, %v753_v26  ;;  %v2613_v44 = vcvt.f32.s32 %v753_v26  ;;  %v2616_v45 = vand.u32 2147483648, %v753_v26  ;;  %v2619_v43 = vand.u32 2147483647, %v754_v35 }
 0x1d4   :  { %1334 = vst [vmem:[#allocation5 + $0x4b0] sm:$0xff] %v1142_v37  ;;  %v2607_v41 = vand.u32 2147483647, %v2606_v39  ;;  %v2621_v48 = vcvt.f32.s32 %v754_v35  ;;  %v2624_v47 = vand.u32 2147483648, %v754_v35  ;;  %v755_v49 = vmul.f32 255.0, %v563_v29  ;;  %v186_v39 = vld [vmem:[#allocation2 + $0x508] sm:$0xff] }
 0x1d5   :  { %vm4114_vm9 = vcmp.lt.f32.partialorder %v2611_v40, 8388608.0  ;;  %v2614_v46 = vcvt.s32.f32 %v2613_v44  ;;  %vm4118_vm10 = vcmp.lt.f32.partialorder %v2619_v43, 8388608.0  ;;  %v756_v52 = vmul.f32 255.0, %v564_v30 }
 0x1d6   :  { %v2609_v54 = vor.u32 %v2608_v36, %v2607_v41  ;;  %v2622_v56 = vcvt.s32.f32 %v2621_v48  ;;  %v2627_v55 = vand.u32 2147483647, %v755_v49  ;;  %v2629_v53 = vcvt.f32.s32 %v755_v49 }
 0x1d7   :  { %v2615_v58 = vand.u32 2147483647, %v2614_v46  ;;  %v2632_v57 = vand.u32 2147483648, %v755_v49  ;;  %v2635_v59 = vand.u32 2147483647, %v756_v52  ;;  %v2637_v31 = vcvt.f32.s32 %v756_v52  ;;  %v192_v46 = vld [vmem:[#allocation2 + $0x538] sm:$0xff] }
 0x1d8   :  { %v2610_v61 = vsel %vm4110_vm8, %v2609_v54, %v752_v21  ;;  %v2623_v62 = vand.u32 2147483647, %v2622_v56  ;;  %vm4124_vm11 = vcmp.lt.f32.partialorder %v2627_v55, 8388608.0  ;;  %v2630_v1 = vcvt.s32.f32 %v2629_v53 }
 0x1d9   :  { %v1143_v3 = vmul.f32 %v2610_v61, %v3020_v42  ;;  %v2617_v4 = vor.u32 %v2616_v45, %v2615_v58  ;;  %vm4129_vm12 = vcmp.lt.f32.partialorder %v2635_v59, 8388608.0  ;;  %v2638_v6 = vcvt.s32.f32 %v2637_v31 }
 0x1da   :  { %v2625_v7 = vor.u32 %v2624_v47, %v2623_v62  ;;  %v2631_v8 = vand.u32 2147483647, %v2630_v1  ;;  %v2640_v9 = vand.u32 2147483648, %v756_v52  ;;  %v373_v10 = vmax.f32 %v181_v60, 0.0 }
 0x1db   :  { %1335 = vst [vmem:[#allocation5 + $0x4b8] sm:$0xff] %v1143_v3  ;;  %v2618_v12 = vsel %vm4114_vm9, %v2617_v4, %v753_v26  ;;  %v2639_v13 = vand.u32 2147483647, %v2638_v6  ;;  %v374_v14 = vmax.f32 %v182_v0, 0.0  ;;  %v375_v16 = vmax.f32 %v183_v2, 0.0 }
 0x1dc   :  { %v1144_v18 = vmul.f32 %v2618_v12, %v3020_v42  ;;  %v2626_v19 = vsel %vm4118_vm10, %v2625_v7, %v754_v35  ;;  %v2633_v15 = vor.u32 %v2632_v57, %v2631_v8  ;;  %v565_v21 = vmin.f32 %v373_v10, 1.0 }
 0x1dd   :  { %v1145_v22 = vmul.f32 %v2626_v19, %v3020_v42  ;;  %v2641_v20 = vor.u32 %v2640_v9, %v2639_v13  ;;  %v566_v23 = vmin.f32 %v374_v14, 1.0  ;;  %v567_v24 = vmin.f32 %v375_v16, 1.0  ;;  %v189_v13 = vld [vmem:[#allocation2 + $0x520] sm:$0xff] }
 0x1de   :  { %1336 = vst [vmem:[#allocation5 + $0x4c0] sm:$0xff] %v1144_v18  ;;  %v2634_v25 = vsel %vm4124_vm11, %v2633_v15, %v755_v49  ;;  %v757_v28 = vmul.f32 255.0, %v565_v21  ;;  %v376_v32 = vmax.f32 %v184_v11, 0.0  ;;  %v377_v33 = vmax.f32 %v185_v17, 0.0  ;;  %v187_v49 = vld [vmem:[#allocation2 + $0x510] sm:$0xff] }
 0x1df   :  { %1337 = vst [vmem:[#allocation5 + $0x4c8] sm:$0xff] %v1145_v22  ;;  %v1146_v34 = vmul.f32 %v2634_v25, %v3020_v42  ;;  %v2642_v36 = vsel %vm4129_vm12, %v2641_v20, %v756_v52  ;;  %v758_v27 = vmul.f32 255.0, %v566_v23  ;;  %v759_v26 = vmul.f32 255.0, %v567_v24  ;;  %v190_v20 = vld [vmem:[#allocation2 + $0x528] sm:$0xff] }
 0x1e0   :  { %v1147_v35 = vmul.f32 %v2642_v36, %v3020_v42  ;;  %v2643_v29 = vand.u32 2147483647, %v757_v28  ;;  %v2645_v37 = vcvt.f32.s32 %v757_v28  ;;  %v2648_v38 = vand.u32 2147483648, %v757_v28 }
 0x1e1   :  { %1338 = vst [vmem:[#allocation5 + $0x4d0] sm:$0xff] %v1146_v34  ;;  %v2651_v30 = vand.u32 2147483647, %v758_v27  ;;  %v2653_v40 = vcvt.f32.s32 %v758_v27  ;;  %v2656_v44 = vand.u32 2147483648, %v758_v27  ;;  %v2659_v45 = vand.u32 2147483647, %v759_v26 }
 0x1e2   :  { %1339 = vst [vmem:[#allocation5 + $0x4d8] sm:$0xff] %v1147_v35  ;;  %vm4145_vm13 = vcmp.lt.f32.partialorder %v2643_v29, 8388608.0  ;;  %v2646_v41 = vcvt.s32.f32 %v2645_v37  ;;  %v2661_v48 = vcvt.f32.s32 %v759_v26  ;;  %v2664_v47 = vand.u32 2147483648, %v759_v26 }
 0x1e3   :  { %vm4149_vm14 = vcmp.lt.f32.partialorder %v2651_v30, 8388608.0  ;;  %v2654_v51 = vcvt.s32.f32 %v2653_v40  ;;  %vm4153_vm15 = vcmp.lt.f32.partialorder %v2659_v45, 8388608.0  ;;  %v568_v54 = vmin.f32 %v376_v32, 1.0 }
 0x1e4   :  { %v2647_v56 = vand.u32 2147483647, %v2646_v41  ;;  %v2662_v55 = vcvt.s32.f32 %v2661_v48  ;;  %v569_v53 = vmin.f32 %v377_v33, 1.0  ;;  %v378_v58 = vmax.f32 %v186_v39, 0.0  ;;  %v191_v41 = vld [vmem:[#allocation2 + $0x530] sm:$0xff] }
 0x1e5   :  { %v2655_v57 = vand.u32 2147483647, %v2654_v51  ;;  %v760_v59 = vmul.f32 255.0, %v568_v54  ;;  %v379_v31 = vmax.f32 %v187_v49, 0.0  ;;  %v380_v60 = vmax.f32 %v188_v50, 0.0 }
 0x1e6   :  { %v2649_v61 = vor.u32 %v2648_v38, %v2647_v56  ;;  %v2663_v62 = vand.u32 2147483647, %v2662_v55  ;;  %v761_v63 = vmul.f32 255.0, %v569_v53  ;;  %v570_v1 = vmin.f32 %v378_v58, 1.0 }
 0x1e7   :  { %v2657_v0 = vor.u32 %v2656_v44, %v2655_v57  ;;  %v2667_v2 = vand.u32 2147483647, %v760_v59  ;;  %v2669_v3 = vcvt.f32.s32 %v760_v59  ;;  %v2672_v4 = vand.u32 2147483648, %v760_v59 }
 0x1e8   :  { %v2650_v5 = vsel %vm4145_vm13, %v2649_v61, %v757_v28  ;;  %v2665_v6 = vor.u32 %v2664_v47, %v2663_v62  ;;  %v2675_v7 = vand.u32 2147483647, %v761_v63  ;;  %v2677_v8 = vcvt.f32.s32 %v761_v63 }
 0x1e9   :  { %v1148_v9 = vmul.f32 %v2650_v5, %v3020_v42  ;;  %v2658_v10 = vsel %vm4149_vm14, %v2657_v0, %v758_v27  ;;  %vm4162_vm0 = vcmp.lt.f32.partialorder %v2667_v2, 8388608.0  ;;  %v2670_v12 = vcvt.s32.f32 %v2669_v3 }
 0x1ea   :  { %v1149_v14 = vmul.f32 %v2658_v10, %v3020_v42  ;;  %v2666_v16 = vsel %vm4153_vm15, %v2665_v6, %v759_v26  ;;  %vm4169_vm1 = vcmp.lt.f32.partialorder %v2675_v7, 8388608.0  ;;  %v2678_v18 = vcvt.s32.f32 %v2677_v8 }
 0x1eb   :  { %1340 = vst [vmem:[#allocation5 + $0x4e0] sm:$0xff] %v1148_v9  ;;  %v1150_v19 = vmul.f32 %v2666_v16, %v3020_v42  ;;  %v2671_v15 = vand.u32 2147483647, %v2670_v12  ;;  %v2680_v21 = vand.u32 2147483648, %v761_v63  ;;  %v762_v22 = vmul.f32 255.0, %v570_v1 }
 0x1ec   :  { %1341 = vst [vmem:[#allocation5 + $0x4e8] sm:$0xff] %v1149_v14  ;;  %v2679_v23 = vand.u32 2147483647, %v2678_v18  ;;  %v571_v24 = vmin.f32 %v379_v31, 1.0  ;;  %v572_v25 = vmin.f32 %v380_v60, 1.0  ;;  %v381_v28 = vmax.f32 %v189_v13, 0.0 }
 0x1ed   :  { %1342 = vst [vmem:[#allocation5 + $0x4f0] sm:$0xff] %v1150_v19  ;;  %v2673_v32 = vor.u32 %v2672_v4, %v2671_v15  ;;  %v2683_v33 = vand.u32 2147483647, %v762_v22  ;;  %v2685_v34 = vcvt.f32.s32 %v762_v22  ;;  %v2688_v36 = vand.u32 2147483648, %v762_v22 }
 0x1ee   :  { %v2681_v27 = vor.u32 %v2680_v21, %v2679_v23  ;;  %v763_v26 = vmul.f32 255.0, %v571_v24  ;;  %v764_v35 = vmul.f32 255.0, %v572_v25  ;;  %v573_v29 = vmin.f32 %v381_v28, 1.0  ;;  %v193_v28 = vld [vmem:[#allocation2 + $0x540] sm:$0xff] }
 0x1ef   :  { %v2674_v37 = vsel %vm4162_vm0, %v2673_v32, %v760_v59  ;;  %vm4176_vm2 = vcmp.lt.f32.partialorder %v2683_v33, 8388608.0  ;;  %v2686_v39 = vcvt.s32.f32 %v2685_v34  ;;  %v382_v30 = vmax.f32 %v190_v20, 0.0  ;;  %v194_v32 = vld [vmem:[#allocation2 + $0x548] sm:$0xff] }
 0x1f0   :  { %v1151_v40 = vmul.f32 %v2674_v37, %v3020_v42  ;;  %v2682_v44 = vsel %vm4169_vm1, %v2681_v27, %v761_v63  ;;  %v2691_v45 = vand.u32 2147483647, %v763_v26  ;;  %v2693_v43 = vcvt.f32.s32 %v763_v26 }
 0x1f1   :  { %v1152_v48 = vmul.f32 %v2682_v44, %v3020_v42  ;;  %v2687_v47 = vand.u32 2147483647, %v2686_v39  ;;  %v2696_v49 = vand.u32 2147483648, %v763_v26  ;;  %v2699_v50 = vand.u32 2147483647, %v764_v35  ;;  %v196_v39 = vld [vmem:[#allocation2 + $0x558] sm:$0xff] }
 0x1f2   :  { %1343 = vst [vmem:[#allocation5 + $0x4f8] sm:$0xff] %v1151_v40  ;;  %vm4184_vm3 = vcmp.lt.f32.partialorder %v2691_v45, 8388608.0  ;;  %v2694_v52 = vcvt.s32.f32 %v2693_v43  ;;  %v2701_v54 = vcvt.f32.s32 %v764_v35  ;;  %v2704_v56 = vand.u32 2147483648, %v764_v35 }
 0x1f3   :  { %1344 = vst [vmem:[#allocation5 + $0x500] sm:$0xff] %v1152_v48  ;;  %v2689_v55 = vor.u32 %v2688_v36, %v2687_v47  ;;  %vm4188_vm4 = vcmp.lt.f32.partialorder %v2699_v50, 8388608.0  ;;  %v765_v58 = vmul.f32 255.0, %v573_v29  ;;  %v574_v57 = vmin.f32 %v382_v30, 1.0  ;;  %v197_v30 = vld [vmem:[#allocation2 + $0x560] sm:$0xff] }
 0x1f4   :  { %v2695_v59 = vand.u32 2147483647, %v2694_v52  ;;  %v2702_v31 = vcvt.s32.f32 %v2701_v54  ;;  %v383_v60 = vmax.f32 %v191_v41, 0.0  ;;  %v384_v61 = vmax.f32 %v192_v46, 0.0 }
 0x1f5   :  { %v2690_v62 = vsel %vm4176_vm2, %v2689_v55, %v762_v22  ;;  %v2707_v63 = vand.u32 2147483647, %v765_v58  ;;  %v2709_v1 = vcvt.f32.s32 %v765_v58  ;;  %v2712_v0 = vand.u32 2147483648, %v765_v58 }
 0x1f6   :  { %v1153_v2 = vmul.f32 %v2690_v62, %v3020_v42  ;;  %v2697_v3 = vor.u32 %v2696_v49, %v2695_v59  ;;  %v2703_v4 = vand.u32 2147483647, %v2702_v31  ;;  %v766_v5 = vmul.f32 255.0, %v574_v57 }
 0x1f7   :  { %vm4195_vm5 = vcmp.lt.f32.partialorder %v2707_v63, 8388608.0  ;;  %v2710_v7 = vcvt.s32.f32 %v2709_v1  ;;  %v575_v8 = vmin.f32 %v383_v60, 1.0  ;;  %v576_v9 = vmin.f32 %v384_v61, 1.0 }
 0x1f8   :  { %1345 = vst [vmem:[#allocation5 + $0x508] sm:$0xff] %v1153_v2  ;;  %v2698_v10 = vsel %vm4184_vm3, %v2697_v3, %v763_v26  ;;  %v2705_v11 = vor.u32 %v2704_v56, %v2703_v4  ;;  %v2715_v12 = vand.u32 2147483647, %v766_v5  ;;  %v2717_v13 = vcvt.f32.s32 %v766_v5  ;;  %v195_v26 = vld [vmem:[#allocation2 + $0x550] sm:$0xff] }
 0x1f9   :  { %v1154_v14 = vmul.f32 %v2698_v10, %v3020_v42  ;;  %v2711_v16 = vand.u32 2147483647, %v2710_v7  ;;  %v2720_v17 = vand.u32 2147483648, %v766_v5  ;;  %v767_v18 = vmul.f32 255.0, %v575_v8 }
 0x1fa   :  { %v2706_v19 = vsel %vm4188_vm4, %v2705_v11, %v764_v35  ;;  %vm4204_vm6 = vcmp.lt.f32.partialorder %v2715_v12, 8388608.0  ;;  %v2718_v21 = vcvt.s32.f32 %v2717_v13  ;;  %v768_v22 = vmul.f32 255.0, %v576_v9 }
 0x1fb   :  { %1346 = vst [vmem:[#allocation5 + $0x510] sm:$0xff] %v1154_v14  ;;  %v1155_v20 = vmul.f32 %v2706_v19, %v3020_v42  ;;  %v2713_v23 = vor.u32 %v2712_v0, %v2711_v16  ;;  %v2723_v24 = vand.u32 2147483647, %v767_v18  ;;  %v2725_v25 = vcvt.f32.s32 %v767_v18 }
 0x1fc   :  { %v2719_v33 = vand.u32 2147483647, %v2718_v21  ;;  %v2728_v34 = vand.u32 2147483648, %v767_v18  ;;  %v2731_v36 = vand.u32 2147483647, %v768_v22  ;;  %v2733_v27 = vcvt.f32.s32 %v768_v22 }
 0x1fd   :  { %1347 = vst [vmem:[#allocation5 + $0x518] sm:$0xff] %v1155_v20  ;;  %v2714_v35 = vsel %vm4195_vm5, %v2713_v23, %v765_v58  ;;  %vm4211_vm7 = vcmp.lt.f32.partialorder %v2723_v24, 8388608.0  ;;  %v2726_v37 = vcvt.s32.f32 %v2725_v25  ;;  %v2736_v38 = vand.u32 2147483648, %v768_v22  ;;  %v198_v58 = vld [vmem:[#allocation2 + $0x568] sm:$0xff]  ;;  %v199_v24 = vld [vmem:[#allocation2 + $0x570] sm:$0xff] }
 0x1fe   :  { %v1156_v40 = vmul.f32 %v2714_v35, %v3020_v42  ;;  %v2721_v44 = vor.u32 %v2720_v17, %v2719_v33  ;;  %vm4216_vm8 = vcmp.lt.f32.partialorder %v2731_v36, 8388608.0  ;;  %v2734_v43 = vcvt.s32.f32 %v2733_v27 }
 0x1ff   :  { %v2727_v41 = vand.u32 2147483647, %v2726_v37  ;;  %v385_v48 = vmax.f32 %v193_v28, 0.0  ;;  %v386_v47 = vmax.f32 %v194_v32, 0.0  ;;  %v387_v49 = vmax.f32 %v195_v26, 0.0 }
 0x200   :  { %1348 = vst [vmem:[#allocation5 + $0x520] sm:$0xff] %v1156_v40  ;;  %v2722_v50 = vsel %vm4204_vm6, %v2721_v44, %v766_v5  ;;  %v2735_v46 = vand.u32 2147483647, %v2734_v43  ;;  %v388_v51 = vmax.f32 %v196_v39, 0.0  ;;  %v389_v52 = vmax.f32 %v197_v30, 0.0 }
 0x201   :  { %v1157_v54 = vmul.f32 %v2722_v50, %v3020_v42  ;;  %v2729_v56 = vor.u32 %v2728_v34, %v2727_v41  ;;  %v577_v55 = vmin.f32 %v385_v48, 1.0  ;;  %v578_v53 = vmin.f32 %v386_v47, 1.0  ;;  %v200_v47 = vld [vmem:[#allocation2 + $0x578] sm:$0xff] }
 0x202   :  { %v2737_v57 = vor.u32 %v2736_v38, %v2735_v46  ;;  %v579_v59 = vmin.f32 %v387_v49, 1.0  ;;  %v580_v31 = vmin.f32 %v388_v51, 1.0  ;;  %v581_v63 = vmin.f32 %v389_v52, 1.0  ;;  %v201_v52 = vld [vmem:[#allocation2 + $0x580] sm:$0xff] }
 0x203   :  { %1349 = vst [vmem:[#allocation5 + $0x528] sm:$0xff] %v1157_v54  ;;  %v2730_v60 = vsel %vm4211_vm7, %v2729_v56, %v767_v18  ;;  %v769_v61 = vmul.f32 255.0, %v577_v55  ;;  %v770_v62 = vmul.f32 255.0, %v578_v53  ;;  %v390_v3 = vmax.f32 %v198_v58, 0.0  ;;  %v202_v54 = vld [vmem:[#allocation2 + $0x588] sm:$0xff] }
 0x204   :  { %v1158_v1 = vmul.f32 %v2730_v60, %v3020_v42  ;;  %v2738_v0 = vsel %vm4216_vm8, %v2737_v57, %v768_v22  ;;  %v771_v2 = vmul.f32 255.0, %v579_v59  ;;  %v772_v7 = vmul.f32 255.0, %v580_v31  ;;  %v203_v57 = vld [vmem:[#allocation2 + $0x590] sm:$0xff] }
 0x205   :  { %v1159_v4 = vmul.f32 %v2738_v0, %v3020_v42  ;;  %v2739_v5 = vand.u32 2147483647, %v769_v61  ;;  %v2741_v6 = vcvt.f32.s32 %v769_v61  ;;  %v2744_v8 = vand.u32 2147483648, %v769_v61 }
 0x206   :  { %1350 = vst [vmem:[#allocation5 + $0x530] sm:$0xff] %v1158_v1  ;;  %v2747_v9 = vand.u32 2147483647, %v770_v62  ;;  %v2749_v10 = vcvt.f32.s32 %v770_v62  ;;  %v2755_v11 = vand.u32 2147483647, %v771_v2  ;;  %v2752_v14 = vand.u32 2147483648, %v770_v62 }
 0x207   :  { %1351 = vst [vmem:[#allocation5 + $0x538] sm:$0xff] %v1159_v4  ;;  %vm4229_vm9 = vcmp.lt.f32.partialorder %v2739_v5, 8388608.0  ;;  %v2742_v13 = vcvt.s32.f32 %v2741_v6  ;;  %v2757_v16 = vcvt.f32.s32 %v771_v2  ;;  %v2760_v19 = vand.u32 2147483648, %v771_v2 }
 0x208   :  { %vm4233_vm10 = vcmp.lt.f32.partialorder %v2747_v9, 8388608.0  ;;  %v2750_v18 = vcvt.s32.f32 %v2749_v10  ;;  %v2763_v15 = vand.u32 2147483647, %v772_v7  ;;  %vm4237_vm11 = vcmp.lt.f32.partialorder %v2755_v11, 8388608.0 }
 0x209   :  { %v2743_v21 = vand.u32 2147483647, %v2742_v13  ;;  %v2758_v20 = vcvt.s32.f32 %v2757_v16  ;;  %v2765_v23 = vcvt.f32.s32 %v772_v7  ;;  %v2768_v28 = vand.u32 2147483648, %v772_v7 }
 0x20a   :  { %v2751_v25 = vand.u32 2147483647, %v2750_v18  ;;  %v773_v32 = vmul.f32 255.0, %v581_v63  ;;  %v582_v33 = vmin.f32 %v390_v3, 1.0  ;;  %vm4241_vm12 = vcmp.lt.f32.partialorder %v2763_v15, 8388608.0 }
 0x20b   :  { %v2745_v34 = vor.u32 %v2744_v8, %v2743_v21  ;;  %v2759_v36 = vand.u32 2147483647, %v2758_v20  ;;  %v2766_v26 = vcvt.s32.f32 %v2765_v23  ;;  %v391_v38 = vmax.f32 %v199_v24, 0.0 }
 0x20c   :  { %v2753_v35 = vor.u32 %v2752_v14, %v2751_v25  ;;  %v2771_v29 = vand.u32 2147483647, %v773_v32  ;;  %v2773_v37 = vcvt.f32.s32 %v773_v32  ;;  %v774_v44 = vmul.f32 255.0, %v582_v33 }
 0x20d   :  { %v2746_v39 = vsel %vm4229_vm9, %v2745_v34, %v769_v61  ;;  %v2761_v30 = vor.u32 %v2760_v19, %v2759_v36  ;;  %v2767_v40 = vand.u32 2147483647, %v2766_v26  ;;  %v2776_v48 = vand.u32 2147483648, %v773_v32 }
 0x20e   :  { %v1160_v45 = vmul.f32 %v2746_v39, %v3020_v42  ;;  %v2754_v43 = vsel %vm4233_vm10, %v2753_v35, %v770_v62  ;;  %v2774_v41 = vcvt.s32.f32 %v2773_v37  ;;  %vm4253_vm13 = vcmp.lt.f32.partialorder %v2771_v29, 8388608.0  ;;  %v204_v62 = vld [vmem:[#allocation2 + $0x598] sm:$0xff] }
 0x20f   :  { %v1161_v49 = vmul.f32 %v2754_v43, %v3020_v42  ;;  %v2762_v50 = vsel %vm4237_vm11, %v2761_v30, %v771_v2  ;;  %v2769_v46 = vor.u32 %v2768_v28, %v2767_v40  ;;  %v2779_v53 = vand.u32 2147483647, %v774_v44 }
 0x210   :  { %1352 = vst [vmem:[#allocation5 + $0x540] sm:$0xff] %v1160_v45  ;;  %v1162_v56 = vmul.f32 %v2762_v50, %v3020_v42  ;;  %v2775_v55 = vand.u32 2147483647, %v2774_v41  ;;  %v2781_v58 = vcvt.f32.s32 %v774_v44  ;;  %v2784_v31 = vand.u32 2147483648, %v774_v44  ;;  %v205_v50 = vld [vmem:[#allocation2 + $0x5a0] sm:$0xff] }
 0x211   :  { %1353 = vst [vmem:[#allocation5 + $0x548] sm:$0xff] %v1161_v49  ;;  %v2770_v59 = vsel %vm4241_vm12, %v2769_v46, %v772_v7  ;;  %v583_v60 = vmin.f32 %v391_v38, 1.0  ;;  %v392_v61 = vmax.f32 %v200_v47, 0.0  ;;  %v393_v2 = vmax.f32 %v201_v52, 0.0 }
 0x212   :  { %1354 = vst [vmem:[#allocation5 + $0x550] sm:$0xff] %v1162_v56  ;;  %v1163_v63 = vmul.f32 %v2770_v59, %v3020_v42  ;;  %v2777_v1 = vor.u32 %v2776_v48, %v2775_v55  ;;  %v2782_v0 = vcvt.s32.f32 %v2781_v58  ;;  %v394_v5 = vmax.f32 %v202_v54, 0.0  ;;  %v206_v56 = vld [vmem:[#allocation2 + $0x5a8] sm:$0xff] }
 0x213   :  { %v775_v3 = vmul.f32 255.0, %v583_v60  ;;  %v584_v4 = vmin.f32 %v392_v61, 1.0  ;;  %v395_v6 = vmax.f32 %v203_v57, 0.0  ;;  %v585_v7 = vmin.f32 %v393_v2, 1.0  ;;  %v207_v2 = vld [vmem:[#allocation2 + $0x5b0] sm:$0xff] }
 0x214   :  { %1355 = vst [vmem:[#allocation5 + $0x558] sm:$0xff] %v1163_v63  ;;  %v2778_v8 = vsel %vm4253_vm13, %v2777_v1, %v773_v32  ;;  %v2783_v9 = vand.u32 2147483647, %v2782_v0  ;;  %v396_v10 = vmax.f32 %v204_v62, 0.0  ;;  %vm4264_vm14 = vcmp.lt.f32.partialorder %v2779_v53, 8388608.0 }
 0x215   :  { %v1164_v11 = vmul.f32 %v2778_v8, %v3020_v42  ;;  %v2787_v13 = vand.u32 2147483647, %v775_v3  ;;  %v2789_v14 = vcvt.f32.s32 %v775_v3  ;;  %v776_v17 = vmul.f32 255.0, %v584_v4 }
 0x216   :  { %v2785_v16 = vor.u32 %v2784_v31, %v2783_v9  ;;  %v777_v18 = vmul.f32 255.0, %v585_v7  ;;  %v586_v19 = vmin.f32 %v394_v5, 1.0  ;;  %v2792_v22 = vand.u32 2147483648, %v775_v3 }
 0x217   :  { %1356 = vst [vmem:[#allocation5 + $0x560] sm:$0xff] %v1164_v11  ;;  %vm4268_vm15 = vcmp.lt.f32.partialorder %v2787_v13, 8388608.0  ;;  %v2790_v21 = vcvt.s32.f32 %v2789_v14  ;;  %v587_v20 = vmin.f32 %v395_v6, 1.0  ;;  %v2795_v24 = vand.u32 2147483647, %v776_v17  ;;  %v208_v11 = vld [vmem:[#allocation2 + $0x5b8] sm:$0xff] }
 0x218   :  { %v2786_v23 = vsel %vm4264_vm14, %v2785_v16, %v774_v44  ;;  %v2797_v25 = vcvt.f32.s32 %v776_v17  ;;  %v588_v28 = vmin.f32 %v396_v10, 1.0  ;;  %v2803_v34 = vand.u32 2147483647, %v777_v18 }
 0x219   :  { %v1165_v32 = vmul.f32 %v2786_v23, %v3020_v42  ;;  %v2791_v33 = vand.u32 2147483647, %v2790_v21  ;;  %v2805_v36 = vcvt.f32.s32 %v777_v18  ;;  %vm4275_vm0 = vcmp.lt.f32.partialorder %v2795_v24, 8388608.0 }
 0x21a   :  { %v2798_v26 = vcvt.s32.f32 %v2797_v25  ;;  %v2800_v35 = vand.u32 2147483648, %v776_v17  ;;  %v778_v29 = vmul.f32 255.0, %v586_v19  ;;  %v2808_v39 = vand.u32 2147483648, %v777_v18 }
 0x21b   :  { %1357 = vst [vmem:[#allocation5 + $0x568] sm:$0xff] %v1165_v32  ;;  %v2793_v37 = vor.u32 %v2792_v22, %v2791_v33  ;;  %v2806_v38 = vcvt.s32.f32 %v2805_v36  ;;  %v779_v30 = vmul.f32 255.0, %v587_v20  ;;  %vm4279_vm1 = vcmp.lt.f32.partialorder %v2803_v34, 8388608.0 }
 0x21c   :  { %v2799_v40 = vand.u32 2147483647, %v2798_v26  ;;  %v2811_v45 = vand.u32 2147483647, %v778_v29  ;;  %v2813_v43 = vcvt.f32.s32 %v778_v29  ;;  %v2816_v47 = vand.u32 2147483648, %v778_v29 }
 0x21d   :  { %v2794_v41 = vsel %vm4268_vm15, %v2793_v37, %v775_v3  ;;  %v2807_v48 = vand.u32 2147483647, %v2806_v38  ;;  %v2821_v49 = vcvt.f32.s32 %v779_v30  ;;  %v2819_v54 = vand.u32 2147483647, %v779_v30  ;;  %v209_v38 = vld [vmem:[#allocation2 + $0x5c0] sm:$0xff] }
 0x21e   :  { %v1166_v46 = vmul.f32 %v2794_v41, %v3020_v42  ;;  %v2801_v51 = vor.u32 %v2800_v35, %v2799_v40  ;;  %v2814_v52 = vcvt.s32.f32 %v2813_v43  ;;  %vm4286_vm2 = vcmp.lt.f32.partialorder %v2811_v45, 8388608.0  ;;  %v216_v41 = vld [vmem:[#allocation2 + $0x5f8] sm:$0xff] }
 0x21f   :  { %v2809_v55 = vor.u32 %v2808_v39, %v2807_v48  ;;  %v2822_v58 = vcvt.s32.f32 %v2821_v49  ;;  %v2824_v57 = vand.u32 2147483648, %v779_v30  ;;  %v780_v60 = vmul.f32 255.0, %v588_v28 }
 0x220   :  { %1358 = vst [vmem:[#allocation5 + $0x570] sm:$0xff] %v1166_v46  ;;  %v2802_v59 = vsel %vm4275_vm0, %v2801_v51, %v776_v17  ;;  %v2815_v31 = vand.u32 2147483647, %v2814_v52  ;;  %v397_v61 = vmax.f32 %v205_v50, 0.0  ;;  %v398_v0 = vmax.f32 %v206_v56, 0.0  ;;  %v211_v52 = vld [vmem:[#allocation2 + $0x5d0] sm:$0xff] }
 0x221   :  { %v1167_v62 = vmul.f32 %v2802_v59, %v3020_v42  ;;  %v2810_v63 = vsel %vm4279_vm1, %v2809_v55, %v777_v18  ;;  %v2823_v1 = vand.u32 2147483647, %v2822_v58  ;;  %vm4296_vm3 = vcmp.lt.f32.partialorder %v2819_v54, 8388608.0 }
 0x222   :  { %v1168_v3 = vmul.f32 %v2810_v63, %v3020_v42  ;;  %v2817_v4 = vor.u32 %v2816_v47, %v2815_v31  ;;  %v2829_v6 = vcvt.f32.s32 %v780_v60  ;;  %v2827_v9 = vand.u32 2147483647, %v780_v60  ;;  %v210_v47 = vld [vmem:[#allocation2 + $0x5c8] sm:$0xff] }
 0x223   :  { %1359 = vst [vmem:[#allocation5 + $0x578] sm:$0xff] %v1167_v62  ;;  %v2825_v8 = vor.u32 %v2824_v57, %v2823_v1  ;;  %v589_v7 = vmin.f32 %v397_v61, 1.0  ;;  %v590_v10 = vmin.f32 %v398_v0, 1.0  ;;  %v2832_v14 = vand.u32 2147483648, %v780_v60 }
 0x224   :  { %1360 = vst [vmem:[#allocation5 + $0x580] sm:$0xff] %v1168_v3  ;;  %v2818_v12 = vsel %vm4286_vm2, %v2817_v4, %v778_v29  ;;  %v2830_v13 = vcvt.s32.f32 %v2829_v6  ;;  %v399_v16 = vmax.f32 %v207_v2, 0.0  ;;  %v400_v23 = vmax.f32 %v208_v11, 0.0 }
 0x225   :  { %v1169_v17 = vmul.f32 %v2818_v12, %v3020_v42  ;;  %v2826_v18 = vsel %vm4296_vm3, %v2825_v8, %v779_v30  ;;  %v781_v19 = vmul.f32 255.0, %v589_v7  ;;  %v782_v15 = vmul.f32 255.0, %v590_v10  ;;  %v213_v7 = vld [vmem:[#allocation2 + $0x5e0] sm:$0xff] }
 0x226   :  { %v1170_v21 = vmul.f32 %v2826_v18, %v3020_v42  ;;  %v2831_v22 = vand.u32 2147483647, %v2830_v13  ;;  %v591_v20 = vmin.f32 %v399_v16, 1.0  ;;  %vm4306_vm4 = vcmp.lt.f32.partialorder %v2827_v9, 8388608.0  ;;  %v212_v9 = vld [vmem:[#allocation2 + $0x5d8] sm:$0xff] }
 0x227   :  { %1361 = vst [vmem:[#allocation5 + $0x588] sm:$0xff] %v1169_v17  ;;  %v2835_v25 = vand.u32 2147483647, %v781_v19  ;;  %v2837_v28 = vcvt.f32.s32 %v781_v19  ;;  %v2843_v32 = vand.u32 2147483647, %v782_v15  ;;  %v2840_v34 = vand.u32 2147483648, %v781_v19 }
 0x228   :  { %1362 = vst [vmem:[#allocation5 + $0x590] sm:$0xff] %v1170_v21  ;;  %v2833_v33 = vor.u32 %v2832_v14, %v2831_v22  ;;  %v2845_v36 = vcvt.f32.s32 %v782_v15  ;;  %v783_v27 = vmul.f32 255.0, %v591_v20  ;;  %v2848_v29 = vand.u32 2147483648, %v782_v15 }
 0x229   :  { %vm4310_vm5 = vcmp.lt.f32.partialorder %v2835_v25, 8388608.0  ;;  %v2838_v35 = vcvt.s32.f32 %v2837_v28  ;;  %v592_v37 = vmin.f32 %v400_v23, 1.0  ;;  %vm4317_vm6 = vcmp.lt.f32.partialorder %v2843_v32, 8388608.0 }
 0x22a   :  { %v2834_v39 = vsel %vm4306_vm4, %v2833_v33, %v780_v60  ;;  %v2846_v30 = vcvt.s32.f32 %v2845_v36  ;;  %v2851_v40 = vand.u32 2147483647, %v783_v27  ;;  %v2853_v44 = vcvt.f32.s32 %v783_v27 }
 0x22b   :  { %v1171_v45 = vmul.f32 %v2834_v39, %v3020_v42  ;;  %v2839_v43 = vand.u32 2147483647, %v2838_v35  ;;  %v784_v48 = vmul.f32 255.0, %v592_v37  ;;  %v2856_v46 = vand.u32 2147483648, %v783_v27  ;;  %v214_v35 = vld [vmem:[#allocation2 + $0x5e8] sm:$0xff] }
 0x22c   :  { %v2847_v49 = vand.u32 2147483647, %v2846_v30  ;;  %v2854_v50 = vcvt.s32.f32 %v2853_v44  ;;  %v401_v51 = vmax.f32 %v209_v38, 0.0  ;;  %vm4321_vm7 = vcmp.lt.f32.partialorder %v2851_v40, 8388608.0  ;;  %v215_v30 = vld [vmem:[#allocation2 + $0x5f0] sm:$0xff] }
 0x22d   :  { %1363 = vst [vmem:[#allocation5 + $0x598] sm:$0xff] %v1171_v45  ;;  %v2841_v54 = vor.u32 %v2840_v34, %v2839_v43  ;;  %v2859_v55 = vand.u32 2147483647, %v784_v48  ;;  %v2861_v53 = vcvt.f32.s32 %v784_v48  ;;  %v402_v31 = vmax.f32 %v210_v47, 0.0 }
 0x22e   :  { %v2849_v58 = vor.u32 %v2848_v29, %v2847_v49  ;;  %v2855_v57 = vand.u32 2147483647, %v2854_v50  ;;  %v593_v59 = vmin.f32 %v401_v51, 1.0  ;;  %v2864_v62 = vand.u32 2147483648, %v784_v48 }
 0x22f   :  { %v2842_v60 = vsel %vm4310_vm5, %v2841_v54, %v781_v19  ;;  %v2862_v61 = vcvt.s32.f32 %v2861_v53  ;;  %v403_v63 = vmax.f32 %v211_v52, 0.0  ;;  %v594_v6 = vmin.f32 %v402_v31, 1.0 }
 0x230   :  { %v1172_v1 = vmul.f32 %v2842_v60, %v3020_v42  ;;  %v2850_v0 = vsel %vm4317_vm6, %v2849_v58, %v782_v15  ;;  %v2857_v2 = vor.u32 %v2856_v46, %v2855_v57  ;;  %v785_v3 = vmul.f32 255.0, %v593_v59 }
 0x231   :  { %v1173_v4 = vmul.f32 %v2850_v0, %v3020_v42  ;;  %v2863_v5 = vand.u32 2147483647, %v2862_v61  ;;  %v595_v8 = vmin.f32 %v403_v63, 1.0  ;;  %vm4333_vm8 = vcmp.lt.f32.partialorder %v2859_v55, 8388608.0 }
 0x232   :  { %1364 = vst [vmem:[#allocation5 + $0x5a0] sm:$0xff] %v1172_v1  ;;  %v2858_v10 = vsel %vm4321_vm7, %v2857_v2, %v783_v27  ;;  %v2867_v12 = vand.u32 2147483647, %v785_v3  ;;  %v2869_v13 = vcvt.f32.s32 %v785_v3  ;;  %v786_v17 = vmul.f32 255.0, %v594_v6 }
 0x233   :  { %1365 = vst [vmem:[#allocation5 + $0x5a8] sm:$0xff] %v1173_v4  ;;  %v1174_v14 = vmul.f32 %v2858_v10, %v3020_v42  ;;  %v2865_v16 = vor.u32 %v2864_v62, %v2863_v5  ;;  %v787_v18 = vmul.f32 255.0, %v595_v8  ;;  %v2872_v15 = vand.u32 2147483648, %v785_v3 }
 0x234   :  { %v2870_v19 = vcvt.s32.f32 %v2869_v13  ;;  %v404_v21 = vmax.f32 %v212_v9, 0.0  ;;  %v405_v22 = vmax.f32 %v213_v7, 0.0  ;;  %v2875_v23 = vand.u32 2147483647, %v786_v17 }
 0x235   :  { %1366 = vst [vmem:[#allocation5 + $0x5b0] sm:$0xff] %v1174_v14  ;;  %v2866_v20 = vsel %vm4333_vm8, %v2865_v16, %v784_v48  ;;  %v2877_v24 = vcvt.f32.s32 %v786_v17  ;;  %v2883_v32 = vand.u32 2147483647, %v787_v18  ;;  %v2885_v33 = vcvt.f32.s32 %v787_v18 }
 0x236   :  { %v1175_v25 = vmul.f32 %v2866_v20, %v3020_v42  ;;  %v2871_v28 = vand.u32 2147483647, %v2870_v19  ;;  %vm4341_vm9 = vcmp.lt.f32.partialorder %v2867_v12, 8388608.0  ;;  %v2880_v27 = vand.u32 2147483648, %v786_v17 }
 0x237   :  { %v2878_v36 = vcvt.s32.f32 %v2877_v24  ;;  %v596_v26 = vmin.f32 %v404_v21, 1.0  ;;  %v2886_v37 = vcvt.s32.f32 %v2885_v33  ;;  %v2888_v38 = vand.u32 2147483648, %v787_v18 }
 0x238   :  { %1367 = vst [vmem:[#allocation5 + $0x5b8] sm:$0xff] %v1175_v25  ;;  %v2873_v29 = vor.u32 %v2872_v15, %v2871_v28  ;;  %v597_v39 = vmin.f32 %v405_v22, 1.0  ;;  %vm4345_vm10 = vcmp.lt.f32.partialorder %v2875_v23, 8388608.0  ;;  %vm4349_vm11 = vcmp.lt.f32.partialorder %v2883_v32, 8388608.0 }
 0x239   :  { %v2879_v44 = vand.u32 2147483647, %v2878_v36  ;;  %v788_v43 = vmul.f32 255.0, %v596_v26  ;;  %v2887_v47 = vand.u32 2147483647, %v2886_v37  ;;  %v406_v50 = vmax.f32 %v214_v35, 0.0 }
 0x23a   :  { %v2874_v48 = vsel %vm4341_vm9, %v2873_v29, %v785_v3  ;;  %v789_v49 = vmul.f32 255.0, %v597_v39  ;;  %v407_v54 = vmax.f32 %v215_v30, 0.0  ;;  %v408_v58 = vmax.f32 %v216_v41, 0.0 }
 0x23b   :  { %v1176_v46 = vmul.f32 %v2874_v48, %v3020_v42  ;;  %v2881_v51 = vor.u32 %v2880_v27, %v2879_v44  ;;  %v2893_v52 = vcvt.f32.s32 %v788_v43  ;;  %v2889_v56 = vor.u32 %v2888_v38, %v2887_v47 }
 0x23c   :  { %v2891_v55 = vand.u32 2147483647, %v788_v43  ;;  %v2901_v53 = vcvt.f32.s32 %v789_v49  ;;  %v2896_v31 = vand.u32 2147483648, %v788_v43  ;;  %v2899_v60 = vand.u32 2147483647, %v789_v49 }
 0x23d   :  { %1368 = vst [vmem:[#allocation5 + $0x5c0] sm:$0xff] %v1176_v46  ;;  %v2882_v57 = vsel %vm4345_vm10, %v2881_v51, %v786_v17  ;;  %v2894_v59 = vcvt.s32.f32 %v2893_v52  ;;  %v2890_v62 = vsel %vm4349_vm11, %v2889_v56, %v787_v18  ;;  %v2904_v1 = vand.u32 2147483648, %v789_v49 }
 0x23e   :  { %v1177_v61 = vmul.f32 %v2882_v57, %v3020_v42  ;;  %v2902_v63 = vcvt.s32.f32 %v2901_v53  ;;  %v1178_v0 = vmul.f32 %v2890_v62, %v3020_v42  ;;  %v598_v3 = vmin.f32 %v406_v50, 1.0 }
 0x23f   :  { %v2895_v2 = vand.u32 2147483647, %v2894_v59  ;;  %v599_v4 = vmin.f32 %v407_v54, 1.0  ;;  %vm2892_vm12 = vcmp.lt.f32.partialorder %v2891_v55, 8388608.0  ;;  %v600_v6 = vmin.f32 %v408_v58, 1.0 }
 0x240   :  { %1369 = vst [vmem:[#allocation5 + $0x5c8] sm:$0xff] %v1177_v61  ;;  %v2903_v5 = vand.u32 2147483647, %v2902_v63  ;;  %vm2900_vm13 = vcmp.lt.f32.partialorder %v2899_v60, 8388608.0  ;;  %v790_v9 = vmul.f32 255.0, %v598_v3 }
 0x241   :  { %1370 = vst [vmem:[#allocation5 + $0x5d0] sm:$0xff] %v1178_v0  ;;  %v2897_v8 = vor.u32 %v2896_v31, %v2895_v2  ;;  %v791_v7 = vmul.f32 255.0, %v599_v4  ;;  %v792_v11 = vmul.f32 255.0, %v600_v6 }
 0x242   :  { %v2905_v10 = vor.u32 %v2904_v1, %v2903_v5  ;;  %v2909_v13 = vcvt.f32.s32 %v790_v9  ;;  %v2907_v17 = vand.u32 2147483647, %v790_v9  ;;  %v2912_v21 = vand.u32 2147483648, %v790_v9 }
 0x243   :  { %v2898_v12 = vsel %vm2892_vm12, %v2897_v8, %v788_v43  ;;  %v2917_v18 = vcvt.f32.s32 %v791_v7  ;;  %v2915_v22 = vand.u32 2147483647, %v791_v7  ;;  %v2920_v23 = vand.u32 2147483648, %v791_v7 }
 0x244   :  { %v1179_v14 = vmul.f32 %v2898_v12, %v3020_v42  ;;  %v2906_v16 = vsel %vm2900_vm13, %v2905_v10, %v789_v49  ;;  %v2910_v15 = vcvt.s32.f32 %v2909_v13  ;;  %v2925_v24 = vcvt.f32.s32 %v792_v11 }
 0x245   :  { %v1180_v19 = vmul.f32 %v2906_v16, %v3020_v42  ;;  %v2918_v20 = vcvt.s32.f32 %v2917_v18  ;;  %v2923_v28 = vand.u32 2147483647, %v792_v11  ;;  %vm2908_vm14 = vcmp.lt.f32.partialorder %v2907_v17, 8388608.0 }
 0x246   :  { %1371 = vst [vmem:[#allocation5 + $0x5d8] sm:$0xff] %v1179_v14  ;;  %v2911_v25 = vand.u32 2147483647, %v2910_v15  ;;  %v2926_v33 = vcvt.s32.f32 %v2925_v24  ;;  %v2928_v34 = vand.u32 2147483648, %v792_v11  ;;  %vm2916_vm15 = vcmp.lt.f32.partialorder %v2915_v22, 8388608.0 }
 0x247   :  { %1372 = vst [vmem:[#allocation5 + $0x5e0] sm:$0xff] %v1180_v19  ;;  %v2919_v32 = vand.u32 2147483647, %v2918_v20  ;;  %vm2924_vm0 = vcmp.lt.f32.partialorder %v2923_v28, 8388608.0 }
 0x248   :  { %v2913_v36 = vor.u32 %v2912_v21, %v2911_v25  ;;  %v2927_v26 = vand.u32 2147483647, %v2926_v33 }
 0x249   :  { %v2921_v27 = vor.u32 %v2920_v23, %v2919_v32 }
 0x24a   :  { %v2914_v35 = vsel %vm2908_vm14, %v2913_v36, %v790_v9  ;;  %v2929_v38 = vor.u32 %v2928_v34, %v2927_v26 }
 0x24b   :  { %v1181_v29 = vmul.f32 %v2914_v35, %v3020_v42  ;;  %v2922_v37 = vsel %vm2916_vm15, %v2921_v27, %v791_v7 }
 0x24c   :  { %v1182_v39 = vmul.f32 %v2922_v37, %v3020_v42  ;;  %v2930_v30 = vsel %vm2924_vm0, %v2929_v38, %v792_v11 }
 0x24d   :  { %1373 = vst [vmem:[#allocation5 + $0x5e8] sm:$0xff] %v1181_v29  ;;  %v1183_v40 = vmul.f32 %v2930_v30, %v3020_v42 }
 0x24e   :  { %1374 = vst [vmem:[#allocation5 + $0x5f0] sm:$0xff] %v1182_v39 }
 0x24f   :  { %1375 = vst [vmem:[#allocation5 + $0x5f8] sm:$0xff] %v1183_v40 }
 0x250   :  { %1388 = dma.vmem_to_hbm [thread:$0]  %s1381_s13, 24576, %s1383_s16, [#allocation4], %s2991_s11, %s2991_s11, %s2992_s12  }
 0x251   :  { %2988 = dma.done.wait [#allocation4], 24576  }
 0x252   :  { %2989 = vsyncadd [#allocation4], 4294942720 }
 0x253   :  { %1393 = vsyncpa [#allocation3], 1 }
 0x254   :  { %1394 = vsyncpa [#allocation4], 1 }

</bundles_post_ra>
